<compile_context>
chip_gen: v5e
topology: v5e:2x2
jax: 0.10.0
libtpu: 0.0.40
codegen_flags: <defaults>
</compile_context>

<pallas_src>
import functools

import jax
import jax.numpy as jnp
from jax.experimental import pallas as pl
from jax.experimental.pallas import tpu as pltpu


def _bn_kernel(x_ref, gb_ref, o_ref, *, eps, inv_count):
    # x_ref:  (N, C_tile, HW)  -- channels on sublanes, HW on lanes.
    # gb_ref: (2, C_tile, 1)   -- row 0 = gamma, row 1 = beta.
    x = x_ref[...].astype(jnp.float32)

    # One-pass sufficient statistics over batch + spatial axes (0 and 2).
    s1 = jnp.sum(x, axis=(0, 2), keepdims=True)        # (1, C_tile, 1)
    s2 = jnp.sum(x * x, axis=(0, 2), keepdims=True)    # (1, C_tile, 1)
    mean = s1 * inv_count
    # Clamp: E[x^2] - E[x]^2 can go slightly negative in f32 (cancellation).
    var = jnp.maximum(s2 * inv_count - mean * mean, 0.0)

    inv = jax.lax.rsqrt(var + eps)                      # (1, C_tile, 1)
    gamma = gb_ref[0:1, :, :].astype(jnp.float32)       # (1, C_tile, 1)
    beta = gb_ref[1:2, :, :].astype(jnp.float32)        # (1, C_tile, 1)

    # Fold per-channel constants: out = x * scale + shift (2 VALU ops / elem).
    scale = gamma * inv
    shift = beta - mean * scale
    o_ref[...] = (x * scale + shift).astype(o_ref.dtype)


def _default_channel_tiles(c):
    """4 channel tiles by default (gives the BlockSpec pipeline DMA/compute
    overlap on v5e/v6e); 8 on 2-TensorCore (v7x-class) chips so each core
    still gets >=2 pipelined grid steps after megacore sharding."""
    try:
        kind = jax.devices()[0].device_kind.lower()
    except Exception:
        kind = ""
    two_tc = ("v7" in kind) or ("tpu7" in kind) or ("tpu v7" in kind)
    tiles = 8 if two_tc else 4
    # Fall back gracefully so c_tile stays a positive multiple of 8.
    while tiles > 1 and (c % tiles != 0 or (c // tiles) % 8 != 0):
        tiles //= 2
    return max(tiles, 1)


def batchnorm2d(x_nchw, gamma, beta, *, eps=1e-3, channel_tiles=None):
    """Training-mode BatchNorm2d forward over an NCHW input.

    x_nchw: (N, C, H, W) float32
    gamma, beta: (C,) float32
    Returns (N, C, H, W) float32.
    """
    n, c, h, w = x_nchw.shape
    hw = h * w
    count = n * hw  # true reduction count (lane padding is masked by Mosaic)

    if channel_tiles is None:
        channel_tiles = _default_channel_tiles(c)
    if channel_tiles < 1 or c % channel_tiles != 0 or (c // channel_tiles) % 8 != 0:
        channel_tiles = 1
    c_tile = c // channel_tiles

    # Free reshapes only -- no HBM transposes.
    x3d = x_nchw.reshape(n, c, hw)
    # Single stacked parameter operand: one small DMA per grid step.
    gb = jnp.stack([gamma, beta]).reshape(2, c, 1)

    out3d = pl.pallas_call(
        functools.partial(_bn_kernel, eps=float(eps), inv_count=1.0 / count),
        out_shape=jax.ShapeDtypeStruct((n, c, hw), x_nchw.dtype),
        grid=(channel_tiles,),
        in_specs=[
            pl.BlockSpec((n, c_tile, hw), lambda i: (0, i, 0)),
            pl.BlockSpec((2, c_tile, 1), lambda i: (0, i, 0)),
        ],
        out_specs=pl.BlockSpec((n, c_tile, hw), lambda i: (0, i, 0)),
        # "parallel": channel tiles are independent; on 2-TC chips this axis
        # shards across TensorCores while each core keeps >=2 pipelined steps.
        # TODO(synk): if a profiler shows the axis is not megacore-sharded on
        # v7x, switch this axis to pltpu.CORE_PARALLEL / pl.core_map.
        compiler_params=pltpu.CompilerParams(
            dimension_semantics=("parallel",)),
    )(x3d, gb)

    # (N, C, H*W) -> (N, C, H, W): free reshape.
    return out3d.reshape(n, c, h, w)


def _reference(x_nchw, gamma, beta, eps=1e-3):
    mean = jnp.mean(x_nchw, axis=(0, 2, 3), keepdims=True)
    var = jnp.mean((x_nchw - mean) ** 2, axis=(0, 2, 3), keepdims=True)
    g = gamma.reshape(1, -1, 1, 1)
    b = beta.reshape(1, -1, 1, 1)
    return (x_nchw - mean) * jax.lax.rsqrt(var + eps) * g + b


if __name__ == "__main__":
    key = jax.random.PRNGKey(0)
    kx, kg, kb = jax.random.split(key, 3)

    N, C, H, W = 1, 2304, 7, 7  # shape implied by the module / input x735
    x = jax.random.normal(kx, (N, C, H, W), dtype=jnp.float32)
    # Deterministic, non-trivial affine parameters (module init shapes: (C,)).
    gamma = 1.0 + 0.1 * jax.random.normal(kg, (C,), dtype=jnp.float32)
    beta = 0.1 * jax.random.normal(kb, (C,), dtype=jnp.float32)

    # TODO(synk): running_mean / running_var updates (momentum=0.01) are not
    # produced; only the normalized forward output (as returned by M.forward).
    out = batchnorm2d(x, gamma, beta, eps=1e-3)
    out = jax.block_until_ready(out)

    ref = _reference(x, gamma, beta, eps=1e-3)
    assert out.shape == (N, C, H, W)
    assert jnp.allclose(out, ref, atol=1e-4, rtol=1e-4)
    print("KERNEL_OK")
</pallas_src>

<mosaic_0001>
module attributes {stable_mosaic.version = 11 : i64} {
  func.func @_bn_kernel(%arg0: i32, %arg1: memref<1x576x49xf32, #tpu.memory_space<vmem>>, %arg2: memref<2x576x1xf32, #tpu.memory_space<vmem>>, %arg3: memref<1x576x49xf32, #tpu.memory_space<vmem>>) attributes {dimension_semantics = [#tpu.dimension_semantics<parallel>], iteration_bounds = array<i64: 4>, scalar_prefetch = 0 : i64, scratch_operands = 0 : i64, tpu.core_type = #tpu.core_type<tc>, window_params = [{transform_indices = @transform_0, window_bounds = array<i64: 1, 576, 49>}, {transform_indices = @transform_1, window_bounds = array<i64: 2, 576, 1>}, {transform_indices = @transform_2, window_bounds = array<i64: 1, 576, 49>}]} {
    %c0 = arith.constant 0 : index
    %c0_0 = arith.constant 0 : index
    %c0_1 = arith.constant 0 : index
    %0 = vector.load %arg1[%c0, %c0_0, %c0_1] : memref<1x576x49xf32, #tpu.memory_space<vmem>>, vector<1x576x49xf32>
    %cst = arith.constant dense<0.000000e+00> : vector<576xf32>
    %1 = vector.multi_reduction <add>, %0, %cst [0, 2] : vector<1x576x49xf32> to vector<576xf32>
    %2 = vector.shape_cast %1 : vector<576xf32> to vector<1x576x1xf32>
    %3 = arith.mulf %0, %0 : vector<1x576x49xf32>
    %cst_2 = arith.constant dense<0.000000e+00> : vector<576xf32>
    %4 = vector.multi_reduction <add>, %3, %cst_2 [0, 2] : vector<1x576x49xf32> to vector<576xf32>
    %5 = vector.shape_cast %4 : vector<576xf32> to vector<1x576x1xf32>
    %cst_3 = arith.constant 0.0204081628 : f32
    %6 = vector.broadcast %cst_3 : f32 to vector<1x576x1xf32>
    %7 = arith.mulf %2, %6 : vector<1x576x1xf32>
    %cst_4 = arith.constant 0.0204081628 : f32
    %8 = vector.broadcast %cst_4 : f32 to vector<1x576x1xf32>
    %9 = arith.mulf %5, %8 : vector<1x576x1xf32>
    %10 = arith.mulf %7, %7 : vector<1x576x1xf32>
    %11 = arith.subf %9, %10 : vector<1x576x1xf32>
    %cst_5 = arith.constant 0.000000e+00 : f32
    %12 = vector.broadcast %cst_5 : f32 to vector<1x576x1xf32>
    %13 = arith.maximumf %11, %12 : vector<1x576x1xf32>
    %cst_6 = arith.constant 1.000000e-03 : f32
    %14 = vector.broadcast %cst_6 : f32 to vector<1x576x1xf32>
    %15 = arith.addf %13, %14 : vector<1x576x1xf32>
    %16 = math.rsqrt %15 : vector<1x576x1xf32>
    %c0_7 = arith.constant 0 : index
    %c0_8 = arith.constant 0 : index
    %c0_9 = arith.constant 0 : index
    %17 = vector.load %arg2[%c0_7, %c0_8, %c0_9] : memref<2x576x1xf32, #tpu.memory_space<vmem>>, vector<1x576x1xf32>
    %c1 = arith.constant 1 : index
    %c0_10 = arith.constant 0 : index
    %c0_11 = arith.constant 0 : index
    %18 = vector.load %arg2[%c1, %c0_10, %c0_11] : memref<2x576x1xf32, #tpu.memory_space<vmem>>, vector<1x576x1xf32>
    %19 = arith.mulf %17, %16 : vector<1x576x1xf32>
    %20 = arith.mulf %7, %19 : vector<1x576x1xf32>
    %21 = arith.subf %18, %20 : vector<1x576x1xf32>
    %22 = vector.broadcast %19 : vector<1x576x1xf32> to vector<1x576x49xf32>
    %23 = arith.mulf %0, %22 : vector<1x576x49xf32>
    %24 = vector.broadcast %21 : vector<1x576x1xf32> to vector<1x576x49xf32>
    %25 = arith.addf %23, %24 : vector<1x576x49xf32>
    %c0_12 = arith.constant 0 : index
    %c0_13 = arith.constant 0 : index
    %c0_14 = arith.constant 0 : index
    %26 = vector.load %arg3[%c0_12, %c0_13, %c0_14] : memref<1x576x49xf32, #tpu.memory_space<vmem>>, vector<1x576x49xf32>
    tpu.vector_store %arg3[%c0_12, %c0_13, %c0_14], %25 {strides = array<i32>} : memref<1x576x49xf32, #tpu.memory_space<vmem>>, vector<1x576x49xf32>,
    return
  }
  func.func @transform_0(%arg0: i32) -> (i32, i32, i32) {
    %c0_i32 = arith.constant 0 : i32
    %c0_i32_0 = arith.constant 0 : i32
    %c0_i32_1 = arith.constant 0 : i32
    return %c0_i32, %arg0, %c0_i32_0 : i32, i32, i32
  }
  func.func @transform_1(%arg0: i32) -> (i32, i32, i32) {
    %c0_i32 = arith.constant 0 : i32
    %c0_i32_0 = arith.constant 0 : i32
    %c0_i32_1 = arith.constant 0 : i32
    return %c0_i32, %arg0, %c0_i32_0 : i32, i32, i32
  }
  func.func @transform_2(%arg0: i32) -> (i32, i32, i32) {
    %c0_i32 = arith.constant 0 : i32
    %c0_i32_0 = arith.constant 0 : i32
    %c0_i32_1 = arith.constant 0 : i32
    return %c0_i32, %arg0, %c0_i32_0 : i32, i32, i32
  }
}

</mosaic_0001>

<bundles_post_ra>
// kernel: tpu_custom_call.1
= control target key start
LH: loop header
LB: loop body
LE: loop exit
PB: predicated region body
PF: predicated region fallthrough
CT: control target
= control target key end

     0   :  { %s4245_s9 = smov 0   ;;  %s4247_s10 = smov 0   ;;  %s8700_s0 = inlined_call_operand.vmem [shape: f32[1,2304,49], index: 0, kind: input, shape index: {}]   ;;  %s8701_s1 = inlined_call_operand.vmem [shape: f32[2,2304,1], index: 1, kind: input, shape index: {}]   ;;  %s8702_s2 = inlined_call_operand.vmem [shape: f32[1,2304,49], index: 2, kind: output, shape index: {}]  }
   0x1   :  { %s4249_s11 = smov 0  }
   0x2 LB: > { %s3876_s12 = sadd.s32 4294967295, %s4227_s11   ;;  %s4262_s13 = sadd.s32 1, %s4227_s11   ;;  %s4227_s11 = sphi %s4249_s11, %s9596_s11   ;;  %s4223_s10 = sphi %s4247_s10, %s9595_s10   ;;  %s4219_s9 = sphi %s4245_s9, %s9594_s9  }
   0x3   : > { %s42_s14 = ssub.s32 %s4227_s11, %s4262_s13  ;;  %s45_s15 = sadd.s32 1, %s4223_s10 }
   0x4   : > { %p43_p0 = scmp.eq.s32.totalorder %s42_s14, 0  ;;  %p52_p1 = scmp.ne.s32.totalorder %s4223_s10, %s4219_s9 }
   0x5   : > { %p53_p2 = scmp.eq.s32.totalorder %s4227_s11, 0  ;;  %p3879_p4 = scmp.ge.s32.totalorder %s4227_s11, 4 }
   0x6   : > { %s4271_s16 = scalar_select %p43_p0, %s4223_s10, %s45_s15  }
   0x7   : > { %p54_p3 = por %p53_p2, %p52_p1  ;;  %104 = sbr.rel (%p3879_p4) target bundleno = 161 (0xa1), region = 16 }
   0xc   : > { %116 = sbr.rel (!%p54_p3) target bundleno = 161 (0xa1), region = 24  ;;  %s118_s17 = sand.u32 (%p54_p3), 1, %s4223_s10  }
   0xd   : > { %s3958_s18 = smul.u32 (%p54_p3), 576, %s4227_s11 }
   0xe   : > { %s3959_s19 = smul.u32 (%p54_p3), 1152, %s118_s17 }
   0xf   : > { %s4279_s22 = scalar_lea.vmem (%p54_p3), %s8701_s1, %s3958_s18 }
  0x10   : > { %v438_v0 = vld [vmem:[%s4279_s22] sm:$0xff] (%p54_p3)  ;;  %v440_v1 = vld [vmem:[%s4279_s22 + $0x8] sm:$0xff] (%p54_p3)  ;;  %v442_v2 = vld [vmem:[%s4279_s22 + $0x10] sm:$0xff] (%p54_p3)  ;;  %s4284_s23 = scalar_lea.vmem (%p54_p3), [#allocation2], %s3959_s19 }
  0x11   : > { %439 = vst [vmem:[%s4284_s23] sm:$0xff] %v438_v0  ;;  %v444_v3 = vld [vmem:[%s4279_s22 + $0x18] sm:$0xff]  ;;  %v446_v4 = vld [vmem:[%s4279_s22 + $0x20] sm:$0xff]  ;;  %v448_v5 = vld [vmem:[%s4279_s22 + $0x28] sm:$0xff] }
  0x12   : > { %441 = vst [vmem:[%s4284_s23 + $0x8] sm:$0xff] %v440_v1  ;;  %v450_v6 = vld [vmem:[%s4279_s22 + $0x30] sm:$0xff]  ;;  %v452_v7 = vld [vmem:[%s4279_s22 + $0x38] sm:$0xff]  ;;  %v454_v8 = vld [vmem:[%s4279_s22 + $0x40] sm:$0xff] }
  0x13   : > { %443 = vst [vmem:[%s4284_s23 + $0x10] sm:$0xff] %v442_v2  ;;  %v456_v9 = vld [vmem:[%s4279_s22 + $0x48] sm:$0xff]  ;;  %v458_v10 = vld [vmem:[%s4279_s22 + $0x50] sm:$0xff]  ;;  %v460_v11 = vld [vmem:[%s4279_s22 + $0x58] sm:$0xff] }
  0x14   : > { %445 = vst [vmem:[%s4284_s23 + $0x18] sm:$0xff] %v444_v3  ;;  %v462_v12 = vld [vmem:[%s4279_s22 + $0x60] sm:$0xff]  ;;  %v464_v13 = vld [vmem:[%s4279_s22 + $0x68] sm:$0xff]  ;;  %v466_v14 = vld [vmem:[%s4279_s22 + $0x70] sm:$0xff] }
  0x15   : > { %447 = vst [vmem:[%s4284_s23 + $0x20] sm:$0xff] %v446_v4  ;;  %v468_v15 = vld [vmem:[%s4279_s22 + $0x78] sm:$0xff]  ;;  %v470_v16 = vld [vmem:[%s4279_s22 + $0x80] sm:$0xff]  ;;  %v472_v17 = vld [vmem:[%s4279_s22 + $0x88] sm:$0xff] }
  0x16   : > { %449 = vst [vmem:[%s4284_s23 + $0x28] sm:$0xff] %v448_v5  ;;  %v474_v18 = vld [vmem:[%s4279_s22 + $0x90] sm:$0xff]  ;;  %v476_v19 = vld [vmem:[%s4279_s22 + $0x98] sm:$0xff]  ;;  %v478_v20 = vld [vmem:[%s4279_s22 + $0xa0] sm:$0xff] }
  0x17   : > { %451 = vst [vmem:[%s4284_s23 + $0x30] sm:$0xff] %v450_v6  ;;  %v480_v21 = vld [vmem:[%s4279_s22 + $0xa8] sm:$0xff]  ;;  %v482_v22 = vld [vmem:[%s4279_s22 + $0xb0] sm:$0xff]  ;;  %v484_v23 = vld [vmem:[%s4279_s22 + $0xb8] sm:$0xff] }
  0x18   : > { %453 = vst [vmem:[%s4284_s23 + $0x38] sm:$0xff] %v452_v7  ;;  %v486_v24 = vld [vmem:[%s4279_s22 + $0xc0] sm:$0xff]  ;;  %v488_v25 = vld [vmem:[%s4279_s22 + $0xc8] sm:$0xff]  ;;  %v490_v26 = vld [vmem:[%s4279_s22 + $0xd0] sm:$0xff] }
  0x19   : > { %455 = vst [vmem:[%s4284_s23 + $0x40] sm:$0xff] %v454_v8  ;;  %v492_v27 = vld [vmem:[%s4279_s22 + $0xd8] sm:$0xff]  ;;  %v494_v28 = vld [vmem:[%s4279_s22 + $0xe0] sm:$0xff]  ;;  %v496_v29 = vld [vmem:[%s4279_s22 + $0xe8] sm:$0xff] }
  0x1a   : > { %457 = vst [vmem:[%s4284_s23 + $0x48] sm:$0xff] %v456_v9  ;;  %v498_v30 = vld [vmem:[%s4279_s22 + $0xf0] sm:$0xff]  ;;  %v500_v31 = vld [vmem:[%s4279_s22 + $0xf8] sm:$0xff]  ;;  %v502_v32 = vld [vmem:[%s4279_s22 + $0x100] sm:$0xff] }
  0x1b   : > { %459 = vst [vmem:[%s4284_s23 + $0x50] sm:$0xff] %v458_v10  ;;  %v504_v33 = vld [vmem:[%s4279_s22 + $0x108] sm:$0xff]  ;;  %v506_v34 = vld [vmem:[%s4279_s22 + $0x110] sm:$0xff]  ;;  %v508_v35 = vld [vmem:[%s4279_s22 + $0x118] sm:$0xff] }
  0x1c   : > { %461 = vst [vmem:[%s4284_s23 + $0x58] sm:$0xff] %v460_v11  ;;  %v510_v36 = vld [vmem:[%s4279_s22 + $0x120] sm:$0xff]  ;;  %v512_v37 = vld [vmem:[%s4279_s22 + $0x128] sm:$0xff]  ;;  %v514_v38 = vld [vmem:[%s4279_s22 + $0x130] sm:$0xff] }
  0x1d   : > { %463 = vst [vmem:[%s4284_s23 + $0x60] sm:$0xff] %v462_v12  ;;  %v516_v39 = vld [vmem:[%s4279_s22 + $0x138] sm:$0xff]  ;;  %v518_v40 = vld [vmem:[%s4279_s22 + $0x140] sm:$0xff]  ;;  %v520_v41 = vld [vmem:[%s4279_s22 + $0x148] sm:$0xff] }
  0x1e   : > { %465 = vst [vmem:[%s4284_s23 + $0x68] sm:$0xff] %v464_v13  ;;  %v522_v42 = vld [vmem:[%s4279_s22 + $0x150] sm:$0xff]  ;;  %v524_v43 = vld [vmem:[%s4279_s22 + $0x158] sm:$0xff]  ;;  %v526_v44 = vld [vmem:[%s4279_s22 + $0x160] sm:$0xff] }
  0x1f   : > { %467 = vst [vmem:[%s4284_s23 + $0x70] sm:$0xff] %v466_v14  ;;  %v528_v45 = vld [vmem:[%s4279_s22 + $0x168] sm:$0xff]  ;;  %v530_v46 = vld [vmem:[%s4279_s22 + $0x170] sm:$0xff]  ;;  %v532_v47 = vld [vmem:[%s4279_s22 + $0x178] sm:$0xff] }
  0x20   : > { %469 = vst [vmem:[%s4284_s23 + $0x78] sm:$0xff] %v468_v15  ;;  %v534_v48 = vld [vmem:[%s4279_s22 + $0x180] sm:$0xff]  ;;  %v536_v49 = vld [vmem:[%s4279_s22 + $0x188] sm:$0xff]  ;;  %v538_v50 = vld [vmem:[%s4279_s22 + $0x190] sm:$0xff] }
  0x21   : > { %471 = vst [vmem:[%s4284_s23 + $0x80] sm:$0xff] %v470_v16  ;;  %v540_v51 = vld [vmem:[%s4279_s22 + $0x198] sm:$0xff]  ;;  %v542_v52 = vld [vmem:[%s4279_s22 + $0x1a0] sm:$0xff]  ;;  %v544_v53 = vld [vmem:[%s4279_s22 + $0x1a8] sm:$0xff] }
  0x22   : > { %473 = vst [vmem:[%s4284_s23 + $0x88] sm:$0xff] %v472_v17  ;;  %v546_v54 = vld [vmem:[%s4279_s22 + $0x1b0] sm:$0xff]  ;;  %v548_v55 = vld [vmem:[%s4279_s22 + $0x1b8] sm:$0xff]  ;;  %v550_v56 = vld [vmem:[%s4279_s22 + $0x1c0] sm:$0xff] }
  0x23   : > { %475 = vst [vmem:[%s4284_s23 + $0x90] sm:$0xff] %v474_v18  ;;  %v552_v57 = vld [vmem:[%s4279_s22 + $0x1c8] sm:$0xff]  ;;  %v554_v58 = vld [vmem:[%s4279_s22 + $0x1d0] sm:$0xff]  ;;  %v556_v59 = vld [vmem:[%s4279_s22 + $0x1d8] sm:$0xff] }
  0x24   : > { %477 = vst [vmem:[%s4284_s23 + $0x98] sm:$0xff] %v476_v19  ;;  %v558_v60 = vld [vmem:[%s4279_s22 + $0x1e0] sm:$0xff]  ;;  %v560_v61 = vld [vmem:[%s4279_s22 + $0x1e8] sm:$0xff]  ;;  %v562_v62 = vld [vmem:[%s4279_s22 + $0x1f0] sm:$0xff] }
  0x25   : > { %479 = vst [vmem:[%s4284_s23 + $0xa0] sm:$0xff] %v478_v20  ;;  %v564_v63 = vld [vmem:[%s4279_s22 + $0x1f8] sm:$0xff]  ;;  %v566_v0 = vld [vmem:[%s4279_s22 + $0x200] sm:$0xff]  ;;  %v568_v1 = vld [vmem:[%s4279_s22 + $0x208] sm:$0xff] }
  0x26   : > { %481 = vst [vmem:[%s4284_s23 + $0xa8] sm:$0xff] %v480_v21  ;;  %v570_v2 = vld [vmem:[%s4279_s22 + $0x210] sm:$0xff]  ;;  %v572_v3 = vld [vmem:[%s4279_s22 + $0x218] sm:$0xff]  ;;  %v574_v4 = vld [vmem:[%s4279_s22 + $0x220] sm:$0xff] }
  0x27   : > { %483 = vst [vmem:[%s4284_s23 + $0xb0] sm:$0xff] %v482_v22  ;;  %v576_v5 = vld [vmem:[%s4279_s22 + $0x228] sm:$0xff]  ;;  %v578_v6 = vld [vmem:[%s4279_s22 + $0x230] sm:$0xff]  ;;  %v580_v7 = vld [vmem:[%s4279_s22 + $0x238] sm:$0xff] }
  0x28   : > { %485 = vst [vmem:[%s4284_s23 + $0xb8] sm:$0xff] %v484_v23  ;;  %v582_v8 = vld [vmem:[%s4279_s22 + $0x900] sm:$0xff]  ;;  %v584_v9 = vld [vmem:[%s4279_s22 + $0x908] sm:$0xff]  ;;  %v586_v10 = vld [vmem:[%s4279_s22 + $0x910] sm:$0xff] }
  0x29   : > { %487 = vst [vmem:[%s4284_s23 + $0xc0] sm:$0xff] %v486_v24  ;;  %v588_v11 = vld [vmem:[%s4279_s22 + $0x918] sm:$0xff]  ;;  %v590_v12 = vld [vmem:[%s4279_s22 + $0x920] sm:$0xff]  ;;  %v592_v13 = vld [vmem:[%s4279_s22 + $0x928] sm:$0xff] }
  0x2a   : > { %489 = vst [vmem:[%s4284_s23 + $0xc8] sm:$0xff] %v488_v25  ;;  %v594_v14 = vld [vmem:[%s4279_s22 + $0x930] sm:$0xff]  ;;  %v596_v15 = vld [vmem:[%s4279_s22 + $0x938] sm:$0xff]  ;;  %v598_v16 = vld [vmem:[%s4279_s22 + $0x940] sm:$0xff] }
  0x2b   : > { %491 = vst [vmem:[%s4284_s23 + $0xd0] sm:$0xff] %v490_v26  ;;  %v600_v17 = vld [vmem:[%s4279_s22 + $0x948] sm:$0xff]  ;;  %v602_v18 = vld [vmem:[%s4279_s22 + $0x950] sm:$0xff]  ;;  %v604_v19 = vld [vmem:[%s4279_s22 + $0x958] sm:$0xff] }
  0x2c   : > { %493 = vst [vmem:[%s4284_s23 + $0xd8] sm:$0xff] %v492_v27  ;;  %v606_v20 = vld [vmem:[%s4279_s22 + $0x960] sm:$0xff]  ;;  %v608_v21 = vld [vmem:[%s4279_s22 + $0x968] sm:$0xff]  ;;  %v610_v22 = vld [vmem:[%s4279_s22 + $0x970] sm:$0xff] }
  0x2d   : > { %495 = vst [vmem:[%s4284_s23 + $0xe0] sm:$0xff] %v494_v28  ;;  %v612_v23 = vld [vmem:[%s4279_s22 + $0x978] sm:$0xff]  ;;  %v614_v24 = vld [vmem:[%s4279_s22 + $0x980] sm:$0xff]  ;;  %v616_v25 = vld [vmem:[%s4279_s22 + $0x988] sm:$0xff] }
  0x2e   : > { %497 = vst [vmem:[%s4284_s23 + $0xe8] sm:$0xff] %v496_v29  ;;  %v618_v26 = vld [vmem:[%s4279_s22 + $0x990] sm:$0xff]  ;;  %v620_v27 = vld [vmem:[%s4279_s22 + $0x998] sm:$0xff]  ;;  %v622_v28 = vld [vmem:[%s4279_s22 + $0x9a0] sm:$0xff] }
  0x2f   : > { %499 = vst [vmem:[%s4284_s23 + $0xf0] sm:$0xff] %v498_v30  ;;  %v624_v29 = vld [vmem:[%s4279_s22 + $0x9a8] sm:$0xff]  ;;  %v626_v30 = vld [vmem:[%s4279_s22 + $0x9b0] sm:$0xff] }
  0x30   : > { %501 = vst [vmem:[%s4284_s23 + $0xf8] sm:$0xff] %v500_v31  ;;  %v628_v31 = vld [vmem:[%s4279_s22 + $0x9b8] sm:$0xff] }
  0x31   : > { %503 = vst [vmem:[%s4284_s23 + $0x100] sm:$0xff] %v502_v32  ;;  %v630_v32 = vld [vmem:[%s4279_s22 + $0x9c0] sm:$0xff] }
  0x32   : > { %505 = vst [vmem:[%s4284_s23 + $0x108] sm:$0xff] %v504_v33  ;;  %v632_v33 = vld [vmem:[%s4279_s22 + $0x9c8] sm:$0xff] }
  0x33   : > { %507 = vst [vmem:[%s4284_s23 + $0x110] sm:$0xff] %v506_v34  ;;  %v634_v34 = vld [vmem:[%s4279_s22 + $0x9d0] sm:$0xff] }
  0x34   : > { %509 = vst [vmem:[%s4284_s23 + $0x118] sm:$0xff] %v508_v35  ;;  %v636_v35 = vld [vmem:[%s4279_s22 + $0x9d8] sm:$0xff] }
  0x35   : > { %511 = vst [vmem:[%s4284_s23 + $0x120] sm:$0xff] %v510_v36  ;;  %v638_v36 = vld [vmem:[%s4279_s22 + $0x9e0] sm:$0xff] }
  0x36   : > { %513 = vst [vmem:[%s4284_s23 + $0x128] sm:$0xff] %v512_v37  ;;  %v640_v37 = vld [vmem:[%s4279_s22 + $0x9e8] sm:$0xff] }
  0x37   : > { %515 = vst [vmem:[%s4284_s23 + $0x130] sm:$0xff] %v514_v38  ;;  %v642_v38 = vld [vmem:[%s4279_s22 + $0x9f0] sm:$0xff] }
  0x38   : > { %517 = vst [vmem:[%s4284_s23 + $0x138] sm:$0xff] %v516_v39  ;;  %v644_v39 = vld [vmem:[%s4279_s22 + $0x9f8] sm:$0xff] }
  0x39   : > { %519 = vst [vmem:[%s4284_s23 + $0x140] sm:$0xff] %v518_v40  ;;  %v646_v40 = vld [vmem:[%s4279_s22 + $0xa00] sm:$0xff] }
  0x3a   : > { %521 = vst [vmem:[%s4284_s23 + $0x148] sm:$0xff] %v520_v41  ;;  %v648_v41 = vld [vmem:[%s4279_s22 + $0xa08] sm:$0xff] }
  0x3b   : > { %523 = vst [vmem:[%s4284_s23 + $0x150] sm:$0xff] %v522_v42  ;;  %v650_v42 = vld [vmem:[%s4279_s22 + $0xa10] sm:$0xff] }
  0x3c   : > { %525 = vst [vmem:[%s4284_s23 + $0x158] sm:$0xff] %v524_v43  ;;  %v652_v43 = vld [vmem:[%s4279_s22 + $0xa18] sm:$0xff] }
  0x3d   : > { %527 = vst [vmem:[%s4284_s23 + $0x160] sm:$0xff] %v526_v44  ;;  %v654_v44 = vld [vmem:[%s4279_s22 + $0xa20] sm:$0xff] }
  0x3e   : > { %529 = vst [vmem:[%s4284_s23 + $0x168] sm:$0xff] %v528_v45  ;;  %v656_v45 = vld [vmem:[%s4279_s22 + $0xa28] sm:$0xff] }
  0x3f   : > { %531 = vst [vmem:[%s4284_s23 + $0x170] sm:$0xff] %v530_v46  ;;  %v658_v46 = vld [vmem:[%s4279_s22 + $0xa30] sm:$0xff] }
  0x40   : > { %533 = vst [vmem:[%s4284_s23 + $0x178] sm:$0xff] %v532_v47  ;;  %v660_v47 = vld [vmem:[%s4279_s22 + $0xa38] sm:$0xff] }
  0x41   : > { %535 = vst [vmem:[%s4284_s23 + $0x180] sm:$0xff] %v534_v48  ;;  %v662_v48 = vld [vmem:[%s4279_s22 + $0xa40] sm:$0xff] }
  0x42   : > { %537 = vst [vmem:[%s4284_s23 + $0x188] sm:$0xff] %v536_v49  ;;  %v664_v49 = vld [vmem:[%s4279_s22 + $0xa48] sm:$0xff] }
  0x43   : > { %539 = vst [vmem:[%s4284_s23 + $0x190] sm:$0xff] %v538_v50  ;;  %v666_v50 = vld [vmem:[%s4279_s22 + $0xa50] sm:$0xff] }
  0x44   : > { %541 = vst [vmem:[%s4284_s23 + $0x198] sm:$0xff] %v540_v51  ;;  %v668_v51 = vld [vmem:[%s4279_s22 + $0xa58] sm:$0xff] }
  0x45   : > { %543 = vst [vmem:[%s4284_s23 + $0x1a0] sm:$0xff] %v542_v52  ;;  %v670_v52 = vld [vmem:[%s4279_s22 + $0xa60] sm:$0xff] }
  0x46   : > { %545 = vst [vmem:[%s4284_s23 + $0x1a8] sm:$0xff] %v544_v53  ;;  %v672_v53 = vld [vmem:[%s4279_s22 + $0xa68] sm:$0xff] }
  0x47   : > { %547 = vst [vmem:[%s4284_s23 + $0x1b0] sm:$0xff] %v546_v54  ;;  %v674_v54 = vld [vmem:[%s4279_s22 + $0xa70] sm:$0xff] }
  0x48   : > { %549 = vst [vmem:[%s4284_s23 + $0x1b8] sm:$0xff] %v548_v55  ;;  %v676_v55 = vld [vmem:[%s4279_s22 + $0xa78] sm:$0xff] }
  0x49   : > { %551 = vst [vmem:[%s4284_s23 + $0x1c0] sm:$0xff] %v550_v56  ;;  %v678_v56 = vld [vmem:[%s4279_s22 + $0xa80] sm:$0xff] }
  0x4a   : > { %553 = vst [vmem:[%s4284_s23 + $0x1c8] sm:$0xff] %v552_v57  ;;  %v680_v57 = vld [vmem:[%s4279_s22 + $0xa88] sm:$0xff] }
  0x4b   : > { %555 = vst [vmem:[%s4284_s23 + $0x1d0] sm:$0xff] %v554_v58  ;;  %v682_v58 = vld [vmem:[%s4279_s22 + $0xa90] sm:$0xff] }
  0x4c   : > { %557 = vst [vmem:[%s4284_s23 + $0x1d8] sm:$0xff] %v556_v59  ;;  %v684_v59 = vld [vmem:[%s4279_s22 + $0xa98] sm:$0xff] }
  0x4d   : > { %559 = vst [vmem:[%s4284_s23 + $0x1e0] sm:$0xff] %v558_v60  ;;  %v686_v60 = vld [vmem:[%s4279_s22 + $0xaa0] sm:$0xff] }
  0x4e   : > { %561 = vst [vmem:[%s4284_s23 + $0x1e8] sm:$0xff] %v560_v61  ;;  %v688_v61 = vld [vmem:[%s4279_s22 + $0xaa8] sm:$0xff] }
  0x4f   : > { %563 = vst [vmem:[%s4284_s23 + $0x1f0] sm:$0xff] %v562_v62  ;;  %v690_v62 = vld [vmem:[%s4279_s22 + $0xab0] sm:$0xff] }
  0x50   : > { %565 = vst [vmem:[%s4284_s23 + $0x1f8] sm:$0xff] %v564_v63  ;;  %v692_v63 = vld [vmem:[%s4279_s22 + $0xab8] sm:$0xff] }
  0x51   : > { %567 = vst [vmem:[%s4284_s23 + $0x200] sm:$0xff] %v566_v0  ;;  %v694_v0 = vld [vmem:[%s4279_s22 + $0xac0] sm:$0xff] }
  0x52   : > { %569 = vst [vmem:[%s4284_s23 + $0x208] sm:$0xff] %v568_v1  ;;  %v696_v1 = vld [vmem:[%s4279_s22 + $0xac8] sm:$0xff] }
  0x53   : > { %571 = vst [vmem:[%s4284_s23 + $0x210] sm:$0xff] %v570_v2  ;;  %v698_v2 = vld [vmem:[%s4279_s22 + $0xad0] sm:$0xff] }
  0x54   : > { %573 = vst [vmem:[%s4284_s23 + $0x218] sm:$0xff] %v572_v3  ;;  %v700_v3 = vld [vmem:[%s4279_s22 + $0xad8] sm:$0xff] }
  0x55   : > { %575 = vst [vmem:[%s4284_s23 + $0x220] sm:$0xff] %v574_v4  ;;  %v702_v4 = vld [vmem:[%s4279_s22 + $0xae0] sm:$0xff] }
  0x56   : > { %577 = vst [vmem:[%s4284_s23 + $0x228] sm:$0xff] %v576_v5  ;;  %v704_v5 = vld [vmem:[%s4279_s22 + $0xae8] sm:$0xff] }
  0x57   : > { %579 = vst [vmem:[%s4284_s23 + $0x230] sm:$0xff] %v578_v6  ;;  %v706_v6 = vld [vmem:[%s4279_s22 + $0xaf0] sm:$0xff] }
  0x58   : > { %581 = vst [vmem:[%s4284_s23 + $0x238] sm:$0xff] %v580_v7  ;;  %v708_v7 = vld [vmem:[%s4279_s22 + $0xaf8] sm:$0xff] }
  0x59   : > { %583 = vst [vmem:[%s4284_s23 + $0x240] sm:$0xff] %v582_v8  ;;  %v710_v8 = vld [vmem:[%s4279_s22 + $0xb00] sm:$0xff] }
  0x5a   : > { %585 = vst [vmem:[%s4284_s23 + $0x248] sm:$0xff] %v584_v9  ;;  %v712_v9 = vld [vmem:[%s4279_s22 + $0xb08] sm:$0xff] }
  0x5b   : > { %587 = vst [vmem:[%s4284_s23 + $0x250] sm:$0xff] %v586_v10  ;;  %v714_v10 = vld [vmem:[%s4279_s22 + $0xb10] sm:$0xff] }
  0x5c   : > { %589 = vst [vmem:[%s4284_s23 + $0x258] sm:$0xff] %v588_v11  ;;  %v716_v11 = vld [vmem:[%s4279_s22 + $0xb18] sm:$0xff] }
  0x5d   : > { %591 = vst [vmem:[%s4284_s23 + $0x260] sm:$0xff] %v590_v12  ;;  %v718_v12 = vld [vmem:[%s4279_s22 + $0xb20] sm:$0xff] }
  0x5e   : > { %593 = vst [vmem:[%s4284_s23 + $0x268] sm:$0xff] %v592_v13  ;;  %v720_v13 = vld [vmem:[%s4279_s22 + $0xb28] sm:$0xff] }
  0x5f   : > { %595 = vst [vmem:[%s4284_s23 + $0x270] sm:$0xff] %v594_v14  ;;  %v722_v14 = vld [vmem:[%s4279_s22 + $0xb30] sm:$0xff] }
  0x60   : > { %597 = vst [vmem:[%s4284_s23 + $0x278] sm:$0xff] %v596_v15  ;;  %v724_v15 = vld [vmem:[%s4279_s22 + $0xb38] sm:$0xff] }
  0x61   : > { %599 = vst [vmem:[%s4284_s23 + $0x280] sm:$0xff] %v598_v16 }
  0x62   : > { %601 = vst [vmem:[%s4284_s23 + $0x288] sm:$0xff] %v600_v17 }
  0x63   : > { %603 = vst [vmem:[%s4284_s23 + $0x290] sm:$0xff] %v602_v18 }
  0x64   : > { %605 = vst [vmem:[%s4284_s23 + $0x298] sm:$0xff] %v604_v19 }
  0x65   : > { %607 = vst [vmem:[%s4284_s23 + $0x2a0] sm:$0xff] %v606_v20 }
  0x66   : > { %609 = vst [vmem:[%s4284_s23 + $0x2a8] sm:$0xff] %v608_v21 }
  0x67   : > { %611 = vst [vmem:[%s4284_s23 + $0x2b0] sm:$0xff] %v610_v22 }
  0x68   : > { %613 = vst [vmem:[%s4284_s23 + $0x2b8] sm:$0xff] %v612_v23 }
  0x69   : > { %615 = vst [vmem:[%s4284_s23 + $0x2c0] sm:$0xff] %v614_v24 }
  0x6a   : > { %617 = vst [vmem:[%s4284_s23 + $0x2c8] sm:$0xff] %v616_v25 }
  0x6b   : > { %619 = vst [vmem:[%s4284_s23 + $0x2d0] sm:$0xff] %v618_v26 }
  0x6c   : > { %621 = vst [vmem:[%s4284_s23 + $0x2d8] sm:$0xff] %v620_v27 }
  0x6d   : > { %623 = vst [vmem:[%s4284_s23 + $0x2e0] sm:$0xff] %v622_v28 }
  0x6e   : > { %625 = vst [vmem:[%s4284_s23 + $0x2e8] sm:$0xff] %v624_v29 }
  0x6f   : > { %627 = vst [vmem:[%s4284_s23 + $0x2f0] sm:$0xff] %v626_v30 }
  0x70   : > { %629 = vst [vmem:[%s4284_s23 + $0x2f8] sm:$0xff] %v628_v31 }
  0x71   : > { %631 = vst [vmem:[%s4284_s23 + $0x300] sm:$0xff] %v630_v32 }
  0x72   : > { %633 = vst [vmem:[%s4284_s23 + $0x308] sm:$0xff] %v632_v33 }
  0x73   : > { %635 = vst [vmem:[%s4284_s23 + $0x310] sm:$0xff] %v634_v34 }
  0x74   : > { %637 = vst [vmem:[%s4284_s23 + $0x318] sm:$0xff] %v636_v35 }
  0x75   : > { %639 = vst [vmem:[%s4284_s23 + $0x320] sm:$0xff] %v638_v36 }
  0x76   : > { %641 = vst [vmem:[%s4284_s23 + $0x328] sm:$0xff] %v640_v37 }
  0x77   : > { %643 = vst [vmem:[%s4284_s23 + $0x330] sm:$0xff] %v642_v38 }
  0x78   : > { %645 = vst [vmem:[%s4284_s23 + $0x338] sm:$0xff] %v644_v39 }
  0x79   : > { %647 = vst [vmem:[%s4284_s23 + $0x340] sm:$0xff] %v646_v40 }
  0x7a   : > { %649 = vst [vmem:[%s4284_s23 + $0x348] sm:$0xff] %v648_v41 }
  0x7b   : > { %651 = vst [vmem:[%s4284_s23 + $0x350] sm:$0xff] %v650_v42 }
  0x7c   : > { %653 = vst [vmem:[%s4284_s23 + $0x358] sm:$0xff] %v652_v43 }
  0x7d   : > { %655 = vst [vmem:[%s4284_s23 + $0x360] sm:$0xff] %v654_v44 }
  0x7e   : > { %657 = vst [vmem:[%s4284_s23 + $0x368] sm:$0xff] %v656_v45 }
  0x7f   : > { %659 = vst [vmem:[%s4284_s23 + $0x370] sm:$0xff] %v658_v46 }
  0x80   : > { %661 = vst [vmem:[%s4284_s23 + $0x378] sm:$0xff] %v660_v47 }
  0x81   : > { %663 = vst [vmem:[%s4284_s23 + $0x380] sm:$0xff] %v662_v48 }
  0x82   : > { %665 = vst [vmem:[%s4284_s23 + $0x388] sm:$0xff] %v664_v49 }
  0x83   : > { %667 = vst [vmem:[%s4284_s23 + $0x390] sm:$0xff] %v666_v50 }
  0x84   : > { %669 = vst [vmem:[%s4284_s23 + $0x398] sm:$0xff] %v668_v51 }
  0x85   : > { %671 = vst [vmem:[%s4284_s23 + $0x3a0] sm:$0xff] %v670_v52 }
  0x86   : > { %673 = vst [vmem:[%s4284_s23 + $0x3a8] sm:$0xff] %v672_v53 }
  0x87   : > { %675 = vst [vmem:[%s4284_s23 + $0x3b0] sm:$0xff] %v674_v54 }
  0x88   : > { %677 = vst [vmem:[%s4284_s23 + $0x3b8] sm:$0xff] %v676_v55 }
  0x89   : > { %679 = vst [vmem:[%s4284_s23 + $0x3c0] sm:$0xff] %v678_v56 }
  0x8a   : > { %681 = vst [vmem:[%s4284_s23 + $0x3c8] sm:$0xff] %v680_v57 }
  0x8b   : > { %683 = vst [vmem:[%s4284_s23 + $0x3d0] sm:$0xff] %v682_v58 }
  0x8c   : > { %685 = vst [vmem:[%s4284_s23 + $0x3d8] sm:$0xff] %v684_v59 }
  0x8d   : > { %687 = vst [vmem:[%s4284_s23 + $0x3e0] sm:$0xff] %v686_v60 }
  0x8e   : > { %689 = vst [vmem:[%s4284_s23 + $0x3e8] sm:$0xff] %v688_v61 }
  0x8f   : > { %691 = vst [vmem:[%s4284_s23 + $0x3f0] sm:$0xff] %v690_v62 }
  0x90   : > { %693 = vst [vmem:[%s4284_s23 + $0x3f8] sm:$0xff] %v692_v63 }
  0x91   : > { %695 = vst [vmem:[%s4284_s23 + $0x400] sm:$0xff] %v694_v0 }
  0x92   : > { %697 = vst [vmem:[%s4284_s23 + $0x408] sm:$0xff] %v696_v1 }
  0x93   : > { %699 = vst [vmem:[%s4284_s23 + $0x410] sm:$0xff] %v698_v2 }
  0x94   : > { %701 = vst [vmem:[%s4284_s23 + $0x418] sm:$0xff] %v700_v3 }
  0x95   : > { %703 = vst [vmem:[%s4284_s23 + $0x420] sm:$0xff] %v702_v4 }
  0x96   : > { %705 = vst [vmem:[%s4284_s23 + $0x428] sm:$0xff] %v704_v5 }
  0x97   : > { %707 = vst [vmem:[%s4284_s23 + $0x430] sm:$0xff] %v706_v6 }
  0x98   : > { %709 = vst [vmem:[%s4284_s23 + $0x438] sm:$0xff] %v708_v7 }
  0x99   : > { %711 = vst [vmem:[%s4284_s23 + $0x440] sm:$0xff] %v710_v8 }
  0x9a   : > { %713 = vst [vmem:[%s4284_s23 + $0x448] sm:$0xff] %v712_v9 }
  0x9b   : > { %715 = vst [vmem:[%s4284_s23 + $0x450] sm:$0xff] %v714_v10 }
  0x9c   : > { %717 = vst [vmem:[%s4284_s23 + $0x458] sm:$0xff] %v716_v11 }
  0x9d   : > { %719 = vst [vmem:[%s4284_s23 + $0x460] sm:$0xff] %v718_v12 }
  0x9e   : > { %721 = vst [vmem:[%s4284_s23 + $0x468] sm:$0xff] %v720_v13 }
  0x9f   : > { %723 = vst [vmem:[%s4284_s23 + $0x470] sm:$0xff] %v722_v14 }
  0xa0   : > { %725 = vst [vmem:[%s4284_s23 + $0x478] sm:$0xff] %v724_v15 }
  0xa1 PF: > { %p3881_p5 = scmp.ge.s32.totalorder %s4227_s11, 1  ;;  %p730_p6 = scmp.lt.s32.totalorder %s4227_s11, 5 }
  0xa3   : > { %p731_p7 = pnand %p3881_p5, %p730_p6 }
  0xa5   : > { %734 = sbr.rel (%p731_p7) target bundleno = 1207 (0x4b7), region = 62 }
  0xaa   : > { %s763_s24 = smul.u32 72, %s3876_s12  ;;  %vm848_vm0 = vcmask 400384   ;;  %s737_s29 = sand.u32 1, %s4219_s9  }
  0xab   : > { %s5953_s30 = smul.u32 1152, %s737_s29 }
  0xac   : > { %p764_p8 = scmp.lt.s32.totalorder %s763_s24, 287 }
  0xad   : > { %s5997_s3 = scalar_lea.vmem [#allocation2], %s5953_s30 }
  0xae   : > { %s9598_s24 = smov (!%p764_p8, %s763_s24), 287 }
  0xaf   : > { %s3882_s25 = sshll.u32 %s9598_s24, 3 }
  0xb0   : > { %s4583_s28 = scalar_lea.vmem %s8700_s0, %s3882_s25  ;;  %s8305_s6 = scalar_lea.vmem %s8702_s2, %s3882_s25 }
  0xb1   : > { %v4586_v16 = vld [vmem:[%s4583_s28 + $0x20] sm:$0xff]  ;;  %v4589_v17 = vld [vmem:[%s4583_s28 + $0x10] sm:$0xff]  ;;  %v4601_v22 = vld [vmem:[%s4583_s28 + $0x28] sm:$0xff] }
  0xb2   : > { %v4592_v18 = vld [vmem:[%s4583_s28] sm:$0xff]  ;;  %v861_v19 = vsel %vm848_vm0, %v4586_v16, 0.0  ;;  %v855_v20 = vsel %vm848_vm0, %v4589_v17, 0.0  ;;  %v4604_v23 = vld [vmem:[%s4583_s28 + $0x18] sm:$0xff]  ;;  %v4607_v24 = vld [vmem:[%s4583_s28 + $0x8] sm:$0xff]  ;;  %v864_v25 = vsel %vm848_vm0, %v4601_v22, 0.0 }
  0xb3   : > { %v849_v21 = vsel %vm848_vm0, %v4592_v18, 0.0  ;;  %862 = vadd.xlane.f32.xlu2 %v861_v19  ;;  %856 = vadd.xlane.f32.xlu1 %v855_v20  ;;  %v858_v26 = vsel %vm848_vm0, %v4604_v23, 0.0  ;;  %v852_v27 = vsel %vm848_vm0, %v4607_v24, 0.0  ;;  %v4616_v28 = vld [vmem:[%s4583_s28 + $0x40] sm:$0xff]  ;;  %v4619_v29 = vld [vmem:[%s4583_s28 + $0x38] sm:$0xff]  ;;  %v4622_v30 = vld [vmem:[%s4583_s28 + $0x30] sm:$0xff] }
  0xb4   : > { %850 = vadd.xlane.f32.xlu0 %v849_v21  ;;  %v873_v31 = vsel %vm848_vm0, %v4616_v28, 0.0  ;;  %v870_v32 = vsel %vm848_vm0, %v4619_v29, 0.0  ;;  %v867_v33 = vsel %vm848_vm0, %v4622_v30, 0.0  ;;  %v4631_v34 = vld [vmem:[%s4583_s28 + $0x58] sm:$0xff]  ;;  %v4634_v35 = vld [vmem:[%s4583_s28 + $0x50] sm:$0xff]  ;;  %v4637_v36 = vld [vmem:[%s4583_s28 + $0x48] sm:$0xff] }
  0xb5   : > { %v882_v37 = vsel %vm848_vm0, %v4631_v34, 0.0  ;;  %v879_v38 = vsel %vm848_vm0, %v4634_v35, 0.0  ;;  %v876_v39 = vsel %vm848_vm0, %v4637_v36, 0.0  ;;  %v4646_v40 = vld [vmem:[%s4583_s28 + $0x70] sm:$0xff]  ;;  %v4649_v41 = vld [vmem:[%s4583_s28 + $0x68] sm:$0xff]  ;;  %v4652_v42 = vld [vmem:[%s4583_s28 + $0x60] sm:$0xff] }
  0xb6   : > { %v891_v43 = vsel %vm848_vm0, %v4646_v40, 0.0  ;;  %v888_v44 = vsel %vm848_vm0, %v4649_v41, 0.0  ;;  %v885_v45 = vsel %vm848_vm0, %v4652_v42, 0.0  ;;  %v4661_v46 = vld [vmem:[%s4583_s28 + $0x88] sm:$0xff]  ;;  %v4664_v47 = vld [vmem:[%s4583_s28 + $0x80] sm:$0xff]  ;;  %v4667_v48 = vld [vmem:[%s4583_s28 + $0x78] sm:$0xff] }
  0xb7   : > { %v900_v49 = vsel %vm848_vm0, %v4661_v46, 0.0  ;;  %v897_v50 = vsel %vm848_vm0, %v4664_v47, 0.0  ;;  %v894_v51 = vsel %vm848_vm0, %v4667_v48, 0.0  ;;  %v4676_v52 = vld [vmem:[%s4583_s28 + $0xa0] sm:$0xff]  ;;  %v4679_v53 = vld [vmem:[%s4583_s28 + $0x98] sm:$0xff]  ;;  %v4682_v54 = vld [vmem:[%s4583_s28 + $0x90] sm:$0xff] }
  0xb8   : > { %v909_v55 = vsel %vm848_vm0, %v4676_v52, 0.0  ;;  %v906_v56 = vsel %vm848_vm0, %v4679_v53, 0.0  ;;  %v903_v57 = vsel %vm848_vm0, %v4682_v54, 0.0  ;;  %v4691_v58 = vld [vmem:[%s4583_s28 + $0xb8] sm:$0xff]  ;;  %v4694_v59 = vld [vmem:[%s4583_s28 + $0xb0] sm:$0xff]  ;;  %v4697_v60 = vld [vmem:[%s4583_s28 + $0xa8] sm:$0xff] }
  0xb9   : > { %v918_v61 = vsel %vm848_vm0, %v4691_v58, 0.0  ;;  %v915_v62 = vsel %vm848_vm0, %v4694_v59, 0.0  ;;  %v912_v63 = vsel %vm848_vm0, %v4697_v60, 0.0  ;;  %v4706_v0 = vld [vmem:[%s4583_s28 + $0xd0] sm:$0xff]  ;;  %v4709_v1 = vld [vmem:[%s4583_s28 + $0xc8] sm:$0xff]  ;;  %v4712_v2 = vld [vmem:[%s4583_s28 + $0xc0] sm:$0xff] }
  0xba   : > { %v927_v3 = vsel %vm848_vm0, %v4706_v0, 0.0  ;;  %v924_v4 = vsel %vm848_vm0, %v4709_v1, 0.0  ;;  %v921_v5 = vsel %vm848_vm0, %v4712_v2, 0.0  ;;  %v4721_v6 = vld [vmem:[%s4583_s28 + $0xe8] sm:$0xff]  ;;  %v4724_v7 = vld [vmem:[%s4583_s28 + $0xe0] sm:$0xff]  ;;  %v4727_v8 = vld [vmem:[%s4583_s28 + $0xd8] sm:$0xff] }
  0xbb   : > { %865 = vadd.xlane.f32.xlu2 %v864_v25  ;;  %859 = vadd.xlane.f32.xlu1 %v858_v26  ;;  %v936_v9 = vsel %vm848_vm0, %v4721_v6, 0.0  ;;  %v933_v10 = vsel %vm848_vm0, %v4724_v7, 0.0  ;;  %v930_v11 = vsel %vm848_vm0, %v4727_v8, 0.0  ;;  %v4736_v12 = vld [vmem:[%s4583_s28 + $0x100] sm:$0xff]  ;;  %v4739_v13 = vld [vmem:[%s4583_s28 + $0xf8] sm:$0xff]  ;;  %v4742_v14 = vld [vmem:[%s4583_s28 + $0xf0] sm:$0xff] }
  0xbc   : > { %853 = vadd.xlane.f32.xlu0 %v852_v27  ;;  %v945_v15 = vsel %vm848_vm0, %v4736_v12, 0.0  ;;  %v942_v19 = vsel %vm848_vm0, %v4739_v13, 0.0  ;;  %v939_v20 = vsel %vm848_vm0, %v4742_v14, 0.0  ;;  %v4751_v21 = vld [vmem:[%s4583_s28 + $0x118] sm:$0xff]  ;;  %v4754_v25 = vld [vmem:[%s4583_s28 + $0x110] sm:$0xff]  ;;  %v4757_v26 = vld [vmem:[%s4583_s28 + $0x108] sm:$0xff] }
  0xbd   : > { %v954_v27 = vsel %vm848_vm0, %v4751_v21, 0.0 }
  0xc3   : > { %874 = vadd.xlane.f32.xlu2 %v873_v31  ;;  %871 = vadd.xlane.f32.xlu1 %v870_v32  ;;  %v951_v31 = vsel %vm848_vm0, %v4754_v25, 0.0  ;;  %v948_v32 = vsel %vm848_vm0, %v4757_v26, 0.0 }
  0xc4   : > { %868 = vadd.xlane.f32.xlu0 %v867_v33  ;;  %v4766_v33 = vld [vmem:[%s4583_s28 + $0x130] sm:$0xff] }
  0xcb   : > { %883 = vadd.xlane.f32.xlu2 %v882_v37  ;;  %880 = vadd.xlane.f32.xlu1 %v879_v38  ;;  %v4769_v37 = vld [vmem:[%s4583_s28 + $0x128] sm:$0xff]  ;;  %v4772_v38 = vld [vmem:[%s4583_s28 + $0x120] sm:$0xff] }
  0xcc   : > { %877 = vadd.xlane.f32.xlu0 %v876_v39  ;;  %v963_v39 = vsel %vm848_vm0, %v4766_v33, 0.0 }
  0xd3   : > { %892 = vadd.xlane.f32.xlu2 %v891_v43  ;;  %889 = vadd.xlane.f32.xlu1 %v888_v44  ;;  %v960_v43 = vsel %vm848_vm0, %v4769_v37, 0.0  ;;  %v957_v44 = vsel %vm848_vm0, %v4772_v38, 0.0 }
  0xd4   : > { %886 = vadd.xlane.f32.xlu0 %v885_v45  ;;  %v4781_v45 = vld [vmem:[%s4583_s28 + $0x148] sm:$0xff] }
  0xdb   : > { %901 = vadd.xlane.f32.xlu2 %v900_v49  ;;  %898 = vadd.xlane.f32.xlu1 %v897_v50  ;;  %v4784_v49 = vld [vmem:[%s4583_s28 + $0x140] sm:$0xff]  ;;  %v4787_v50 = vld [vmem:[%s4583_s28 + $0x138] sm:$0xff] }
  0xdc   : > { %895 = vadd.xlane.f32.xlu0 %v894_v51  ;;  %v972_v51 = vsel %vm848_vm0, %v4781_v45, 0.0 }
  0xe3   : > { %910 = vadd.xlane.f32.xlu2 %v909_v55  ;;  %907 = vadd.xlane.f32.xlu1 %v906_v56  ;;  %v969_v55 = vsel %vm848_vm0, %v4784_v49, 0.0  ;;  %v966_v56 = vsel %vm848_vm0, %v4787_v50, 0.0 }
  0xe4   : > { %904 = vadd.xlane.f32.xlu0 %v903_v57  ;;  %v4796_v57 = vld [vmem:[%s4583_s28 + $0x160] sm:$0xff] }
  0xeb   : > { %919 = vadd.xlane.f32.xlu2 %v918_v61  ;;  %916 = vadd.xlane.f32.xlu1 %v915_v62  ;;  %v4799_v61 = vld [vmem:[%s4583_s28 + $0x158] sm:$0xff]  ;;  %v4802_v62 = vld [vmem:[%s4583_s28 + $0x150] sm:$0xff] }
  0xec   : > { %913 = vadd.xlane.f32.xlu0 %v912_v63  ;;  %v981_v63 = vsel %vm848_vm0, %v4796_v57, 0.0 }
  0xf3   : > { %928 = vadd.xlane.f32.xlu2 %v927_v3  ;;  %925 = vadd.xlane.f32.xlu1 %v924_v4  ;;  %v978_v3 = vsel %vm848_vm0, %v4799_v61, 0.0  ;;  %v975_v4 = vsel %vm848_vm0, %v4802_v62, 0.0 }
  0xf4   : > { %922 = vadd.xlane.f32.xlu0 %v921_v5  ;;  %v4811_v5 = vld [vmem:[%s4583_s28 + $0x178] sm:$0xff] }
  0xfb   : > { %937 = vadd.xlane.f32.xlu2 %v936_v9  ;;  %934 = vadd.xlane.f32.xlu1 %v933_v10  ;;  %v4814_v9 = vld [vmem:[%s4583_s28 + $0x170] sm:$0xff] }
  0xfc   : > { %931 = vadd.xlane.f32.xlu0 %v930_v11 }
 0x103   : > { %946 = vadd.xlane.f32.xlu2 %v945_v15  ;;  %943 = vadd.xlane.f32.xlu1 %v942_v19  ;;  %v4821_v15 = vld [vmem:[%s4583_s28 + $0x168] sm:$0xff] }
 0x104   : > { %940 = vadd.xlane.f32.xlu0 %v939_v20  ;;  %v990_v20 = vsel %vm848_vm0, %v4811_v5, 0.0 }
 0x10b   : > { %955 = vadd.xlane.f32.xlu2 %v954_v27  ;;  %952 = vadd.xlane.f32.xlu1 %v951_v31  ;;  %v987_v27 = vsel %vm848_vm0, %v4814_v9, 0.0  ;;  %v984_v31 = vsel %vm848_vm0, %v4821_v15, 0.0 }
 0x10c   : > { %949 = vadd.xlane.f32.xlu0 %v948_v32  ;;  %v4832_v32 = vld [vmem:[%s4583_s28 + $0x190] sm:$0xff] }
 0x113   : > { %964 = vadd.xlane.f32.xlu2 %v963_v39  ;;  %961 = vadd.xlane.f32.xlu1 %v960_v43  ;;  %v4835_v39 = vld [vmem:[%s4583_s28 + $0x188] sm:$0xff] }
 0x114   : > { %958 = vadd.xlane.f32.xlu0 %v957_v44 }
 0x11b   : > { %973 = vadd.xlane.f32.xlu2 %v972_v51  ;;  %970 = vadd.xlane.f32.xlu1 %v969_v55  ;;  %v4842_v51 = vld [vmem:[%s4583_s28 + $0x180] sm:$0xff] }
 0x11c   : > { %967 = vadd.xlane.f32.xlu0 %v966_v56  ;;  %v999_v56 = vsel %vm848_vm0, %v4832_v32, 0.0 }
 0x123   : > { %982 = vadd.xlane.f32.xlu2 %v981_v63  ;;  %979 = vadd.xlane.f32.xlu1 %v978_v3  ;;  %v996_v63 = vsel %vm848_vm0, %v4835_v39, 0.0  ;;  %v993_v3 = vsel %vm848_vm0, %v4842_v51, 0.0 }
 0x124   : > { %976 = vadd.xlane.f32.xlu0 %v975_v4  ;;  %v4853_v4 = vld [vmem:[%s4583_s28 + $0x1a8] sm:$0xff] }
 0x126   : > { %v4816_v10 = vpop.xlane.xlu2 %862  ;;  %v4818_v11 = vpop.xlane.xlu1 %856 }
 0x127   : > { %8832 = vst [vmem:[#allocation3_spill] sm:$0xff] %v4816_v10  ;;  %v4823_v19 = vpop.xlane.xlu0 %850 }
 0x128   : > { %8833 = vst [vmem:[#allocation4_spill] sm:$0xff] %v4818_v11 }
 0x129   : > { %8834 = vst [vmem:[#allocation5_spill] sm:$0xff] %v4823_v19  ;;  %v4884_v19 = vld [vmem:[%s4583_s28 + $0x1b0] sm:$0xff] }
 0x12a   : > { %8846 = vst [vmem:[#allocation17_spill] sm:$0xff] %v4884_v19 }
 0x12b   : > { %991 = vadd.xlane.f32.xlu2 %v990_v20  ;;  %988 = vadd.xlane.f32.xlu1 %v987_v27  ;;  %v4856_v20 = vld [vmem:[%s4583_s28 + $0x1a0] sm:$0xff] }
 0x12c   : > { %985 = vadd.xlane.f32.xlu0 %v984_v31 }
 0x12e   : > { %v4837_v43 = vpop.xlane.xlu2 %865  ;;  %v4839_v44 = vpop.xlane.xlu1 %859 }
 0x12f   : > { %8835 = vst [vmem:[#allocation6_spill] sm:$0xff] %v4837_v43  ;;  %v4844_v55 = vpop.xlane.xlu0 %853  ;;  %v1008_v43 = vsel %vm848_vm0, %v4853_v4, 0.0 }
 0x130   : > { %8836 = vst [vmem:[#allocation7_spill] sm:$0xff] %v4839_v44 }
 0x131   : > { %8837 = vst [vmem:[#allocation8_spill] sm:$0xff] %v4844_v55  ;;  %v4863_v55 = vld [vmem:[%s4583_s28 + $0x198] sm:$0xff] }
 0x132   : > { %8840 = vst [vmem:[#allocation11_spill] sm:$0xff] %v4863_v55 }
 0x133   : > { %1000 = vadd.xlane.f32.xlu2 %v999_v56  ;;  %997 = vadd.xlane.f32.xlu1 %v996_v63  ;;  %v1005_v56 = vsel %vm848_vm0, %v4856_v20, 0.0  ;;  %v1002_v63 = vsel %vm848_vm0, %v4863_v55, 0.0 }
 0x134   : > { %994 = vadd.xlane.f32.xlu0 %v993_v3  ;;  %v4874_v3 = vld [vmem:[%s4583_s28 + $0x1c0] sm:$0xff] }
 0x135   : > { %8842 = vst [vmem:[#allocation13_spill] sm:$0xff] %v4874_v3  ;;  %v1017_v10 = vsel %vm848_vm0, %v4874_v3, 0.0  ;;  %v4905_v3 = vld [vmem:[%s4583_s28 + $0x1c8] sm:$0xff] }
 0x136   : > { %v4858_v27 = vpop.xlane.xlu2 %874  ;;  %v4860_v31 = vpop.xlane.xlu1 %871  ;;  %8852 = vst [vmem:[#allocation23_spill] sm:$0xff] %v4905_v3 }
 0x137   : > { %8838 = vst [vmem:[#allocation9_spill] sm:$0xff] %v4858_v27  ;;  %v4865_v44 = vpop.xlane.xlu0 %868 }
 0x138   : > { %8839 = vst [vmem:[#allocation10_spill] sm:$0xff] %v4860_v31  ;;  %v4877_v31 = vld [vmem:[%s4583_s28 + $0x1b8] sm:$0xff] }
 0x139   : > { %8841 = vst [vmem:[#allocation12_spill] sm:$0xff] %v4865_v44 }
 0x13a   : > { %8843 = vst [vmem:[#allocation14_spill] sm:$0xff] %v4877_v31 }
 0x13b   : > { %1009 = vadd.xlane.f32.xlu2 %v1008_v43  ;;  %1006 = vadd.xlane.f32.xlu1 %v1005_v56  ;;  %v1014_v43 = vsel %vm848_vm0, %v4877_v31, 0.0  ;;  %v1011_v56 = vsel %vm848_vm0, %v4884_v19, 0.0 }
 0x13c   : > { %1003 = vadd.xlane.f32.xlu0 %v1002_v63  ;;  %v4895_v63 = vld [vmem:[%s4583_s28 + $0x1d8] sm:$0xff] }
 0x13d   : > { %8848 = vst [vmem:[#allocation19_spill] sm:$0xff] %v4895_v63  ;;  %v1026_v19 = vsel %vm848_vm0, %v4895_v63, 0.0  ;;  %v4926_v63 = vld [vmem:[%s4583_s28 + $0x1e0] sm:$0xff] }
 0x13e   : > { %v4879_v44 = vpop.xlane.xlu2 %883  ;;  %v4881_v27 = vpop.xlane.xlu1 %880  ;;  %8858 = vst [vmem:[#allocation29_spill] sm:$0xff] %v4926_v63 }
 0x13f   : > { %8844 = vst [vmem:[#allocation15_spill] sm:$0xff] %v4879_v44  ;;  %v4886_v11 = vpop.xlane.xlu0 %877 }
 0x140   : > { %8845 = vst [vmem:[#allocation16_spill] sm:$0xff] %v4881_v27  ;;  %v4898_v27 = vld [vmem:[%s4583_s28 + $0x1d0] sm:$0xff] }
 0x141   : > { %8847 = vst [vmem:[#allocation18_spill] sm:$0xff] %v4886_v11 }
 0x142   : > { %8849 = vst [vmem:[#allocation20_spill] sm:$0xff] %v4898_v27 }
 0x143   : > { %1018 = vadd.xlane.f32.xlu2 %v1017_v10  ;;  %1015 = vadd.xlane.f32.xlu1 %v1014_v43  ;;  %v1023_v10 = vsel %vm848_vm0, %v4898_v27, 0.0  ;;  %v1020_v43 = vsel %vm848_vm0, %v4905_v3, 0.0 }
 0x144   : > { %1012 = vadd.xlane.f32.xlu0 %v1011_v56  ;;  %v4916_v56 = vld [vmem:[%s4583_s28 + $0x1f0] sm:$0xff] }
 0x145   : > { %8854 = vst [vmem:[#allocation25_spill] sm:$0xff] %v4916_v56  ;;  %v1035_v3 = vsel %vm848_vm0, %v4916_v56, 0.0  ;;  %v4947_v56 = vld [vmem:[%s4583_s28 + $0x1f8] sm:$0xff] }
 0x146   : > { %v4900_v11 = vpop.xlane.xlu2 %892  ;;  %v4902_v44 = vpop.xlane.xlu1 %889  ;;  %8864 = vst [vmem:[#allocation35_spill] sm:$0xff] %v4947_v56 }
 0x147   : > { %8850 = vst [vmem:[#allocation21_spill] sm:$0xff] %v4900_v11  ;;  %v4907_v31 = vpop.xlane.xlu0 %886 }
 0x148   : > { %8851 = vst [vmem:[#allocation22_spill] sm:$0xff] %v4902_v44  ;;  %v4919_v44 = vld [vmem:[%s4583_s28 + $0x1e8] sm:$0xff] }
 0x149   : > { %8853 = vst [vmem:[#allocation24_spill] sm:$0xff] %v4907_v31 }
 0x14a   : > { %8855 = vst [vmem:[#allocation26_spill] sm:$0xff] %v4919_v44 }
 0x14b   : > { %1027 = vadd.xlane.f32.xlu2 %v1026_v19  ;;  %1024 = vadd.xlane.f32.xlu1 %v1023_v10  ;;  %v1032_v19 = vsel %vm848_vm0, %v4919_v44, 0.0  ;;  %v1029_v10 = vsel %vm848_vm0, %v4926_v63, 0.0 }
 0x14c   : > { %1021 = vadd.xlane.f32.xlu0 %v1020_v43  ;;  %v4937_v43 = vld [vmem:[%s4583_s28 + $0x208] sm:$0xff] }
 0x14d   : > { %8860 = vst [vmem:[#allocation31_spill] sm:$0xff] %v4937_v43  ;;  %v1044_v63 = vsel %vm848_vm0, %v4937_v43, 0.0  ;;  %v4968_v43 = vld [vmem:[%s4583_s28 + $0x210] sm:$0xff] }
 0x14e   : > { %v4921_v31 = vpop.xlane.xlu2 %901  ;;  %v4923_v11 = vpop.xlane.xlu1 %898  ;;  %8870 = vst [vmem:[#allocation41_spill] sm:$0xff] %v4968_v43 }
 0x14f   : > { %8856 = vst [vmem:[#allocation27_spill] sm:$0xff] %v4921_v31  ;;  %v4928_v27 = vpop.xlane.xlu0 %895 }
 0x150   : > { %8857 = vst [vmem:[#allocation28_spill] sm:$0xff] %v4923_v11  ;;  %v4940_v11 = vld [vmem:[%s4583_s28 + $0x200] sm:$0xff] }
 0x151   : > { %8859 = vst [vmem:[#allocation30_spill] sm:$0xff] %v4928_v27 }
 0x152   : > { %8861 = vst [vmem:[#allocation32_spill] sm:$0xff] %v4940_v11 }
 0x153   : > { %1036 = vadd.xlane.f32.xlu2 %v1035_v3  ;;  %1033 = vadd.xlane.f32.xlu1 %v1032_v19  ;;  %v1041_v3 = vsel %vm848_vm0, %v4940_v11, 0.0  ;;  %v1038_v19 = vsel %vm848_vm0, %v4947_v56, 0.0 }
 0x154   : > { %1030 = vadd.xlane.f32.xlu0 %v1029_v10  ;;  %v4958_v10 = vld [vmem:[%s4583_s28 + $0x220] sm:$0xff] }
 0x155   : > { %8866 = vst [vmem:[#allocation37_spill] sm:$0xff] %v4958_v10  ;;  %v1053_v56 = vsel %vm848_vm0, %v4958_v10, 0.0 }
 0x156   : > { %v4942_v27 = vpop.xlane.xlu2 %910  ;;  %v4944_v31 = vpop.xlane.xlu1 %907 }
 0x157   : > { %8862 = vst [vmem:[#allocation33_spill] sm:$0xff] %v4942_v27  ;;  %v4949_v44 = vpop.xlane.xlu0 %904 }
 0x158   : > { %8863 = vst [vmem:[#allocation34_spill] sm:$0xff] %v4944_v31  ;;  %v4961_v31 = vld [vmem:[%s4583_s28 + $0x218] sm:$0xff] }
 0x159   : > { %8865 = vst [vmem:[#allocation36_spill] sm:$0xff] %v4949_v44 }
 0x15a   : > { %8867 = vst [vmem:[#allocation38_spill] sm:$0xff] %v4961_v31 }
 0x15b   : > { %1045 = vadd.xlane.f32.xlu2 %v1044_v63  ;;  %1042 = vadd.xlane.f32.xlu1 %v1041_v3  ;;  %v1050_v63 = vsel %vm848_vm0, %v4961_v31, 0.0  ;;  %v1047_v3 = vsel %vm848_vm0, %v4968_v43, 0.0  ;;  %v1066_v43 = vmul.f32 %v4607_v24, %v4607_v24  ;;  %v1068_v24 = vmul.f32 %v4604_v23, %v4604_v23 }
 0x15c   : > { %1039 = vadd.xlane.f32.xlu0 %v1038_v19  ;;  %v4979_v19 = vld [vmem:[%s4583_s28 + $0x238] sm:$0xff]  ;;  %v1071_v23 = vmul.f32 %v4622_v30, %v4622_v30  ;;  %v1074_v30 = vmul.f32 %v4637_v36, %v4637_v36  ;;  %v1077_v36 = vmul.f32 %v4652_v42, %v4652_v42  ;;  %v1080_v42 = vmul.f32 %v4667_v48, %v4667_v48 }
 0x15d   : > { %8872 = vst [vmem:[#allocation43_spill] sm:$0xff] %v4979_v19  ;;  %v1062_v31 = vsel %vm848_vm0, %v4979_v19, 0.0  ;;  %v1083_v48 = vmul.f32 %v4682_v54, %v4682_v54  ;;  %v1086_v54 = vmul.f32 %v4697_v60, %v4697_v60  ;;  %v1089_v60 = vmul.f32 %v4712_v2, %v4712_v2 }
 0x15e   : > { %v4963_v44 = vpop.xlane.xlu2 %919  ;;  %v4965_v27 = vpop.xlane.xlu1 %916  ;;  %v1092_v2 = vmul.f32 %v4727_v8, %v4727_v8  ;;  %v1095_v8 = vmul.f32 %v4742_v14, %v4742_v14  ;;  %v1098_v14 = vmul.f32 %v4757_v26, %v4757_v26  ;;  %v1101_v26 = vmul.f32 %v4772_v38, %v4772_v38 }
 0x15f   : > { %8868 = vst [vmem:[#allocation39_spill] sm:$0xff] %v4963_v44  ;;  %v4970_v11 = vpop.xlane.xlu0 %913  ;;  %v4982_v44 = vld [vmem:[%s4583_s28 + $0x230] sm:$0xff]  ;;  %v1104_v38 = vmul.f32 %v4787_v50, %v4787_v50  ;;  %v1107_v50 = vmul.f32 %v4802_v62, %v4802_v62  ;;  %v1110_v62 = vmul.f32 %v4821_v15, %v4821_v15  ;;  %v1113_v15 = vmul.f32 %v4842_v51, %v4842_v51  ;;  %v8894_v51 = vld [vmem:[#allocation11_spill] sm:$0xff] }
 0x160   : > { %8869 = vst [vmem:[#allocation40_spill] sm:$0xff] %v4965_v27 }
 0x161   : > { %8871 = vst [vmem:[#allocation42_spill] sm:$0xff] %v4970_v11  ;;  %v4989_v11 = vld [vmem:[%s4583_s28 + $0x228] sm:$0xff] }
 0x162   : > { %8873 = vst [vmem:[#allocation44_spill] sm:$0xff] %v4982_v44 }
 0x163   : > { %1054 = vadd.xlane.f32.xlu2 %v1053_v56  ;;  %1051 = vadd.xlane.f32.xlu1 %v1050_v63  ;;  %8875 = vst [vmem:[#allocation46_spill] sm:$0xff] %v4989_v11  ;;  %v1059_v56 = vsel %vm848_vm0, %v4982_v44, 0.0  ;;  %v1056_v63 = vsel %vm848_vm0, %v4989_v11, 0.0 }
 0x164   : > { %1048 = vadd.xlane.f32.xlu0 %v1047_v3  ;;  %v1067_v3 = vmul.f32 %v4589_v17, %v4589_v17  ;;  %v1070_v17 = vmul.f32 %v4601_v22, %v4601_v22  ;;  %v1072_v22 = vmul.f32 %v4619_v29, %v4619_v29  ;;  %v1075_v29 = vmul.f32 %v4634_v35, %v4634_v35 }
 0x165   : > { %v1078_v35 = vmul.f32 %v4649_v41, %v4649_v41  ;;  %v1081_v41 = vmul.f32 %v4664_v47, %v4664_v47  ;;  %v1084_v47 = vmul.f32 %v4679_v53, %v4679_v53  ;;  %v1087_v53 = vmul.f32 %v4694_v59, %v4694_v59 }
 0x166   : > { %v4984_v27 = vpop.xlane.xlu2 %928  ;;  %v4986_v55 = vpop.xlane.xlu1 %925  ;;  %v1143_v11 = vsel %vm848_vm0, %v1067_v3, 0.0  ;;  %v1090_v59 = vmul.f32 %v4709_v1, %v4709_v1  ;;  %v1093_v1 = vmul.f32 %v4724_v7, %v4724_v7  ;;  %v1096_v7 = vmul.f32 %v4739_v13, %v4739_v13 }
 0x167   : > { %8874 = vst [vmem:[#allocation45_spill] sm:$0xff] %v4986_v55  ;;  %v4991_v10 = vpop.xlane.xlu0 %922  ;;  %v1099_v13 = vmul.f32 %v4754_v25, %v4754_v25  ;;  %v1102_v25 = vmul.f32 %v4769_v37, %v4769_v37  ;;  %v1105_v37 = vmul.f32 %v4784_v49, %v4784_v49  ;;  %v1108_v49 = vmul.f32 %v4799_v61, %v4799_v61 }
 0x168   : > { %8876 = vst [vmem:[#allocation47_spill] sm:$0xff] %v4991_v10  ;;  %v1065_v10 = vmul.f32 %v4592_v18, %v4592_v18  ;;  %v1069_v18 = vmul.f32 %v4586_v16, %v4586_v16  ;;  %v1073_v16 = vmul.f32 %v4616_v28, %v4616_v28  ;;  %v1076_v28 = vmul.f32 %v4631_v34, %v4631_v34 }
 0x169   : > { %v1079_v34 = vmul.f32 %v4646_v40, %v4646_v40  ;;  %v1082_v40 = vmul.f32 %v4661_v46, %v4661_v46  ;;  %v1085_v46 = vmul.f32 %v4676_v52, %v4676_v52  ;;  %v1088_v52 = vmul.f32 %v4691_v58, %v4691_v58 }
 0x16a   : > { %v1091_v58 = vmul.f32 %v4706_v0, %v4706_v0  ;;  %v1094_v0 = vmul.f32 %v4721_v6, %v4721_v6  ;;  %v1097_v6 = vmul.f32 %v4736_v12, %v4736_v12  ;;  %v1100_v12 = vmul.f32 %v4751_v21, %v4751_v21 }
 0x16b   : > { %1063 = vadd.xlane.f32.xlu2 %v1062_v31  ;;  %1060 = vadd.xlane.f32.xlu1 %v1059_v56  ;;  %v1140_v31 = vsel %vm848_vm0, %v1066_v43, 0.0  ;;  %v1137_v56 = vsel %vm848_vm0, %v1065_v10, 0.0  ;;  %v1152_v43 = vsel %vm848_vm0, %v1070_v17, 0.0  ;;  %v1146_v10 = vsel %vm848_vm0, %v1068_v24, 0.0 }
 0x16c   : > { %1057 = vadd.xlane.f32.xlu0 %v1056_v63  ;;  %v1158_v24 = vsel %vm848_vm0, %v1072_v22, 0.0  ;;  %v1170_v22 = vsel %vm848_vm0, %v1076_v28, 0.0  ;;  %v1103_v21 = vmul.f32 %v4766_v33, %v4766_v33  ;;  %v1106_v33 = vmul.f32 %v4781_v45, %v4781_v45 }
 0x16d   : > { %v1109_v45 = vmul.f32 %v4796_v57, %v4796_v57  ;;  %v1112_v57 = vmul.f32 %v4811_v5, %v4811_v5  ;;  %v1111_v61 = vmul.f32 %v4814_v9, %v4814_v9  ;;  %v1115_v5 = vmul.f32 %v4832_v32, %v4832_v32 }
 0x16e   : > { %v5005_v55 = vpop.xlane.xlu2 %937  ;;  %v5007_v19 = vpop.xlane.xlu1 %934  ;;  %v1114_v9 = vmul.f32 %v4835_v39, %v4835_v39  ;;  %v1118_v32 = vmul.f32 %v4853_v4, %v4853_v4  ;;  %v1117_v39 = vmul.f32 %v4856_v20, %v4856_v20  ;;  %v8896_v4 = vld [vmem:[#allocation13_spill] sm:$0xff] }
 0x16f   : > { %v5009_v44 = vpop.xlane.xlu0 %931  ;;  %v1121_v20 = vmul.f32 %v8896_v4, %v8896_v4  ;;  %v8903_v4 = vld [vmem:[#allocation20_spill] sm:$0xff] }
 0x170   : > { %8877 = vst [vmem:[#allocation48_spill] sm:$0xff] %v5009_v44 }
 0x173   : > { %1144 = vadd.xlane.f32.xlu2 %v1143_v11  ;;  %1141 = vadd.xlane.f32.xlu1 %v1140_v31  ;;  %v1149_v11 = vsel %vm848_vm0, %v1069_v18, 0.0  ;;  %v1161_v18 = vsel %vm848_vm0, %v1073_v16, 0.0 }
 0x174   : > { %1138 = vadd.xlane.f32.xlu0 %v1137_v56 }
 0x176   : > { %v5020_v63 = vpop.xlane.xlu2 %946  ;;  %v5022_v44 = vpop.xlane.xlu1 %943 }
 0x177   : > { %v5024_v3 = vpop.xlane.xlu0 %940 }
 0x17b   : > { %1153 = vadd.xlane.f32.xlu2 %v1152_v43  ;;  %1150 = vadd.xlane.f32.xlu1 %v1149_v11  ;;  %v1155_v43 = vsel %vm848_vm0, %v1071_v23, 0.0  ;;  %v1167_v23 = vsel %vm848_vm0, %v1075_v29, 0.0  ;;  %v1179_v29 = vsel %vm848_vm0, %v1079_v34, 0.0 }
 0x17c   : > { %1147 = vadd.xlane.f32.xlu0 %v1146_v10 }
 0x17e   : > { %v5035_v31 = vpop.xlane.xlu2 %955  ;;  %v5037_v56 = vpop.xlane.xlu1 %952 }
 0x17f   : > { %v5039_v17 = vpop.xlane.xlu0 %949 }
 0x183   : > { %1162 = vadd.xlane.f32.xlu2 %v1161_v18  ;;  %1159 = vadd.xlane.f32.xlu1 %v1158_v24  ;;  %v1164_v18 = vsel %vm848_vm0, %v1074_v30, 0.0  ;;  %v1176_v30 = vsel %vm848_vm0, %v1078_v35, 0.0  ;;  %v1188_v35 = vsel %vm848_vm0, %v1082_v40, 0.0 }
 0x184   : > { %1156 = vadd.xlane.f32.xlu0 %v1155_v43 }
 0x186   : > { %v5050_v11 = vpop.xlane.xlu2 %964  ;;  %v5052_v10 = vpop.xlane.xlu1 %961 }
 0x187   : > { %v5054_v16 = vpop.xlane.xlu0 %958 }
 0x18b   : > { %1171 = vadd.xlane.f32.xlu2 %v1170_v22  ;;  %1168 = vadd.xlane.f32.xlu1 %v1167_v23  ;;  %v1173_v22 = vsel %vm848_vm0, %v1077_v36, 0.0  ;;  %v1185_v36 = vsel %vm848_vm0, %v1081_v41, 0.0  ;;  %v1197_v41 = vsel %vm848_vm0, %v1085_v46, 0.0 }
 0x18c   : > { %1165 = vadd.xlane.f32.xlu0 %v1164_v18 }
 0x18e   : > { %v5065_v24 = vpop.xlane.xlu2 %973  ;;  %v5067_v43 = vpop.xlane.xlu1 %970 }
 0x18f   : > { %v5069_v28 = vpop.xlane.xlu0 %967 }
 0x193   : > { %1180 = vadd.xlane.f32.xlu2 %v1179_v29  ;;  %1177 = vadd.xlane.f32.xlu1 %v1176_v30  ;;  %v1182_v29 = vsel %vm848_vm0, %v1080_v42, 0.0  ;;  %v1194_v42 = vsel %vm848_vm0, %v1084_v47, 0.0  ;;  %v1206_v47 = vsel %vm848_vm0, %v1088_v52, 0.0 }
 0x194   : > { %1174 = vadd.xlane.f32.xlu0 %v1173_v22 }
 0x196   : > { %v5080_v23 = vpop.xlane.xlu2 %982  ;;  %v5082_v18 = vpop.xlane.xlu1 %979 }
 0x197   : > { %v5084_v34 = vpop.xlane.xlu0 %976 }
 0x19b   : > { %1189 = vadd.xlane.f32.xlu2 %v1188_v35  ;;  %1186 = vadd.xlane.f32.xlu1 %v1185_v36  ;;  %v1191_v35 = vsel %vm848_vm0, %v1083_v48, 0.0  ;;  %v1203_v48 = vsel %vm848_vm0, %v1087_v53, 0.0  ;;  %v1215_v53 = vsel %vm848_vm0, %v1091_v58, 0.0 }
 0x19c   : > { %1183 = vadd.xlane.f32.xlu0 %v1182_v29 }
 0x19e   : > { %v5095_v30 = vpop.xlane.xlu2 %991  ;;  %v5097_v22 = vpop.xlane.xlu1 %988 }
 0x19f   : > { %v5099_v40 = vpop.xlane.xlu0 %985 }
 0x1a3   : > { %1198 = vadd.xlane.f32.xlu2 %v1197_v41  ;;  %1195 = vadd.xlane.f32.xlu1 %v1194_v42  ;;  %v1200_v41 = vsel %vm848_vm0, %v1086_v54, 0.0  ;;  %v1212_v54 = vsel %vm848_vm0, %v1090_v59, 0.0  ;;  %v1224_v59 = vsel %vm848_vm0, %v1094_v0, 0.0 }
 0x1a4   : > { %1192 = vadd.xlane.f32.xlu0 %v1191_v35 }
 0x1a6   : > { %v5110_v36 = vpop.xlane.xlu2 %1000  ;;  %v5112_v29 = vpop.xlane.xlu1 %997 }
 0x1a7   : > { %v5114_v46 = vpop.xlane.xlu0 %994 }
 0x1ab   : > { %1207 = vadd.xlane.f32.xlu2 %v1206_v47  ;;  %1204 = vadd.xlane.f32.xlu1 %v1203_v48  ;;  %v1209_v47 = vsel %vm848_vm0, %v1089_v60, 0.0  ;;  %v1221_v60 = vsel %vm848_vm0, %v1093_v1, 0.0  ;;  %v1233_v1 = vsel %vm848_vm0, %v1097_v6, 0.0 }
 0x1ac   : > { %1201 = vadd.xlane.f32.xlu0 %v1200_v41 }
 0x1ae   : > { %v5125_v42 = vpop.xlane.xlu2 %1009  ;;  %v5127_v35 = vpop.xlane.xlu1 %1006 }
 0x1af   : > { %v5129_v52 = vpop.xlane.xlu0 %1003 }
 0x1b3   : > { %1216 = vadd.xlane.f32.xlu2 %v1215_v53  ;;  %1213 = vadd.xlane.f32.xlu1 %v1212_v54  ;;  %v1218_v53 = vsel %vm848_vm0, %v1092_v2, 0.0  ;;  %v1230_v2 = vsel %vm848_vm0, %v1096_v7, 0.0  ;;  %v1242_v7 = vsel %vm848_vm0, %v1100_v12, 0.0 }
 0x1b4   : > { %1210 = vadd.xlane.f32.xlu0 %v1209_v47 }
 0x1b6   : > { %v5140_v48 = vpop.xlane.xlu2 %1018  ;;  %v5142_v41 = vpop.xlane.xlu1 %1015 }
 0x1b7   : > { %v5144_v58 = vpop.xlane.xlu0 %1012 }
 0x1b8   : > { %8878 = vst [vmem:[#allocation49_spill] sm:$0xff] %v5144_v58 }
 0x1bb   : > { %1225 = vadd.xlane.f32.xlu2 %v1224_v59  ;;  %1222 = vadd.xlane.f32.xlu1 %v1221_v60  ;;  %v1227_v59 = vsel %vm848_vm0, %v1095_v8, 0.0  ;;  %v1239_v8 = vsel %vm848_vm0, %v1099_v13, 0.0  ;;  %v1251_v13 = vsel %vm848_vm0, %v1103_v21, 0.0 }
 0x1bc   : > { %1219 = vadd.xlane.f32.xlu0 %v1218_v53 }
 0x1be   : > { %v5155_v54 = vpop.xlane.xlu2 %1027  ;;  %v5157_v47 = vpop.xlane.xlu1 %1024 }
 0x1bf   : > { %8879 = vst [vmem:[#allocation50_spill] sm:$0xff] %v5155_v54  ;;  %v5159_v0 = vpop.xlane.xlu0 %1021  ;;  %v8950_v54 = vld [vmem:[#allocation27_spill] sm:$0xff] }
 0x1c0   : > { %8880 = vst [vmem:[#allocation51_spill] sm:$0xff] %v5157_v47  ;;  %v8948_v47 = vld [vmem:[#allocation24_spill] sm:$0xff] }
 0x1c1   : > { %8881 = vst [vmem:[#allocation52_spill] sm:$0xff] %v5159_v0  ;;  %v8943_v0 = vld [vmem:[#allocation21_spill] sm:$0xff] }
 0x1c3   : > { %1234 = vadd.xlane.f32.xlu2 %v1233_v1  ;;  %1231 = vadd.xlane.f32.xlu1 %v1230_v2  ;;  %v1236_v1 = vsel %vm848_vm0, %v1098_v14, 0.0  ;;  %v1248_v14 = vsel %vm848_vm0, %v1102_v25, 0.0  ;;  %v1260_v25 = vsel %vm848_vm0, %v1106_v33, 0.0 }
 0x1c4   : > { %1228 = vadd.xlane.f32.xlu0 %v1227_v59 }
 0x1c6   : > { %v5170_v60 = vpop.xlane.xlu2 %1036  ;;  %v5172_v53 = vpop.xlane.xlu1 %1033 }
 0x1c7   : > { %8882 = vst [vmem:[#allocation53_spill] sm:$0xff] %v5170_v60  ;;  %v5174_v6 = vpop.xlane.xlu0 %1030  ;;  %v8941_v60 = vld [vmem:[#allocation18_spill] sm:$0xff] }
 0x1c8   : > { %8883 = vst [vmem:[#allocation54_spill] sm:$0xff] %v5172_v53 }
 0x1c9   : > { %8884 = vst [vmem:[#allocation55_spill] sm:$0xff] %v5174_v6 }
 0x1cb   : > { %1243 = vadd.xlane.f32.xlu2 %v1242_v7  ;;  %1240 = vadd.xlane.f32.xlu1 %v1239_v8  ;;  %v1245_v7 = vsel %vm848_vm0, %v1101_v26, 0.0  ;;  %v1257_v26 = vsel %vm848_vm0, %v1105_v37, 0.0  ;;  %v1269_v37 = vsel %vm848_vm0, %v1109_v45, 0.0 }
 0x1cc   : > { %1237 = vadd.xlane.f32.xlu0 %v1236_v1 }
 0x1ce   : > { %v5185_v2 = vpop.xlane.xlu2 %1045  ;;  %v5187_v59 = vpop.xlane.xlu1 %1042 }
 0x1cf   : > { %8885 = vst [vmem:[#allocation56_spill] sm:$0xff] %v5185_v2  ;;  %v5189_v12 = vpop.xlane.xlu0 %1039  ;;  %v8933_v2 = vld [vmem:[#allocation12_spill] sm:$0xff] }
 0x1d0   : > { %8886 = vst [vmem:[#allocation57_spill] sm:$0xff] %v5187_v59 }
 0x1d1   : > { %8887 = vst [vmem:[#allocation58_spill] sm:$0xff] %v5189_v12 }
 0x1d3   : > { %1252 = vadd.xlane.f32.xlu2 %v1251_v13  ;;  %1249 = vadd.xlane.f32.xlu1 %v1248_v14  ;;  %v1254_v13 = vsel %vm848_vm0, %v1104_v38, 0.0  ;;  %v1266_v38 = vsel %vm848_vm0, %v1108_v49, 0.0  ;;  %v1278_v49 = vsel %vm848_vm0, %v1112_v57, 0.0 }
 0x1d4   : > { %1246 = vadd.xlane.f32.xlu0 %v1245_v7 }
 0x1d6   : > { %v5200_v8 = vpop.xlane.xlu2 %1054  ;;  %v5202_v1 = vpop.xlane.xlu1 %1051 }
 0x1d7   : > { %8888 = vst [vmem:[#allocation59_spill] sm:$0xff] %v5200_v8  ;;  %v5204_v21 = vpop.xlane.xlu0 %1048 }
 0x1d8   : > { %8889 = vst [vmem:[#allocation60_spill] sm:$0xff] %v5202_v1 }
 0x1d9   : > { %8890 = vst [vmem:[#allocation61_spill] sm:$0xff] %v5204_v21 }
 0x1db   : > { %1261 = vadd.xlane.f32.xlu2 %v1260_v25  ;;  %1258 = vadd.xlane.f32.xlu1 %v1257_v26  ;;  %v1263_v25 = vsel %vm848_vm0, %v1107_v50, 0.0  ;;  %v1275_v50 = vsel %vm848_vm0, %v1111_v61, 0.0  ;;  %v1287_v61 = vsel %vm848_vm0, %v1115_v5, 0.0 }
 0x1dc   : > { %1255 = vadd.xlane.f32.xlu0 %v1254_v13 }
 0x1de   : > { %v5215_v14 = vpop.xlane.xlu2 %1063  ;;  %v5217_v7 = vpop.xlane.xlu1 %1060 }
 0x1df   : > { %8891 = vst [vmem:[#allocation62_spill] sm:$0xff] %v5215_v14  ;;  %v5219_v33 = vpop.xlane.xlu0 %1057 }
 0x1e0   : > { %8892 = vst [vmem:[#allocation63_spill] sm:$0xff] %v5217_v7 }
 0x1e1   : > { %8893 = vst [vmem:[#allocation64_spill] sm:$0xff] %v5219_v33 }
 0x1e3   : > { %1270 = vadd.xlane.f32.xlu2 %v1269_v37  ;;  %1267 = vadd.xlane.f32.xlu1 %v1266_v38  ;;  %v1272_v37 = vsel %vm848_vm0, %v1110_v62, 0.0  ;;  %v1284_v62 = vsel %vm848_vm0, %v1114_v9, 0.0  ;;  %v1296_v9 = vsel %vm848_vm0, %v1118_v32, 0.0  ;;  %v1305_v32 = vsel %vm848_vm0, %v1121_v20, 0.0 }
 0x1e4   : > { %1264 = vadd.xlane.f32.xlu0 %v1263_v25 }
 0x1e6   : > { %v5230_v26 = vpop.xlane.xlu2 %1144  ;;  %v5232_v13 = vpop.xlane.xlu1 %1141 }
 0x1e7   : > { %v5234_v45 = vpop.xlane.xlu0 %1138 }
 0x1eb   : > { %1279 = vadd.xlane.f32.xlu2 %v1278_v49  ;;  %1276 = vadd.xlane.f32.xlu1 %v1275_v50  ;;  %v1281_v49 = vsel %vm848_vm0, %v1113_v15, 0.0  ;;  %v1116_v50 = vmul.f32 %v8894_v51, %v8894_v51  ;;  %v1293_v15 = vsel %vm848_vm0, %v1117_v39, 0.0  ;;  %v8898_v51 = vld [vmem:[#allocation17_spill] sm:$0xff] }
 0x1ec   : > { %1273 = vadd.xlane.f32.xlu0 %v1272_v37  ;;  %v1119_v7 = vmul.f32 %v8898_v51, %v8898_v51  ;;  %v8904_v51 = vld [vmem:[#allocation23_spill] sm:$0xff] }
 0x1ee   : > { %v5245_v38 = vpop.xlane.xlu2 %1153  ;;  %v5247_v25 = vpop.xlane.xlu1 %1150 }
 0x1ef   : > { %v5249_v57 = vpop.xlane.xlu0 %1147 }
 0x1f3   : > { %1288 = vadd.xlane.f32.xlu2 %v1287_v61  ;;  %1285 = vadd.xlane.f32.xlu1 %v1284_v62  ;;  %v1290_v61 = vsel %vm848_vm0, %v1116_v50, 0.0  ;;  %v8897_v62 = vld [vmem:[#allocation14_spill] sm:$0xff]  ;;  %v1299_v50 = vsel %vm848_vm0, %v1119_v7, 0.0 }
 0x1f4   : > { %1282 = vadd.xlane.f32.xlu0 %v1281_v49  ;;  %v1120_v49 = vmul.f32 %v8897_v62, %v8897_v62  ;;  %v1123_v62 = vmul.f32 %v8903_v4, %v8903_v4  ;;  %v8909_v4 = vld [vmem:[#allocation26_spill] sm:$0xff] }
 0x1f6   : > { %v5260_v37 = vpop.xlane.xlu2 %1162  ;;  %v5264_v5 = vpop.xlane.xlu1 %1159  ;;  %v1302_v39 = vsel %vm848_vm0, %v1120_v49, 0.0  ;;  %v1311_v49 = vsel %vm848_vm0, %v1123_v62, 0.0  ;;  %v8913_v62 = vld [vmem:[#allocation3_spill] sm:$0xff] }
 0x1f7   : > { %8895 = vst [vmem:[#allocation11_spill] sm:$0xff] %v5260_v37  ;;  %v5262_v33 = vpop.xlane.xlu0 %1156  ;;  %v8939_v37 = vld [vmem:[#allocation16_spill] sm:$0xff] }
 0x1fb   : > { %1297 = vadd.xlane.f32.xlu2 %v1296_v9  ;;  %1294 = vadd.xlane.f32.xlu1 %v1293_v15  ;;  %v8902_v15 = vld [vmem:[#allocation19_spill] sm:$0xff] }
 0x1fc   : > { %1291 = vadd.xlane.f32.xlu0 %v1290_v61  ;;  %v1124_v61 = vmul.f32 %v8902_v15, %v8902_v15 }
 0x1fe   : > { %v5275_v14 = vpop.xlane.xlu2 %1171  ;;  %v5282_v9 = vpop.xlane.xlu1 %1168  ;;  %v1314_v7 = vsel %vm848_vm0, %v1124_v61, 0.0 }
 0x1ff   : > { %8899 = vst [vmem:[#allocation13_spill] sm:$0xff] %v5275_v14  ;;  %v5277_v21 = vpop.xlane.xlu0 %1165 }
 0x200   : > { %8900 = vst [vmem:[#allocation14_spill] sm:$0xff] %v5277_v21  ;;  %v1122_v21 = vmul.f32 %v8904_v51, %v8904_v51  ;;  %v1126_v51 = vmul.f32 %v8909_v4, %v8909_v4 }
 0x201   : > { %8901 = vst [vmem:[#allocation17_spill] sm:$0xff] %v5282_v9  ;;  %v8945_v9 = vld [vmem:[#allocation22_spill] sm:$0xff] }
 0x203   : > { %1306 = vadd.xlane.f32.xlu2 %v1305_v32  ;;  %1303 = vadd.xlane.f32.xlu1 %v1302_v39  ;;  %v1308_v32 = vsel %vm848_vm0, %v1122_v21, 0.0  ;;  %v5310_v21 = vmul.f32 0.020408163, %v8913_v62  ;;  %v8923_v62 = vld [vmem:[#allocation8_spill] sm:$0xff] }
 0x204   : > { %1300 = vadd.xlane.f32.xlu0 %v1299_v50  ;;  %v8908_v50 = vld [vmem:[#allocation25_spill] sm:$0xff]  ;;  %v5328_v59 = vmul.f32 0.020408163, %v8923_v62  ;;  %v8929_v62 = vld [vmem:[#allocation35_spill] sm:$0xff] }
 0x205   : > { %v1127_v15 = vmul.f32 %v8908_v50, %v8908_v50  ;;  %v8917_v50 = vld [vmem:[#allocation5_spill] sm:$0xff] }
 0x206   : > { %v5290_v14 = vpop.xlane.xlu2 %1180  ;;  %v5297_v39 = vpop.xlane.xlu1 %1177  ;;  %v5318_v8 = vmul.f32 0.020408163, %v8917_v50 }
 0x207   : > { %8905 = vst [vmem:[#allocation19_spill] sm:$0xff] %v5290_v14  ;;  %v5292_v20 = vpop.xlane.xlu0 %1174  ;;  %v8910_v14 = vld [vmem:[#allocation29_spill] sm:$0xff] }
 0x208   : > { %8906 = vst [vmem:[#allocation20_spill] sm:$0xff] %v5292_v20  ;;  %v1125_v20 = vmul.f32 %v8910_v14, %v8910_v14  ;;  %v8919_v14 = vld [vmem:[#allocation6_spill] sm:$0xff] }
 0x209   : > { %8907 = vst [vmem:[#allocation23_spill] sm:$0xff] %v5297_v39  ;;  %v5322_v12 = vmul.f32 0.020408163, %v8919_v14  ;;  %v5344_v14 = vmul.f32 %v5318_v8, %v5318_v8 }
 0x20a   : > { %8914 = vst [vmem:[#allocation29_spill] sm:$0xff] %v5310_v21  ;;  %v1317_v4 = vsel %vm848_vm0, %v1125_v20, 0.0  ;;  %v8926_v20 = vld [vmem:[#allocation32_spill] sm:$0xff] }
 0x20b   : > { %1315 = vadd.xlane.f32.xlu2 %v1314_v7  ;;  %1312 = vadd.xlane.f32.xlu1 %v1311_v49  ;;  %v1323_v7 = vsel %vm848_vm0, %v1127_v15, 0.0  ;;  %v1320_v49 = vsel %vm848_vm0, %v1126_v51, 0.0  ;;  %8920 = vst [vmem:[#allocation5_spill] sm:$0xff] %v5322_v12  ;;  %v5332_v15 = vmul.f32 %v5310_v21, %v5310_v21  ;;  %v8925_v51 = vld [vmem:[#allocation31_spill] sm:$0xff]  ;;  %v1129_v50 = vmul.f32 %v8926_v20, %v8926_v20 }
 0x20c   : > { %1309 = vadd.xlane.f32.xlu0 %v1308_v32  ;;  %v8915_v32 = vld [vmem:[#allocation4_spill] sm:$0xff] }
 0x20d   : > { %v5315_v39 = vmul.f32 0.020408163, %v8915_v32  ;;  %8918 = vst [vmem:[#allocation4_spill] sm:$0xff] %v5318_v8  ;;  %v1130_v32 = vmul.f32 %v8925_v51, %v8925_v51  ;;  %v5353_v51 = vmul.f32 %v5322_v12, %v5322_v12  ;;  %v5363_v8 = vmul.f32 0.020408163, %v8933_v2  ;;  %v8937_v12 = vld [vmem:[#allocation15_spill] sm:$0xff] }
 0x20e   : > { %v5305_v1 = vpop.xlane.xlu2 %1189  ;;  %v5365_v6 = vpop.xlane.xlu1 %1186  ;;  %v5374_v53 = vmul.f32 0.020408163, %v8937_v12  ;;  %v5383_v2 = vmul.f32 0.020408163, %v8943_v0 }
 0x20f   : > { %8911 = vst [vmem:[#allocation25_spill] sm:$0xff] %v5305_v1  ;;  %v5307_v61 = vpop.xlane.xlu0 %1183  ;;  %v8921_v1 = vld [vmem:[#allocation7_spill] sm:$0xff] }
 0x210   : > { %8912 = vst [vmem:[#allocation26_spill] sm:$0xff] %v5307_v61  ;;  %v5325_v61 = vmul.f32 0.020408163, %v8921_v1  ;;  %v5340_v1 = vmul.f32 %v5315_v39, %v5315_v39 }
 0x211   : > { %8916 = vst [vmem:[#allocation3_spill] sm:$0xff] %v5315_v39  ;;  %v8931_v39 = vld [vmem:[#allocation10_spill] sm:$0xff] }
 0x212   : > { %8922 = vst [vmem:[#allocation6_spill] sm:$0xff] %v5325_v61  ;;  %v5357_v20 = vmul.f32 %v5325_v61, %v5325_v61  ;;  %v5360_v21 = vmul.f32 0.020408163, %v8931_v39  ;;  %v5377_v61 = vmul.f32 0.020408163, %v8939_v37 }
 0x213   : > { %8924 = vst [vmem:[#allocation7_spill] sm:$0xff] %v5328_v59  ;;  %1324 = vadd.xlane.f32.xlu2 %v1323_v7  ;;  %1321 = vadd.xlane.f32.xlu1 %v1320_v49  ;;  %v8927_v7 = vld [vmem:[#allocation9_spill] sm:$0xff]  ;;  %v5380_v39 = vmul.f32 0.020408163, %v8941_v60  ;;  %v5395_v37 = vmul.f32 0.020408163, %v8948_v47 }
 0x214   : > { %1318 = vadd.xlane.f32.xlu0 %v1317_v4  ;;  %v5347_v49 = vmul.f32 0.020408163, %v8927_v7  ;;  %v1128_v4 = vmul.f32 %v8929_v62, %v8929_v62  ;;  %8930 = vst [vmem:[#allocation31_spill] sm:$0xff] %v5357_v20  ;;  %v5371_v62 = vmul.f32 %v5328_v59, %v5328_v59  ;;  %v1329_v59 = vsel %vm848_vm0, %v1129_v50, 0.0  ;;  %v8953_v50 = vld [vmem:[#allocation28_spill] sm:$0xff]  ;;  %v8955_v47 = vld [vmem:[#allocation30_spill] sm:$0xff] }
 0x215   : > { %8932 = vst [vmem:[#allocation32_spill] sm:$0xff] %v5360_v21  ;;  %v5398_v60 = vmul.f32 0.020408163, %v8950_v54  ;;  %v5419_v54 = vmul.f32 %v5374_v53, %v5374_v53  ;;  %v8959_v20 = vld [vmem:[#allocation34_spill] sm:$0xff] }
 0x216   : > { %8928 = vst [vmem:[#allocation8_spill] sm:$0xff] %v5347_v49  ;;  %v5367_v7 = vpop.xlane.xlu2 %1198  ;;  %v5392_v12 = vmul.f32 %v5347_v49, %v5347_v49  ;;  %v1326_v0 = vsel %vm848_vm0, %v1128_v4, 0.0  ;;  %v5412_v49 = vmul.f32 0.020408163, %v8953_v50  ;;  %v5423_v4 = vmul.f32 %v5377_v61, %v5377_v61 }
 0x217   : > { %8934 = vst [vmem:[#allocation9_spill] sm:$0xff] %v5363_v8  ;;  %v5400_v58 = vpop.xlane.xlu0 %1192  ;;  %v5433_v50 = vmul.f32 %v5380_v39, %v5380_v39 }
 0x218   : > { %8935 = vst [vmem:[#allocation35_spill] sm:$0xff] %v5365_v6  ;;  %v5386_v6 = vmul.f32 0.020408163, %v8945_v9  ;;  %v5405_v9 = vmul.f32 %v5360_v21, %v5360_v21  ;;  %v8957_v21 = vld [vmem:[#allocation33_spill] sm:$0xff] }
 0x219   : > { %8936 = vst [vmem:[#allocation10_spill] sm:$0xff] %v5367_v7  ;;  %v1332_v7 = vsel %vm848_vm0, %v1130_v32, 0.0  ;;  %v5409_v32 = vmul.f32 %v5363_v8, %v5363_v8  ;;  %v5429_v8 = vmul.f32 0.020408163, %v8959_v20  ;;  %v5448_v20 = vmul.f32 %v5395_v37, %v5395_v37 }
 0x21a   : > { %8938 = vst [vmem:[#allocation12_spill] sm:$0xff] %v5374_v53  ;;  %v5441_v53 = vmul.f32 %v5386_v6, %v5386_v6 }
 0x21b   : > { %8940 = vst [vmem:[#allocation15_spill] sm:$0xff] %v5377_v61  ;;  %1333 = vadd.xlane.f32.xlu2 %v1332_v7  ;;  %1330 = vadd.xlane.f32.xlu1 %v1329_v59  ;;  %v8962_v61 = vld [vmem:[#allocation36_spill] sm:$0xff]  ;;  %v5452_v59 = vmul.f32 %v5398_v60, %v5398_v60  ;;  %v8965_v7 = vld [vmem:[#allocation39_spill] sm:$0xff] }
 0x21c   : > { %8942 = vst [vmem:[#allocation16_spill] sm:$0xff] %v5380_v39  ;;  %1327 = vadd.xlane.f32.xlu0 %v1326_v0  ;;  %v5455_v39 = vmul.f32 0.020408163, %v8965_v7  ;;  %v8971_v0 = vld [vmem:[#allocation42_spill] sm:$0xff]  ;;  %v5482_v7 = vmul.f32 %v5429_v8, %v5429_v8 }
 0x21d   : > { %8944 = vst [vmem:[#allocation18_spill] sm:$0xff] %v5383_v2 }
 0x21e   : > { %8946 = vst [vmem:[#allocation21_spill] sm:$0xff] %v5386_v6  ;;  %v5462_v6 = vmul.f32 %v5412_v49, %v5412_v49 }
 0x21f   : > { %8947 = vst [vmem:[#allocation22_spill] sm:$0xff] %v5392_v12  ;;  %v5415_v12 = vmul.f32 0.020408163, %v8955_v47  ;;  %v5437_v47 = vmul.f32 %v5383_v2, %v5383_v2  ;;  %v8967_v2 = vld [vmem:[#allocation40_spill] sm:$0xff] }
 0x220   : > { %8949 = vst [vmem:[#allocation24_spill] sm:$0xff] %v5395_v37  ;;  %v5469_v37 = vmul.f32 0.020408163, %v8971_v0  ;;  %v5495_v0 = vmul.f32 0.020408163, %v5005_v55  ;;  %v8986_v55 = vld [vmem:[#allocation37_spill] sm:$0xff] }
 0x221   : > { %8951 = vst [vmem:[#allocation27_spill] sm:$0xff] %v5398_v60  ;;  %v5472_v60 = vmul.f32 0.020408163, %v4984_v27 }
 0x222   : > { %8952 = vst [vmem:[#allocation65_spill] sm:$0xff] %v5400_v58  ;;  %v5426_v58 = vmul.f32 0.020408163, %v8957_v21  ;;  %v5444_v21 = vmul.f32 0.020408163, %v8962_v61  ;;  %v5466_v61 = vmul.f32 %v5415_v12, %v5415_v12 }
 0x223   : > { %8954 = vst [vmem:[#allocation28_spill] sm:$0xff] %v5412_v49  ;;  %v8976_v49 = vld [vmem:[#allocation45_spill] sm:$0xff] }
 0x224   : > { %8956 = vst [vmem:[#allocation30_spill] sm:$0xff] %v5415_v12  ;;  %v8978_v12 = vld [vmem:[#allocation47_spill] sm:$0xff]  ;;  %v5492_v27 = vmul.f32 %v5444_v21, %v5444_v21 }
 0x225   : > { %8958 = vst [vmem:[#allocation33_spill] sm:$0xff] %v5426_v58 }
 0x226   : > { %8960 = vst [vmem:[#allocation34_spill] sm:$0xff] %v5429_v8  ;;  %v5503_v8 = vpop.xlane.xlu1 %1195 }
 0x227   : > { %8961 = vst [vmem:[#allocation66_spill] sm:$0xff] %v5437_v47  ;;  %v5458_v47 = vmul.f32 0.020408163, %v8967_v2  ;;  %v5478_v2 = vmul.f32 %v5426_v58, %v5426_v58  ;;  %v5498_v58 = vmul.f32 0.020408163, %v5007_v19  ;;  %v1133_v19 = vmul.f32 %v8986_v55, %v8986_v55 }
 0x228   : > { %8963 = vst [vmem:[#allocation36_spill] sm:$0xff] %v5444_v21  ;;  %v5514_v21 = vmul.f32 0.020408163, %v5020_v63 }
 0x229   : > { %8964 = vst [vmem:[#allocation67_spill] sm:$0xff] %v5452_v59  ;;  %v5474_v59 = vpop.xlane.xlu2 %1207 }
 0x22a   : > { %8966 = vst [vmem:[#allocation39_spill] sm:$0xff] %v5455_v39 }
 0x22b   : > { %8968 = vst [vmem:[#allocation40_spill] sm:$0xff] %v5458_v47 }
 0x22c   : > { %8969 = vst [vmem:[#allocation68_spill] sm:$0xff] %v5462_v6  ;;  %v5485_v6 = vmul.f32 0.020408163, %v8976_v49  ;;  %v5507_v49 = vmul.f32 %v5455_v39, %v5455_v39  ;;  %v5527_v39 = vmul.f32 0.020408163, %v5022_v44  ;;  %v5550_v44 = vmul.f32 %v5495_v0, %v5495_v0 }
 0x22d   : > { %8970 = vst [vmem:[#allocation69_spill] sm:$0xff] %v5466_v61  ;;  %v5488_v61 = vmul.f32 0.020408163, %v8978_v12  ;;  %v5511_v12 = vmul.f32 %v5458_v47, %v5458_v47  ;;  %v5530_v47 = vmul.f32 0.020408163, %v5024_v3  ;;  %v5554_v3 = vmul.f32 %v5498_v58, %v5498_v58 }
 0x22e   : > { %8972 = vst [vmem:[#allocation42_spill] sm:$0xff] %v5469_v37  ;;  %v5534_v63 = vmul.f32 %v5485_v6, %v5485_v6 }
 0x22f   : > { %8973 = vst [vmem:[#allocation70_spill] sm:$0xff] %v5472_v60  ;;  %v5538_v55 = vmul.f32 %v5488_v61, %v5488_v61 }
 0x230   : > { %8974 = vst [vmem:[#allocation71_spill] sm:$0xff] %v5474_v59  ;;  %v8983_v59 = vld [vmem:[#allocation48_spill] sm:$0xff] }
 0x231   : > { %8975 = vst [vmem:[#allocation72_spill] sm:$0xff] %v5478_v2  ;;  %v5501_v2 = vmul.f32 0.020408163, %v8983_v59  ;;  %v5520_v59 = vmul.f32 %v5469_v37, %v5469_v37  ;;  %v5541_v37 = vmul.f32 0.020408163, %v5035_v31 }
 0x232   : > { %8977 = vst [vmem:[#allocation45_spill] sm:$0xff] %v5485_v6  ;;  %v5561_v31 = vmul.f32 0.020408163, %v5039_v17  ;;  %v5568_v6 = vmul.f32 0.020408163, %v5050_v11  ;;  %v5579_v17 = vmul.f32 %v5530_v47, %v5530_v47  ;;  %v5585_v11 = vpop.xlane.xlu2 %1216 }
 0x233   : > { %8979 = vst [vmem:[#allocation47_spill] sm:$0xff] %v5488_v61  ;;  %v5558_v61 = vmul.f32 %v5501_v2, %v5501_v2 }
 0x234   : > { %8980 = vst [vmem:[#allocation73_spill] sm:$0xff] %v5492_v27  ;;  %v5524_v27 = vmul.f32 %v5472_v60, %v5472_v60  ;;  %v5544_v60 = vmul.f32 0.020408163, %v5037_v56  ;;  %v5565_v56 = vmul.f32 %v5514_v21, %v5514_v21 }
 0x235   : > { %8981 = vst [vmem:[#allocation74_spill] sm:$0xff] %v5495_v0  ;;  %v1341_v0 = vsel %vm848_vm0, %v1133_v19, 0.0  ;;  %v5589_v19 = vmul.f32 %v5541_v37, %v5541_v37 }
 0x236   : > { %8982 = vst [vmem:[#allocation75_spill] sm:$0xff] %v5498_v58  ;;  %1342 = vadd.xlane.f32.xlu2 %v1341_v0  ;;  %v5609_v0 = vmul.f32 0.020408163, %v5069_v28  ;;  %v5630_v28 = vmul.f32 0.020408163, %v5095_v30  ;;  %v9018_v30 = vld [vmem:[#allocation41_spill] sm:$0xff] }
 0x237   : > { %8984 = vst [vmem:[#allocation48_spill] sm:$0xff] %v5501_v2  ;;  %v5582_v2 = vmul.f32 0.020408163, %v5052_v10  ;;  %v5603_v10 = vmul.f32 %v5561_v31, %v5561_v31 }
 0x238   : > { %8985 = vst [vmem:[#allocation76_spill] sm:$0xff] %v5514_v21  ;;  %v1425_v21 = vmul.f32 0.020408163, %v5234_v45  ;;  %v5606_v45 = vmul.f32 0.020408163, %v5067_v43 }
 0x239   : > { %8987 = vst [vmem:[#allocation37_spill] sm:$0xff] %v5524_v27  ;;  %v5546_v27 = vpop.xlane.xlu0 %1201  ;;  %v5627_v43 = vmul.f32 %v5582_v2, %v5582_v2 }
 0x23a   : > { %8988 = vst [vmem:[#allocation77_spill] sm:$0xff] %v5527_v39 }
 0x23b   : > { %8989 = vst [vmem:[#allocation78_spill] sm:$0xff] %v5530_v47  ;;  %v5599_v47 = vmul.f32 0.020408163, %v5065_v24  ;;  %v5619_v24 = vmul.f32 0.020408163, %v5082_v18 }
 0x23c   : > { %8990 = vst [vmem:[#allocation79_spill] sm:$0xff] %v5541_v37  ;;  %v5612_v37 = vmul.f32 0.020408163, %v5080_v23  ;;  %v5633_v23 = vmul.f32 0.020408163, %v5097_v22  ;;  %v1131_v22 = vmul.f32 %v9018_v30, %v9018_v30 }
 0x23d   : > { %8991 = vst [vmem:[#allocation80_spill] sm:$0xff] %v5544_v60  ;;  %v5669_v30 = vmul.f32 %v5619_v24, %v5619_v24 }
 0x23e   : > { %8992 = vst [vmem:[#allocation81_spill] sm:$0xff] %v5550_v44  ;;  %v8997_v44 = vld [vmem:[#allocation38_spill] sm:$0xff] }
 0x23f   : > { %8993 = vst [vmem:[#allocation82_spill] sm:$0xff] %v5554_v3  ;;  %v1132_v58 = vmul.f32 %v8997_v44, %v8997_v44  ;;  %v5575_v3 = vmul.f32 %v5527_v39, %v5527_v39  ;;  %v5593_v44 = vmul.f32 %v5544_v60, %v5544_v60  ;;  %v5596_v39 = vmul.f32 0.020408163, %v5054_v16 }
 0x240   : > { %8994 = vst [vmem:[#allocation83_spill] sm:$0xff] %v5561_v31  ;;  %v5616_v16 = vmul.f32 %v5568_v6, %v5568_v6  ;;  %v5622_v60 = vmul.f32 0.020408163, %v5084_v34  ;;  %v5644_v34 = vmul.f32 %v5599_v47, %v5599_v47 }
 0x241   : > { %8995 = vst [vmem:[#allocation84_spill] sm:$0xff] %v5565_v56  ;;  %v1338_v31 = vsel %vm848_vm0, %v1132_v58, 0.0  ;;  %v5640_v18 = vmul.f32 %v5596_v39, %v5596_v39  ;;  %v5647_v58 = vmul.f32 0.020408163, %v5099_v40  ;;  %v5665_v40 = vmul.f32 %v5612_v37, %v5612_v37 }
 0x242   : > { %8996 = vst [vmem:[#allocation85_spill] sm:$0xff] %v5568_v6  ;;  %v1569_v6 = vsub.f32 %v1425_v21, %v5344_v14  ;;  %1339 = vadd.xlane.f32.xlu1 %v1338_v31  ;;  %v5653_v14 = vmul.f32 %v5606_v45, %v5606_v45  ;;  %v5657_v21 = vmul.f32 %v5609_v0, %v5609_v0  ;;  %v5660_v31 = vmul.f32 0.020408163, %v5110_v36 }
 0x243   : > { %8998 = vst [vmem:[#allocation38_spill] sm:$0xff] %v5575_v3  ;;  %v5680_v36 = vmul.f32 %v5630_v28, %v5630_v28 }
 0x244   : > { %8999 = vst [vmem:[#allocation86_spill] sm:$0xff] %v5579_v17  ;;  %v9108_v17 = vld [vmem:[#allocation35_spill] sm:$0xff] }
 0x245   : > { %9000 = vst [vmem:[#allocation87_spill] sm:$0xff] %v5582_v2  ;;  %v5687_v2 = vpop.xlane.xlu2 %1225 }
 0x246   : > { %9001 = vst [vmem:[#allocation88_spill] sm:$0xff] %v5589_v19 }
 0x247   : > { %9002 = vst [vmem:[#allocation89_spill] sm:$0xff] %v5593_v44 }
 0x248   : > { %9003 = vst [vmem:[#allocation90_spill] sm:$0xff] %v5596_v39  ;;  %v5673_v39 = vmul.f32 %v5622_v60, %v5622_v60 }
 0x249   : > { %9004 = vst [vmem:[#allocation91_spill] sm:$0xff] %v5599_v47  ;;  %v1427_v47 = vmul.f32 0.020408163, %v5230_v26  ;;  %v5684_v26 = vmul.f32 %v5633_v23, %v5633_v23 }
 0x24a   : > { %9005 = vst [vmem:[#allocation92_spill] sm:$0xff] %v5603_v10 }
 0x24b   : > { %9006 = vst [vmem:[#allocation93_spill] sm:$0xff] %v5606_v45  ;;  %v5676_v45 = vpop.xlane.xlu0 %1210 }
 0x24c   : > { %9007 = vst [vmem:[#allocation94_spill] sm:$0xff] %v5609_v0  ;;  %v1430_v0 = vmul.f32 0.020408163, %v5245_v38  ;;  %v5694_v38 = vmul.f32 0.020408163, %v5112_v29 }
 0x24d   : > { %9008 = vst [vmem:[#allocation95_spill] sm:$0xff] %v5612_v37  ;;  %v1426_v37 = vmul.f32 0.020408163, %v5232_v13  ;;  %v5703_v13 = vmul.f32 0.020408163, %v5114_v46 }
 0x24e   : > { %9009 = vst [vmem:[#allocation96_spill] sm:$0xff] %v5616_v16  ;;  %v5636_v16 = vpop.xlane.xlu1 %1204  ;;  %v1574_v29 = vsub.f32 %v1430_v0, %v5353_v51 }
 0x24f   : > { %9010 = vst [vmem:[#allocation97_spill] sm:$0xff] %v5619_v24  ;;  %v1641_v24 = vmax.f32 %v1569_v6, 0.0  ;;  %v5706_v6 = vmul.f32 0.020408163, %v5125_v42  ;;  %v1428_v42 = vmul.f32 0.020408163, %v5249_v57 }
 0x250   : > { %9011 = vst [vmem:[#allocation98_spill] sm:$0xff] %v5622_v60  ;;  %v5691_v60 = vmul.f32 %v5647_v58, %v5647_v58  ;;  %v5735_v57 = vmul.f32 0.020408163, %v5140_v48  ;;  %v9040_v48 = vld [vmem:[#allocation31_spill] sm:$0xff] }
 0x251   : > { %9012 = vst [vmem:[#allocation99_spill] sm:$0xff] %v5627_v43  ;;  %v5716_v46 = vadd.f32 0.001, %v1641_v24 }
 0x252   : > { %9013 = vst [vmem:[#allocation100_spill] sm:$0xff] %v5630_v28  ;;  %v1335_v28 = vsel %vm848_vm0, %v1131_v22, 0.0 }
 0x253   : > { %9014 = vst [vmem:[#allocation101_spill] sm:$0xff] %v5633_v23  ;;  %v5700_v23 = vmul.f32 %v5660_v31, %v5660_v31  ;;  %1336 = vadd.xlane.f32.xlu0 %v1335_v28  ;;  %v5729_v28 = vmul.f32 %v5694_v38, %v5694_v38  ;;  %3989 = vrsqrt.f32 %v5716_v46  ;;  %vm1791_vm1 = vweird.f32 %v5716_v46 }
 0x254   : > { %9015 = vst [vmem:[#allocation102_spill] sm:$0xff] %v5640_v18 }
 0x255   : > { %9016 = vst [vmem:[#allocation103_spill] sm:$0xff] %v5644_v34 }
 0x256   : > { %9017 = vst [vmem:[#allocation104_spill] sm:$0xff] %v5647_v58  ;;  %v1571_v58 = vsub.f32 %v1427_v47, %v5340_v1  ;;  %v5722_v47 = vmul.f32 0.020408163, %v5127_v35  ;;  %v5737_v24 = vpop.xlane.xlu1 %1213  ;;  %v1646_v35 = vmax.f32 %v1574_v29, 0.0  ;;  %v5753_v29 = vmul.f32 %v5706_v6, %v5706_v6 }
 0x257   : > { %9019 = vst [vmem:[#allocation41_spill] sm:$0xff] %v5653_v14 }
 0x258   : > { %9020 = vst [vmem:[#allocation105_spill] sm:$0xff] %v5657_v21 }
 0x259   : > { %9021 = vst [vmem:[#allocation106_spill] sm:$0xff] %v5660_v31 }
 0x25a   : > { %9022 = vst [vmem:[#allocation107_spill] sm:$0xff] %v5665_v40 }
 0x25b   : > { %9023 = vst [vmem:[#allocation108_spill] sm:$0xff] %v5669_v30 }
 0x25c   : > { %9024 = vst [vmem:[#allocation109_spill] sm:$0xff] %v5673_v39  ;;  %v1429_v39 = vmul.f32 0.020408163, %v5247_v25  ;;  %v9032_v25 = vld [vmem:[#allocation43_spill] sm:$0xff] }
 0x25d   : > { %9025 = vst [vmem:[#allocation110_spill] sm:$0xff] %v5680_v36  ;;  %v1136_v22 = vmul.f32 %v9032_v25, %v9032_v25  ;;  %v9034_v36 = vld [vmem:[#allocation46_spill] sm:$0xff]  ;;  %v5758_v25 = vpop.xlane.xlu0 %1219 }
 0x25e   : > { %9026 = vst [vmem:[#allocation111_spill] sm:$0xff] %v5684_v26  ;;  %v9033_v26 = vld [vmem:[#allocation44_spill] sm:$0xff]  ;;  %v1134_v1 = vmul.f32 %v9034_v36, %v9034_v36  ;;  %v5743_v36 = vmul.f32 0.020408163, %v5142_v41  ;;  %v5760_v41 = vpop.xlane.xlu2 %1234 }
 0x25f   : > { %9027 = vst [vmem:[#allocation112_spill] sm:$0xff] %v5691_v60  ;;  %v1432_v60 = vmul.f32 0.020408163, %v5264_v5  ;;  %v1135_v31 = vmul.f32 %v9033_v26, %v9033_v26  ;;  %v1573_v5 = vsub.f32 %v1429_v39, %v5332_v15  ;;  %v1350_v51 = vsel %vm848_vm0, %v1136_v22, 0.0 }
 0x260   : > { %9028 = vst [vmem:[#allocation113_spill] sm:$0xff] %v5694_v38  ;;  %1351 = vadd.xlane.f32.xlu2 %v1350_v51  ;;  %v1431_v39 = vmul.f32 0.020408163, %v5262_v33  ;;  %v1572_v26 = vsub.f32 %v1428_v42, %v9040_v48  ;;  %v9047_v42 = vld [vmem:[#allocation50_spill] sm:$0xff] }
 0x261   : > { %9029 = vst [vmem:[#allocation114_spill] sm:$0xff] %v5700_v23  ;;  %v1570_v23 = vsub.f32 %v1426_v37, %v5371_v62  ;;  %v1347_v0 = vsel %vm848_vm0, %v1135_v31, 0.0  ;;  %v5732_v62 = vmul.f32 0.020408163, %v5129_v52  ;;  %v1643_v37 = vmax.f32 %v1571_v58, 0.0 }
 0x262   : > { %9030 = vst [vmem:[#allocation115_spill] sm:$0xff] %v5703_v13  ;;  %1348 = vadd.xlane.f32.xlu1 %v1347_v0  ;;  %v1576_v15 = vsub.f32 %v1432_v60, %v5405_v9  ;;  %v1344_v31 = vsel %vm848_vm0, %v1134_v1, 0.0  ;;  %v5749_v58 = vmul.f32 %v5703_v13, %v5703_v13  ;;  %v9043_v60 = vld [vmem:[#allocation49_spill] sm:$0xff]  ;;  %v1645_v9 = vmax.f32 %v1573_v5, 0.0 }
 0x263   : > { %9031 = vst [vmem:[#allocation116_spill] sm:$0xff] %v5706_v6  ;;  %v1642_v52 = vmax.f32 %v1570_v23, 0.0  ;;  %v5756_v33 = vmul.f32 0.020408163, %v9043_v60  ;;  %v5764_v23 = vmul.f32 %v5722_v47, %v5722_v47  ;;  %v5768_v22 = vmul.f32 %v5732_v62, %v5732_v62  ;;  %1345 = vadd.xlane.f32.xlu0 %v1344_v31 }
 0x264   : > { %9035 = vst [vmem:[#allocation43_spill] sm:$0xff] %v5722_v47  ;;  %v5771_v1 = vmul.f32 0.020408163, %v9047_v42  ;;  %v5773_v51 = vadd.f32 0.001, %v1643_v37  ;;  %v5777_v5 = vmul.f32 %v5735_v57, %v5735_v57  ;;  %v1648_v48 = vmax.f32 %v1576_v15, 0.0  ;;  %v5798_v47 = vpop.eup %3989 }
 0x265   : > { %9036 = vst [vmem:[#allocation44_spill] sm:$0xff] %v5729_v28  ;;  %v5779_v0 = vadd.f32 0.001, %v1646_v35  ;;  %v1575_v60 = vsub.f32 %v1431_v39, %v5409_v32  ;;  %v5784_v6 = vmul.f32 %v5743_v36, %v5743_v36  ;;  %v5789_v42 = vadd.f32 0.001, %v1642_v52  ;;  %v9054_v35 = vld [vmem:[#allocation17_spill] sm:$0xff] }
 0x266   : > { %9037 = vst [vmem:[#allocation46_spill] sm:$0xff] %v5732_v62  ;;  %v9051_v62 = vld [vmem:[#allocation51_spill] sm:$0xff]  ;;  %v1644_v37 = vmax.f32 %v1572_v26, 0.0  ;;  %v5793_v31 = vmul.f32 %v5756_v33, %v5756_v33  ;;  %v1435_v15 = vmul.f32 0.020408163, %v9054_v35  ;;  %v5802_v32 = vmul.f32 %v5771_v1, %v5771_v1  ;;  %v9056_v39 = vld [vmem:[#allocation52_spill] sm:$0xff] }
 0x267   : > { %9038 = vst [vmem:[#allocation117_spill] sm:$0xff] %v5735_v57  ;;  %v5787_v13 = vmul.f32 0.020408163, %v9051_v62  ;;  %v5795_v57 = vadd.f32 0.001, %v1645_v9  ;;  %v9058_v52 = vld [vmem:[#allocation53_spill] sm:$0xff]  ;;  %3991 = vrsqrt.f32 %v5773_v51  ;;  %vm1792_vm2 = vweird.f32 %v5798_v47 }
 0x268   : > { %9039 = vst [vmem:[#allocation118_spill] sm:$0xff] %v5743_v36  ;;  %v5805_v62 = vmul.f32 0.020408163, %v9056_v39  ;;  %v5808_v36 = vmul.f32 0.020408163, %v9058_v52  ;;  %v4229_v26 = vmov 0   ;;  %3993 = vrsqrt.f32 %v5779_v0  ;;  %vm1793_vm3 = vmor %vm1791_vm1, %vm1792_vm2 }
 0x269   : > { %9041 = vst [vmem:[#allocation31_spill] sm:$0xff] %v5749_v58  ;;  %3986 = vset.pattern.permute.xlu0 %v4229_v26  ;;  %3988 = vset.pattern.permute.xlu2 %v4229_v26  ;;  %v9060_v9 = vld [vmem:[#allocation11_spill] sm:$0xff]  ;;  %v1647_v38 = vmax.f32 %v1575_v60, 0.0  ;;  %3995 = vrsqrt.f32 %v5789_v42  ;;  %v5822_v52 = vadd.f32 0.001, %v1644_v37  ;;  %v9083_v58 = vld [vmem:[#allocation13_spill] sm:$0xff]  ;;  %vm1811_vm9 = vweird.f32 %v5773_v51 }
 0x26a   : > { %9042 = vst [vmem:[#allocation119_spill] sm:$0xff] %v5753_v29  ;;  %v1433_v35 = vmul.f32 0.020408163, %v9060_v9  ;;  %3987 = vset.pattern.permute.xlu1 %v4229_v26  ;;  %v9063_v39 = vld [vmem:[#allocation55_spill] sm:$0xff]  ;;  %3997 = vrsqrt.f32 %v5795_v57  ;;  %v5836_v60 = vmul.f32 %v5805_v62, %v5805_v62  ;;  %v9067_v26 = vld [vmem:[#allocation56_spill] sm:$0xff]  ;;  %v9069_v9 = vld [vmem:[#allocation57_spill] sm:$0xff]  ;;  %vm1831_vm11 = vweird.f32 %v5795_v57 }
 0x26b   : > { %9044 = vst [vmem:[#allocation49_spill] sm:$0xff] %v5756_v33  ;;  %v5813_v33 = vadd.f32 0.001, %v1648_v48  ;;  %v1786_v48 = vmul.f32 %v5798_v47, %v5716_v46  ;;  %v5839_v37 = vmul.f32 0.020408163, %v9067_v26  ;;  %v9074_v29 = vld [vmem:[#allocation22_spill] sm:$0xff]  ;;  %v5857_v26 = vpop.xlane.xlu2 %1243  ;;  %vm1821_vm8 = vweird.f32 %v5822_v52 }
 0x26c   : > { %9045 = vst [vmem:[#allocation120_spill] sm:$0xff] %v5764_v23  ;;  %v1577_v23 = vsub.f32 %v1433_v35, %v9074_v29  ;;  %v9081_v35 = vld [vmem:[#allocation60_spill] sm:$0xff]  ;;  %v1436_v28 = vmul.f32 0.020408163, %v9083_v58  ;;  %vm1801_vm13 = vweird.f32 %v5789_v42 }
 0x26d   : > { %9046 = vst [vmem:[#allocation121_spill] sm:$0xff] %v5768_v22  ;;  %v9071_v22 = vld [vmem:[#allocation58_spill] sm:$0xff]  ;;  %3999 = vrsqrt.f32 %v5813_v33  ;;  %vm1861_vm5 = vweird.f32 %v5813_v33 }
 0x26e   : > { %9048 = vst [vmem:[#allocation50_spill] sm:$0xff] %v5771_v1  ;;  %v9061_v1 = vld [vmem:[#allocation54_spill] sm:$0xff]  ;;  %4001 = vrsqrt.f32 %v5822_v52  ;;  %v1649_v30 = vmax.f32 %v1577_v23, 0.0 }
 0x26f   : > { %9049 = vst [vmem:[#allocation122_spill] sm:$0xff] %v5777_v5  ;;  %v5824_v5 = vpop.xlane.xlu1 %1222 }
 0x270   : > { %9050 = vst [vmem:[#allocation123_spill] sm:$0xff] %v5784_v6  ;;  %v5828_v6 = vmul.f32 %v5787_v13, %v5787_v13 }
 0x271   : > { %9052 = vst [vmem:[#allocation51_spill] sm:$0xff] %v5787_v13  ;;  %v5845_v13 = vmul.f32 0.020408163, %v9071_v22 }
 0x272   : > { %9053 = vst [vmem:[#allocation124_spill] sm:$0xff] %v5793_v31  ;;  %v5819_v31 = vmul.f32 0.020408163, %v9063_v39  ;;  %v5842_v39 = vmul.f32 0.020408163, %v9069_v9 }
 0x273   : > { %9055 = vst [vmem:[#allocation17_spill] sm:$0xff] %v5802_v32  ;;  %v5816_v32 = vmul.f32 0.020408163, %v9061_v1  ;;  %v1579_v1 = vsub.f32 %v1435_v15, %v5423_v4  ;;  %v5853_v4 = vadd.f32 0.001, %v1647_v38  ;;  %v5855_v15 = vpop.xlane.xlu0 %1228 }
 0x274   : > { %9057 = vst [vmem:[#allocation52_spill] sm:$0xff] %v5805_v62  ;;  %v5859_v62 = vpop.eup %3991  ;;  %v5867_v9 = vmul.f32 %v5819_v31, %v5819_v31 }
 0x275   : > { %9059 = vst [vmem:[#allocation53_spill] sm:$0xff] %v5808_v36  ;;  %v5863_v22 = vmul.f32 %v5816_v32, %v5816_v32  ;;  %v5873_v38 = vpop.eup %3993  ;;  %4003 = vrsqrt.f32 %v5853_v4  ;;  %vm1812_vm6 = vweird.f32 %v5859_v62 }
 0x276   : > { %9062 = vst [vmem:[#allocation11_spill] sm:$0xff] %v5816_v32  ;;  %v1651_v32 = vmax.f32 %v1579_v1, 0.0  ;;  %v1806_v1 = vmul.f32 %v5859_v62, %v5773_v51  ;;  %vm1813_vm12 = vmor %vm1811_vm9, %vm1812_vm6  ;;  %vm1842_vm1 = vweird.f32 %v5873_v38 }
 0x277   : > { %9064 = vst [vmem:[#allocation54_spill] sm:$0xff] %v5819_v31  ;;  %v5884_v31 = vmul.f32 %v5839_v37, %v5839_v37 }
 0x278   : > { %9065 = vst [vmem:[#allocation55_spill] sm:$0xff] %v5828_v6  ;;  %v5849_v6 = vmul.f32 %v5808_v36, %v5808_v36  ;;  %v9079_v36 = vld [vmem:[#allocation59_spill] sm:$0xff]  ;;  %v5920_v34 = vadd.f32 0.001, %v1651_v32  ;;  %v1807_v32 = vmul.f32 %v5859_v62, %v1806_v1 }
 0x279   : > { %9066 = vst [vmem:[#allocation125_spill] sm:$0xff] %v5836_v60  ;;  %v5870_v29 = vmul.f32 0.020408163, %v9079_v36  ;;  %v1787_v60 = vmul.f32 %v5798_v47, %v1786_v48  ;;  %v5888_v36 = vmul.f32 %v5842_v39, %v5842_v39 }
 0x27a   : > { %9068 = vst [vmem:[#allocation56_spill] sm:$0xff] %v5839_v37  ;;  %v9089_v37 = vld [vmem:[#allocation23_spill] sm:$0xff]  ;;  %4005 = vrsqrt.f32 %v5920_v34  ;;  %v1808_v19 = vmul.f32 0.5, %v1807_v32  ;;  %vm1891_vm2 = vweird.f32 %v5920_v34 }
 0x27b   : > { %9070 = vst [vmem:[#allocation57_spill] sm:$0xff] %v5842_v39  ;;  %v5905_v39 = vmul.f32 %v5870_v29, %v5870_v29  ;;  %v1788_v14 = vmul.f32 0.5, %v1787_v60 }
 0x27c   : > { %9072 = vst [vmem:[#allocation58_spill] sm:$0xff] %v5845_v13 }
 0x27d   : > { %9073 = vst [vmem:[#allocation126_spill] sm:$0xff] %v5849_v6  ;;  %v5876_v6 = vmul.f32 0.020408163, %v9081_v35  ;;  %v9087_v35 = vld [vmem:[#allocation61_spill] sm:$0xff] }
 0x27e   : > { %9075 = vst [vmem:[#allocation22_spill] sm:$0xff] %v5855_v15  ;;  %v5895_v48 = vmul.f32 0.020408163, %v9087_v35  ;;  %v1836_v35 = vmul.f32 %v5873_v38, %v5779_v0  ;;  %v1441_v15 = vmul.f32 0.020408163, %v9108_v17 }
 0x27f   : > { %9076 = vst [vmem:[#allocation127_spill] sm:$0xff] %v5857_v26  ;;  %v5917_v23 = vmul.f32 %v5876_v6, %v5876_v6 }
 0x280   : > { %9077 = vst [vmem:[#allocation128_spill] sm:$0xff] %v5863_v22  ;;  %v5880_v22 = vpop.eup %3995 }
 0x281   : > { %9078 = vst [vmem:[#allocation129_spill] sm:$0xff] %v5867_v9  ;;  %v5892_v9 = vmul.f32 %v5845_v13, %v5845_v13  ;;  %v5897_v58 = vpop.eup %3997  ;;  %v9091_v13 = vld [vmem:[#allocation62_spill] sm:$0xff]  ;;  %v1796_v18 = vmul.f32 %v5880_v22, %v5789_v42  ;;  %vm1802_vm10 = vweird.f32 %v5880_v22 }
 0x282   : > { %9080 = vst [vmem:[#allocation59_spill] sm:$0xff] %v5870_v29  ;;  %v5913_v21 = vpop.eup %3999  ;;  %v1826_v60 = vmul.f32 %v5897_v58, %v5795_v57  ;;  %vm1832_vm7 = vweird.f32 %v5897_v58  ;;  %vm1803_vm15 = vmor %vm1801_vm13, %vm1802_vm10 }
 0x283   : > { %9082 = vst [vmem:[#allocation60_spill] sm:$0xff] %v5876_v6  ;;  %v5923_v29 = vpop.eup %4001  ;;  %v5936_v6 = vpop.xlane.xlu1 %1231  ;;  %v1856_v43 = vmul.f32 %v5913_v21, %v5813_v33  ;;  %vm1862_vm14 = vweird.f32 %v5913_v21 }
 0x284   : > { %9084 = vst [vmem:[#allocation13_spill] sm:$0xff] %v5884_v31  ;;  %v1438_v31 = vmul.f32 0.020408163, %v9089_v37  ;;  %v1580_v37 = vsub.f32 %v1436_v28, %v5419_v54  ;;  %v9098_v54 = vld [vmem:[#allocation64_spill] sm:$0xff]  ;;  %vm1822_vm4 = vweird.f32 %v5923_v29  ;;  %vm6092_vm6 = vmor %vm1861_vm5, %vm1862_vm14 }
 0x285   : > { %9085 = vst [vmem:[#allocation130_spill] sm:$0xff] %v5888_v36  ;;  %v9093_v36 = vld [vmem:[#allocation14_spill] sm:$0xff]  ;;  %v5939_v28 = vmul.f32 0.020408163, %v9098_v54  ;;  %v5955_v54 = vpop.eup %4003  ;;  %vm6106_vm9 = vmor %vm1821_vm8, %vm1822_vm4  ;;  %vm1851_vm4 = vweird.f32 %v5853_v4 }
 0x286   : > { %9086 = vst [vmem:[#allocation131_spill] sm:$0xff] %v5892_v9  ;;  %v5908_v9 = vmul.f32 0.020408163, %v9091_v13  ;;  %v1434_v40 = vmul.f32 0.020408163, %v9093_v36  ;;  %v5927_v13 = vmul.f32 %v5895_v48, %v5895_v48  ;;  %v1652_v1 = vmax.f32 %v1580_v37, 0.0  ;;  %vm6132_vm5 = vmor %vm1831_vm11, %vm1832_vm7 }
 0x287   : > { %9088 = vst [vmem:[#allocation61_spill] sm:$0xff] %v5895_v48  ;;  %v1582_v48 = vsub.f32 %v1438_v31, %v5441_v53  ;;  %v5960_v53 = vpop.xlane.xlu0 %1237  ;;  %v1789_v31 = vsub.f32 1.5, %v1788_v14  ;;  %v5973_v37 = vmul.f32 %v5939_v28, %v5939_v28  ;;  %vm1852_vm7 = vweird.f32 %v5955_v54 }
 0x288   : > { %9090 = vst [vmem:[#allocation23_spill] sm:$0xff] %v5905_v39  ;;  %v9096_v39 = vld [vmem:[#allocation63_spill] sm:$0xff]  ;;  %v1578_v10 = vsub.f32 %v1434_v40, %v5433_v50  ;;  %v1797_v50 = vmul.f32 %v5880_v22, %v1796_v18  ;;  %v1827_v40 = vmul.f32 %v5897_v58, %v1826_v60  ;;  %v1846_v18 = vmul.f32 %v5955_v54, %v5853_v4  ;;  %vm6220_vm13 = vmor %vm1851_vm4, %vm1852_vm7 }
 0x289   : > { %9092 = vst [vmem:[#allocation62_spill] sm:$0xff] %v5908_v9  ;;  %v5930_v36 = vmul.f32 0.020408163, %v9096_v39  ;;  %v5947_v39 = vmul.f32 %v5908_v9, %v5908_v9  ;;  %v5962_v9 = vpop.xlane.xlu2 %1252  ;;  %v1654_v14 = vmax.f32 %v1582_v48, 0.0  ;;  %v1790_v32 = vmul.f32 %v5798_v47, %v1789_v31  ;;  %v9107_v48 = vld [vmem:[#allocation66_spill] sm:$0xff] }
 0x28a   : > { %9094 = vst [vmem:[#allocation14_spill] sm:$0xff] %v5917_v23  ;;  %v5942_v23 = vadd.f32 0.001, %v1649_v30  ;;  %v1816_v30 = vmul.f32 %v5923_v29, %v5822_v52  ;;  %v5986_v26 = vmul.f32 0.5, %v1827_v40 }
 0x28b   : > { %9095 = vst [vmem:[#allocation132_spill] sm:$0xff] %v5927_v13  ;;  %v1837_v13 = vmul.f32 %v5873_v38, %v1836_v35  ;;  %v5966_v35 = vmul.f32 %v5930_v36, %v5930_v36  ;;  %v5992_v3 = vadd.f32 0.001, %v1654_v14  ;;  %v6006_v31 = vpop.xlane.xlu1 %1240  ;;  %v9110_v14 = vld [vmem:[#allocation68_spill] sm:$0xff] }
 0x28c   : > { %9097 = vst [vmem:[#allocation63_spill] sm:$0xff] %v5930_v36  ;;  %4007 = vrsqrt.f32 %v5942_v23  ;;  %v1857_v36 = vmul.f32 %v5913_v21, %v1856_v43  ;;  %v1817_v60 = vmul.f32 %v5923_v29, %v1816_v30  ;;  %v5990_v43 = vpop.eup %4005  ;;  %v1829_v30 = vsub.f32 1.5, %v5986_v26 }
 0x28d   : > { %9099 = vst [vmem:[#allocation64_spill] sm:$0xff] %v5939_v28  ;;  %vm1892_vm8 = vweird.f32 %v5990_v43  ;;  %vm1871_vm14 = vweird.f32 %v5942_v23 }
 0x28e   : > { %9100 = vst [vmem:[#allocation133_spill] sm:$0xff] %v5947_v39  ;;  %v9104_v39 = vld [vmem:[#allocation19_spill] sm:$0xff]  ;;  %v6010_v46 = vmul.f32 0.5, %v1817_v60  ;;  %vm6169_vm10 = vmor %vm1891_vm2, %vm1892_vm8 }
 0x28f   : > { %9101 = vst [vmem:[#allocation134_spill] sm:$0xff] %v5960_v53  ;;  %v1439_v44 = vmul.f32 0.020408163, %v9104_v39  ;;  %v5976_v53 = vmul.f32 0.5, %v1837_v13  ;;  %v5982_v39 = vadd.f32 0.001, %v1652_v1 }
 0x290   : > { %9102 = vst [vmem:[#allocation135_spill] sm:$0xff] %v5962_v9  ;;  %v9106_v9 = vld [vmem:[#allocation20_spill] sm:$0xff]  ;;  %v6001_v1 = vmul.f32 0.5, %v1857_v36  ;;  %v1886_v36 = vmul.f32 %v5990_v43, %v5920_v34 }
 0x291   : > { %9103 = vst [vmem:[#allocation136_spill] sm:$0xff] %v5966_v35  ;;  %v1650_v35 = vmax.f32 %v1578_v10, 0.0  ;;  %v1437_v28 = vmul.f32 0.020408163, %v9106_v9  ;;  %v1583_v13 = vsub.f32 %v1439_v44, %v9107_v48  ;;  %v2505_v10 = vld [vmem:[%s5997_s3] sm:$0xff]  ;;  %v1809_v9 = vsub.f32 1.5, %v1808_v19 }
 0x292   : > { %9105 = vst [vmem:[#allocation19_spill] sm:$0xff] %v5973_v37  ;;  %v1798_v37 = vmul.f32 0.5, %v1797_v50  ;;  %v1847_v44 = vmul.f32 %v5955_v54, %v1846_v18  ;;  %v6008_v50 = vpop.eup %4007  ;;  %4009 = vrsqrt.f32 %v5982_v39  ;;  %v1794_v19 = vsel %vm1793_vm3, %v5798_v47, %v1790_v32  ;;  %v6026_v47 = vpop.xlane.xlu0 %1246  ;;  %v9114_v32 = vld [vmem:[#allocation25_spill] sm:$0xff] }
 0x293   : > { %v6004_v17 = vadd.f32 0.001, %v1650_v35  ;;  %9109 = vst [vmem:[#allocation20_spill] sm:$0xff] %v6006_v31  ;;  %v1581_v40 = vsub.f32 %v1437_v28, %v5448_v20  ;;  %v1655_v35 = vmax.f32 %v1583_v13, 0.0  ;;  %v1585_v18 = vsub.f32 %v1441_v15, %v9110_v14  ;;  %v6028_v28 = vpop.xlane.xlu2 %1261 }
 0x294   : > { %v6019_v48 = vmul.f32 %v2505_v10, %v1794_v19  ;;  %4011 = vrsqrt.f32 %v5992_v3  ;;  %v1810_v20 = vmul.f32 %v5859_v62, %v1809_v9  ;;  %9112 = vst [vmem:[#allocation35_spill] sm:$0xff] %v6026_v47  ;;  %v1866_v15 = vmul.f32 %v6008_v50, %v5942_v23  ;;  %v2507_v10 = vld [vmem:[%s5997_s3 + $0x10] sm:$0xff] }
 0x295   : > { %9113 = vst [vmem:[#allocation68_spill] sm:$0xff] %v6028_v28  ;;  %v1859_v26 = vsub.f32 1.5, %v6001_v1  ;;  %v6035_v60 = vmul.f32 0.5, %v1847_v44  ;;  %4013 = vrsqrt.f32 %v6004_v17  ;;  %v1442_v13 = vmul.f32 0.020408163, %v9114_v32  ;;  %v2506_v28 = vld [vmem:[%s5997_s3 + $0x8] sm:$0xff] }
 0x296   : > { %9111 = vst [vmem:[#allocation66_spill] sm:$0xff] %v6019_v48  ;;  %2868 = vperm.xlu0 %3986, %v6019_v48   ;;  %v1799_v9 = vsub.f32 1.5, %v1798_v37  ;;  %v1887_v19 = vmul.f32 %v5990_v43, %v1886_v36  ;;  %v6045_v1 = vadd.f32 0.001, %v1655_v35  ;;  %v1653_v44 = vmax.f32 %v1581_v40, 0.0  ;;  %v9115_v40 = vld [vmem:[#allocation26_spill] sm:$0xff] }
 0x297   : > { %v1657_v14 = vmax.f32 %v1585_v18, 0.0  ;;  %v1444_v32 = vmul.f32 0.020408163, %v5503_v8  ;;  %v1814_v51 = vsel %vm1813_vm12, %v5859_v62, %v1810_v20  ;;  %v1819_v36 = vsub.f32 1.5, %v6010_v46  ;;  %v9117_v62 = vld [vmem:[#allocation67_spill] sm:$0xff]  ;;  %v9118_v20 = vld [vmem:[#allocation10_spill] sm:$0xff] }
 0x298   : > { %v6049_v48 = vpop.eup %4009  ;;  %v1800_v37 = vmul.f32 %v5880_v22, %v1799_v9  ;;  %v1440_v35 = vmul.f32 0.020408163, %v9115_v40  ;;  %v6059_v18 = vmul.f32 %v2507_v10, %v1814_v51  ;;  %v1867_v8 = vmul.f32 %v6008_v50, %v1866_v15  ;;  %v6079_v15 = vpop.xlane.xlu1 %1249 }
 0x299   : > { %v1586_v42 = vsub.f32 %v1442_v13, %v9117_v62  ;;  %v1445_v46 = vmul.f32 0.020408163, %v9118_v20  ;;  %v1888_v51 = vmul.f32 0.5, %v1887_v19  ;;  %v6074_v40 = vadd.f32 0.001, %v1657_v14  ;;  %v9122_v62 = vld [vmem:[#allocation69_spill] sm:$0xff] }
 0x29a   : > { %9116 = vst [vmem:[#allocation25_spill] sm:$0xff] %v6059_v18  ;;  %v6063_v47 = vpop.eup %4011  ;;  %v1804_v9 = vsel %vm1803_vm15, %v5880_v22, %v1800_v37  ;;  %2878 = vperm.xlu2 %3988, %v6059_v18   ;;  %vm1841_vm3 = vweird.f32 %v5779_v0  ;;  %4015 = vrsqrt.f32 %v6045_v1  ;;  %v6083_v22 = vadd.f32 0.001, %v1653_v44  ;;  %v2512_v37 = vld [vmem:[%s5997_s3 + $0x38] sm:$0xff] }
 0x29b   : > { %v6070_v31 = vpop.eup %4013  ;;  %v6077_v56 = vmul.f32 %v2506_v28, %v1804_v9  ;;  %v1588_v13 = vsub.f32 %v1444_v32, %v5482_v7  ;;  %v1860_v19 = vmul.f32 %v5913_v21, %v1859_v26  ;;  %v1916_v14 = vmul.f32 %v6063_v47, %v5992_v3  ;;  %v9125_v9 = vld [vmem:[#allocation72_spill] sm:$0xff]  ;;  %v6119_v10 = vpop.xlane.xlu2 %1270  ;;  %vm6183_vm11 = vmor %vm1841_vm3, %vm1842_vm1 }
 0x29c   : > { %v1584_v20 = vsub.f32 %v1440_v35, %v9122_v62  ;;  %v1820_v7 = vmul.f32 %v5923_v29, %v1819_v36  ;;  %v1830_v26 = vmul.f32 %v5897_v58, %v1829_v30  ;;  %v1896_v44 = vmul.f32 %v6049_v48, %v5982_v39  ;;  %v2508_v30 = vld [vmem:[%s5997_s3 + $0x18] sm:$0xff]  ;;  %v6117_v62 = vpop.xlane.xlu0 %1255 }
 0x29d   : > { %9119 = vst [vmem:[#allocation26_spill] sm:$0xff] %v6077_v56  ;;  %2873 = vperm.xlu1 %3987, %v6077_v56   ;;  %v1658_v32 = vmax.f32 %v1586_v42, 0.0  ;;  %v1589_v35 = vsub.f32 %v1445_v46, %v9125_v9  ;;  %v1864_v36 = vsel %vm6092_vm6, %v5913_v21, %v1860_v19  ;;  %v1889_v52 = vsub.f32 1.5, %v1888_v51  ;;  %v2509_v19 = vld [vmem:[%s5997_s3 + $0x20] sm:$0xff] }
 0x29e   : > { %4017 = vrsqrt.f32 %v6074_v40  ;;  %v6123_v18 = vmul.f32 %v2512_v37, %v1864_v36  ;;  %v1824_v42 = vsel %vm6106_vm9, %v5923_v29, %v1820_v7  ;;  %v1876_v46 = vmul.f32 %v6070_v31, %v6004_v17 }
 0x29f   : > { %4019 = vrsqrt.f32 %v6083_v22  ;;  %v1660_v51 = vmax.f32 %v1588_v13, 0.0  ;;  %v1917_v37 = vmul.f32 %v6063_v47, %v1916_v14  ;;  %v1656_v29 = vmax.f32 %v1584_v20, 0.0  ;;  %v9130_v14 = vld [vmem:[#allocation65_spill] sm:$0xff] }
 0x2a0   : > { %9126 = vst [vmem:[#allocation67_spill] sm:$0xff] %v6123_v18  ;;  %2903 = vperm.xlu0 %3986, %v6123_v18   ;;  %v6143_v28 = vmul.f32 %v2508_v30, %v1824_v42  ;;  %v1834_v57 = vsel %vm6132_vm5, %v5897_v58, %v1830_v26  ;;  %v6148_v7 = vpop.eup %4015  ;;  %v1897_v33 = vmul.f32 %v6049_v48, %v1896_v44  ;;  %v6151_v9 = vadd.f32 0.001, %v1658_v32 }
 0x2a1   : > { %v1661_v13 = vmax.f32 %v1589_v35, 0.0  ;;  %v1447_v36 = vmul.f32 0.020408163, %v5636_v16  ;;  %v1443_v20 = vmul.f32 0.020408163, %v9130_v14  ;;  %v6156_v30 = vmul.f32 %v2509_v19, %v1834_v57 }
 0x2a2   : > { %9129 = vst [vmem:[#allocation10_spill] sm:$0xff] %v6143_v28  ;;  %2883 = vperm.xlu2 %3988, %v6143_v28   ;;  %v1890_v42 = vmul.f32 %v5990_v43, %v1889_v52  ;;  %v9132_v58 = vsub.f32 1.5, %v5976_v53  ;;  %v6162_v21 = vmul.f32 0.5, %v1867_v8  ;;  %v1877_v44 = vmul.f32 %v6070_v31, %v1876_v46  ;;  %v2515_v53 = vld [vmem:[%s5997_s3 + $0x50] sm:$0xff]  ;;  %v6190_v46 = vpop.xlane.xlu1 %1258 }
 0x2a3   : > { %9131 = vst [vmem:[#allocation69_spill] sm:$0xff] %v6156_v30  ;;  %v6174_v32 = vadd.f32 0.001, %v1660_v51  ;;  %v1918_v34 = vmul.f32 0.5, %v1917_v37  ;;  %v6187_v52 = vadd.f32 0.001, %v1656_v29  ;;  %v1926_v14 = vmul.f32 %v6148_v7, %v6045_v1 }
 0x2a4   : > { %v1840_v26 = vmul.f32 %v5873_v38, %v9132_v58  ;;  %v6177_v35 = vpop.eup %4017  ;;  %v1894_v51 = vsel %vm6169_vm10, %v5990_v43, %v1890_v42  ;;  %v9137_v19 = vsub.f32 1.5, %v6035_v60  ;;  %4021 = vrsqrt.f32 %v6151_v9  ;;  %v2510_v58 = vld [vmem:[%s5997_s3 + $0x28] sm:$0xff]  ;;  %v9138_v60 = vld [vmem:[#allocation73_spill] sm:$0xff] }
 0x2a5   : > { %2888 = vperm.xlu1 %3987, %v6156_v30   ;;  %v6198_v0 = vpop.eup %4019  ;;  %v1591_v37 = vsub.f32 %v1447_v36, %v5511_v12  ;;  %v6208_v16 = vmul.f32 0.5, %v1897_v33  ;;  %v6210_v43 = vadd.f32 0.001, %v1661_v13  ;;  %v1587_v42 = vsub.f32 %v1443_v20, %v9138_v60  ;;  %v9142_v13 = vld [vmem:[#allocation71_spill] sm:$0xff]  ;;  %v6228_v20 = vpop.xlane.xlu0 %1264  ;;  %v2511_v8 = vld [vmem:[%s5997_s3 + $0x30] sm:$0xff] }
 0x2a6   : > { %v1850_v57 = vmul.f32 %v5955_v54, %v9137_v19  ;;  %v1844_v29 = vsel %vm6183_vm11, %v5873_v38, %v1840_v26  ;;  %v6213_v19 = vmul.f32 %v2515_v53, %v1894_v51  ;;  %vm1872_vm12 = vweird.f32 %v6008_v50  ;;  %v6230_v26 = vpop.xlane.xlu2 %1279  ;;  %v2523_v30 = vld [vmem:[%s5997_s3 + $0x90] sm:$0xff] }
 0x2a7   : > { %v1878_v38 = vmul.f32 0.5, %v1877_v44  ;;  %v1946_v33 = vmul.f32 %v6177_v35, %v6074_v40  ;;  %4023 = vrsqrt.f32 %v6174_v32  ;;  %v1448_v36 = vmul.f32 0.020408163, %v9142_v13  ;;  %vm1873_vm8 = vmor %vm1871_vm14, %vm1872_vm12 }
 0x2a8   : > { %9139 = vst [vmem:[#allocation72_spill] sm:$0xff] %v6213_v19  ;;  %v1919_v53 = vsub.f32 1.5, %v1918_v34  ;;  %4025 = vrsqrt.f32 %v6187_v52  ;;  %2918 = vperm.xlu0 %3986, %v6213_v19   ;;  %v6234_v4 = vmul.f32 %v2510_v58, %v1844_v29  ;;  %v1854_v44 = vsel %vm6220_vm13, %v5955_v54, %v1850_v57 }
 0x2a9   : > { %v1869_v51 = vsub.f32 1.5, %v6162_v21  ;;  %v1927_v60 = vmul.f32 %v6148_v7, %v1926_v14  ;;  %v1906_v34 = vmul.f32 %v6198_v0, %v6083_v22  ;;  %v1663_v13 = vmax.f32 %v1591_v37, 0.0 }
 0x2aa   : > { %9143 = vst [vmem:[#allocation65_spill] sm:$0xff] %v6234_v4  ;;  %vm1881_vm15 = vweird.f32 %v6004_v17  ;;  %vm1882_vm1 = vweird.f32 %v6070_v31  ;;  %vm1922_vm2 = vweird.f32 %v6063_v47  ;;  %4027 = vrsqrt.f32 %v6210_v43  ;;  %2893 = vperm.xlu2 %3988, %v6234_v4   ;;  %v6250_v21 = vpop.eup %4021 }
 0x2ab   : > { %v1659_v54 = vmax.f32 %v1587_v42, 0.0  ;;  %vm1921_vm3 = vweird.f32 %v5992_v3  ;;  %v1947_v57 = vmul.f32 %v6177_v35, %v1946_v33  ;;  %v1592_v14 = vsub.f32 %v1448_v36, %v5507_v49  ;;  %vm6324_vm7 = vmor %vm1881_vm15, %vm1882_vm1 }
 0x2ac   : > { %v6255_v37 = vmul.f32 %v2511_v8, %v1854_v44  ;;  %v1879_v58 = vsub.f32 1.5, %v1878_v38  ;;  %v1446_v12 = vmul.f32 0.020408163, %v5546_v27  ;;  %v1920_v42 = vmul.f32 %v6063_v47, %v1919_v53  ;;  %vm6266_vm6 = vmor %vm1921_vm3, %vm1922_vm2  ;;  %v2518_v27 = vld [vmem:[%s5997_s3 + $0x68] sm:$0xff] }
 0x2ad   : > { %v6260_v19 = vpop.eup %4023  ;;  %v6262_v4 = vmul.f32 0.5, %v1927_v60  ;;  %v1907_v49 = vmul.f32 %v6198_v0, %v1906_v34  ;;  %v6271_v33 = vadd.f32 0.001, %v1663_v13  ;;  %v1450_v38 = vmul.f32 0.020408163, %v5737_v24  ;;  %v6283_v60 = vpop.xlane.xlu1 %1267 }
 0x2ae   : > { %9144 = vst [vmem:[#allocation73_spill] sm:$0xff] %v6255_v37  ;;  %2898 = vperm.xlu1 %3987, %v6255_v37   ;;  %v6276_v36 = vpop.eup %4025  ;;  %v1956_v53 = vmul.f32 %v6250_v21, %v6151_v9  ;;  %v6280_v44 = vadd.f32 0.001, %v1659_v54  ;;  %v1451_v8 = vmul.f32 0.020408163, %v5585_v11  ;;  %v1924_v34 = vsel %vm6266_vm6, %v6063_v47, %v1920_v42  ;;  %v2513_v42 = vld [vmem:[%s5997_s3 + $0x40] sm:$0xff]  ;;  %v6306_v3 = vpop.xlane.xlu0 %1273 }
 0x2af   : > { %vm1902_vm9 = vweird.f32 %v6049_v48  ;;  %v1948_v24 = vmul.f32 0.5, %v1947_v57  ;;  %vm1951_vm4 = vweird.f32 %v6074_v40  ;;  %v1664_v13 = vmax.f32 %v1592_v14, 0.0 }
 0x2b0   : > { %v1870_v29 = vmul.f32 %v6008_v50, %v1869_v51  ;;  %v6291_v37 = vpop.eup %4027  ;;  %v1976_v11 = vmul.f32 %v6260_v19, %v6174_v32  ;;  %v1590_v54 = vsub.f32 %v1446_v12, %v5520_v59  ;;  %v6296_v28 = vmul.f32 %v2518_v27, %v1924_v34  ;;  %v6308_v59 = vpop.xlane.xlu2 %1288  ;;  %v9148_v27 = vld [vmem:[#allocation37_spill] sm:$0xff] }
 0x2b1   : > { %v1880_v47 = vmul.f32 %v6070_v31, %v1879_v58  ;;  %vm1901_vm5 = vweird.f32 %v5982_v39  ;;  %v1936_v14 = vmul.f32 %v6276_v36, %v6187_v52  ;;  %4029 = vrsqrt.f32 %v6271_v33  ;;  %v9159_v39 = vld [vmem:[#allocation82_spill] sm:$0xff] }
 0x2b2   : > { %9147 = vst [vmem:[#allocation71_spill] sm:$0xff] %v6296_v28  ;;  %v1594_v51 = vsub.f32 %v1450_v38, %v5534_v63  ;;  %v6314_v58 = vmul.f32 0.5, %v1907_v49  ;;  %v1957_v12 = vmul.f32 %v6250_v21, %v1956_v53  ;;  %4031 = vrsqrt.f32 %v6280_v44  ;;  %2933 = vperm.xlu0 %3986, %v6296_v28   ;;  %v2521_v63 = vld [vmem:[%s5997_s3 + $0x80] sm:$0xff]  ;;  %vm6391_vm1 = vmor %vm1901_vm5, %vm1902_vm9 }
 0x2b3   : > { %v1595_v34 = vsub.f32 %v1451_v8, %v9148_v27  ;;  %vm1912_vm10 = vweird.f32 %v6198_v0  ;;  %v1949_v23 = vsub.f32 1.5, %v1948_v24  ;;  %v1986_v49 = vmul.f32 %v6291_v37, %v6210_v43  ;;  %v2514_v8 = vld [vmem:[%s5997_s3 + $0x48] sm:$0xff] }
 0x2b4   : > { %v6331_v38 = vadd.f32 0.001, %v1664_v13  ;;  %v1874_v53 = vsel %vm1873_vm8, %v6008_v50, %v1870_v29  ;;  %v1977_v27 = vmul.f32 %v6260_v19, %v1976_v11  ;;  %v1662_v57 = vmax.f32 %v1590_v54, 0.0 }
 0x2b5   : > { %v6336_v28 = vmul.f32 %v2513_v42, %v1874_v53  ;;  %v1884_v17 = vsel %vm6324_vm7, %v6070_v31, %v1880_v47  ;;  %vm1911_vm11 = vweird.f32 %v6083_v22  ;;  %vm1952_vm12 = vweird.f32 %v6177_v35 }
 0x2b6   : > { %v1937_v24 = vmul.f32 %v6276_v36, %v1936_v14  ;;  %v1666_v13 = vmax.f32 %v1594_v51, 0.0  ;;  %v1449_v18 = vmul.f32 0.020408163, %v5676_v45  ;;  %v1909_v50 = vsub.f32 1.5, %v6314_v58  ;;  %vm6366_vm14 = vmor %vm1951_vm4, %vm1952_vm12 }
 0x2b7   : > { %9151 = vst [vmem:[#allocation37_spill] sm:$0xff] %v6336_v28  ;;  %v1667_v29 = vmax.f32 %v1595_v34, 0.0  ;;  %v1454_v11 = vmul.f32 0.020408163, %v5687_v2  ;;  %2908 = vperm.xlu2 %3988, %v6336_v28   ;;  %v6348_v54 = vmul.f32 %v2514_v8, %v1884_v17  ;;  %v6350_v31 = vpop.eup %4029  ;;  %v6352_v47 = vmul.f32 0.5, %v1957_v12  ;;  %v6375_v34 = vpop.xlane.xlu1 %1276  ;;  %vm1913_vm9 = vmor %vm1911_vm11, %vm1912_vm10 }
 0x2b8   : > { %v1453_v42 = vmul.f32 0.020408163, %v5824_v5  ;;  %v1950_v14 = vmul.f32 %v6177_v35, %v1949_v23  ;;  %v9153_v45 = vsub.f32 1.5, %v6208_v16  ;;  %v6359_v58 = vpop.eup %4031  ;;  %vm1932_vm13 = vweird.f32 %v6148_v7  ;;  %v6413_v2 = vpop.xlane.xlu2 %1297 }
 0x2b9   : > { %9152 = vst [vmem:[#allocation137_spill] sm:$0xff] %v6348_v54  ;;  %v1987_v5 = vmul.f32 %v6291_v37, %v1986_v49  ;;  %v1978_v12 = vmul.f32 0.5, %v1977_v27  ;;  %4033 = vrsqrt.f32 %v6331_v38  ;;  %v6372_v16 = vadd.f32 0.001, %v1662_v57  ;;  %2913 = vperm.xlu1 %3987, %v6348_v54  }
 0x2ba   : > { %v1900_v51 = vmul.f32 %v6049_v48, %v9153_v45  ;;  %v6378_v23 = vmul.f32 0.5, %v1937_v24  ;;  %vm1981_vm15 = vweird.f32 %v6174_v32  ;;  %v6381_v40 = vadd.f32 0.001, %v1666_v13  ;;  %v6411_v45 = vpop.xlane.xlu0 %1282  ;;  %v2520_v32 = vld [vmem:[%s5997_s3 + $0x78] sm:$0xff] }
 0x2bb   : > { %v1593_v53 = vsub.f32 %v1449_v18, %v5538_v55  ;;  %v1954_v49 = vsel %vm6366_vm14, %v6177_v35, %v1950_v14  ;;  %vm1931_vm2 = vweird.f32 %v6045_v1  ;;  %vm1982_vm3 = vweird.f32 %v6260_v19  ;;  %v9158_v18 = vld [vmem:[#allocation81_spill] sm:$0xff]  ;;  %v2516_v35 = vld [vmem:[%s5997_s3 + $0x58] sm:$0xff] }
 0x2bc   : > { %v2006_v8 = vmul.f32 %v6350_v31, %v6271_v33  ;;  %v6399_v55 = vadd.f32 0.001, %v1667_v29  ;;  %v1598_v27 = vsub.f32 %v1454_v11, %v9158_v18  ;;  %v1966_v17 = vmul.f32 %v6359_v58, %v6280_v44  ;;  %vm6459_vm8 = vmor %vm1981_vm15, %vm1982_vm3 }
 0x2bd   : > { %v1597_v24 = vsub.f32 %v1453_v42, %v9159_v39  ;;  %v6406_v13 = vmul.f32 %v2521_v63, %v1954_v49  ;;  %v1904_v14 = vsel %vm6391_vm1, %v6049_v48, %v1900_v51  ;;  %v6415_v29 = vmul.f32 0.5, %v1987_v5  ;;  %v2517_v51 = vld [vmem:[%s5997_s3 + $0x60] sm:$0xff]  ;;  %vm6478_vm7 = vmor %vm1931_vm2, %vm1932_vm13 }
 0x2be   : > { %v1979_v11 = vsub.f32 1.5, %v1978_v12  ;;  %4035 = vrsqrt.f32 %v6372_v16  ;;  %v1452_v18 = vmul.f32 0.020408163, %v5758_v25  ;;  %vm1942_vm6 = vweird.f32 %v6276_v36 }
 0x2bf   : > { %9160 = vst [vmem:[#allocation81_spill] sm:$0xff] %v6406_v13  ;;  %4037 = vrsqrt.f32 %v6381_v40  ;;  %v1665_v42 = vmax.f32 %v1593_v53, 0.0  ;;  %2948 = vperm.xlu0 %3986, %v6406_v13   ;;  %v6422_v63 = vmul.f32 %v2516_v35, %v1904_v14  ;;  %v1910_v48 = vmul.f32 %v6198_v0, %v1909_v50  ;;  %v6426_v49 = vpop.eup %4033  ;;  %v2524_v14 = vld [vmem:[%s5997_s3 + $0x98] sm:$0xff] }
 0x2c0   : > { %v2007_v25 = vmul.f32 %v6350_v31, %v2006_v8  ;;  %4039 = vrsqrt.f32 %v6399_v55  ;;  %v1670_v5 = vmax.f32 %v1598_v27, 0.0  ;;  %v1457_v12 = vmul.f32 0.020408163, %v5760_v41  ;;  %v9170_v41 = vld [vmem:[#allocation22_spill] sm:$0xff] }
 0x2c1   : > { %9161 = vst [vmem:[#allocation82_spill] sm:$0xff] %v6422_v63  ;;  %vm1941_vm4 = vweird.f32 %v6187_v52  ;;  %v1967_v50 = vmul.f32 %v6359_v58, %v1966_v17  ;;  %v1669_v53 = vmax.f32 %v1597_v24, 0.0  ;;  %v1456_v57 = vmul.f32 0.020408163, %v5936_v6  ;;  %2923 = vperm.xlu2 %3988, %v6422_v63  }
 0x2c2   : > { %v1914_v22 = vsel %vm1913_vm9, %v6198_v0, %v1910_v48  ;;  %v1939_v8 = vsub.f32 1.5, %v6378_v23  ;;  %v1596_v27 = vsub.f32 %v1452_v18, %v5558_v61  ;;  %v2016_v17 = vmul.f32 %v6426_v49, %v6331_v38  ;;  %v9165_v18 = vld [vmem:[#allocation84_spill] sm:$0xff]  ;;  %vm1943_vm13 = vmor %vm1941_vm4, %vm1942_vm6 }
 0x2c3   : > { %v6443_v39 = vmul.f32 %v2517_v51, %v1914_v22  ;;  %v6448_v24 = vadd.f32 0.001, %v1665_v42  ;;  %v1980_v6 = vmul.f32 %v6260_v19, %v1979_v11  ;;  %vm1962_vm5 = vweird.f32 %v6250_v21  ;;  %v6467_v11 = vpop.xlane.xlu1 %1285 }
 0x2c4   : > { %v6452_v63 = vpop.eup %4035  ;;  %v2008_v0 = vmul.f32 0.5, %v2007_v25  ;;  %v6463_v23 = vadd.f32 0.001, %v1670_v5  ;;  %v1601_v42 = vsub.f32 %v1457_v12, %v9165_v18  ;;  %v9166_v48 = vsub.f32 1.5, %v6262_v4  ;;  %v9169_v12 = vld [vmem:[#allocation38_spill] sm:$0xff] }
 0x2c5   : > { %9162 = vst [vmem:[#allocation138_spill] sm:$0xff] %v6443_v39  ;;  %2928 = vperm.xlu1 %3987, %v6443_v39   ;;  %v6472_v22 = vpop.eup %4037  ;;  %v6482_v25 = vmul.f32 0.5, %v1967_v50  ;;  %vm2011_vm10 = vweird.f32 %v6271_v33  ;;  %v6485_v5 = vadd.f32 0.001, %v1669_v53  ;;  %v1600_v4 = vsub.f32 %v1456_v57, %v9169_v12  ;;  %v2519_v53 = vld [vmem:[%s5997_s3 + $0x70] sm:$0xff]  ;;  %v9192_v33 = vld [vmem:[#allocation92_spill] sm:$0xff] }
 0x2c6   : > { %v1930_v51 = vmul.f32 %v6148_v7, %v9166_v48  ;;  %v1984_v18 = vsel %vm6459_vm8, %v6260_v19, %v1980_v6  ;;  %v6491_v48 = vpop.eup %4039  ;;  %vm1961_vm11 = vweird.f32 %v6151_v9  ;;  %v1668_v1 = vmax.f32 %v1596_v27, 0.0  ;;  %v6506_v27 = vpop.xlane.xlu0 %1291 }
 0x2c7   : > { %v1455_v35 = vmul.f32 0.020408163, %v9170_v41  ;;  %v6495_v39 = vmul.f32 %v2524_v14, %v1984_v18  ;;  %v2017_v57 = vmul.f32 %v6426_v49, %v2016_v17  ;;  %v1996_v19 = vmul.f32 %v6452_v63, %v6372_v16  ;;  %v6508_v41 = vpop.xlane.xlu2 %1306  ;;  %v9175_v18 = vld [vmem:[#allocation127_spill] sm:$0xff]  ;;  %vm6574_vm2 = vmor %vm1961_vm11, %vm1962_vm5 }
 0x2c8   : > { %v1934_v50 = vsel %vm6478_vm7, %v6148_v7, %v1930_v51  ;;  %4041 = vrsqrt.f32 %v6448_v24  ;;  %v1940_v6 = vmul.f32 %v6276_v36, %v1939_v8  ;;  %9172 = vst [vmem:[#allocation38_spill] sm:$0xff] %v6508_v41  ;;  %v2009_v14 = vsub.f32 1.5, %v2008_v0  ;;  %v2525_v41 = vld [vmem:[%s5997_s3 + $0xa0] sm:$0xff] }
 0x2c9   : > { %9171 = vst [vmem:[#allocation84_spill] sm:$0xff] %v6495_v39  ;;  %v2036_v61 = vmul.f32 %v6472_v22, %v6381_v40  ;;  %4043 = vrsqrt.f32 %v6463_v23  ;;  %v1673_v7 = vmax.f32 %v1601_v42, 0.0  ;;  %2963 = vperm.xlu0 %3986, %v6495_v39   ;;  %vm1971_vm12 = vweird.f32 %v6280_v44  ;;  %v9174_v42 = vld [vmem:[#allocation86_spill] sm:$0xff] }
 0x2ca   : > { %v2046_v17 = vmul.f32 %v6491_v48, %v6399_v55  ;;  %4045 = vrsqrt.f32 %v6485_v5  ;;  %v1672_v8 = vmax.f32 %v1600_v4, 0.0  ;;  %v6518_v51 = vmul.f32 %v2519_v53, %v1934_v50  ;;  %v9176_v4 = vld [vmem:[#allocation20_spill] sm:$0xff] }
 0x2cb   : > { %vm1972_vm14 = vweird.f32 %v6359_v58  ;;  %v6526_v0 = vadd.f32 0.001, %v1668_v1  ;;  %v1599_v12 = vsub.f32 %v1455_v35, %v9174_v42  ;;  %v1460_v39 = vmul.f32 0.020408163, %v9175_v18 }
 0x2cc   : > { %9173 = vst [vmem:[#allocation22_spill] sm:$0xff] %v6518_v51  ;;  %v1969_v13 = vsub.f32 1.5, %v6482_v25  ;;  %vm2012_vm15 = vweird.f32 %v6350_v31  ;;  %v1459_v50 = vmul.f32 0.020408163, %v9176_v4  ;;  %2938 = vperm.xlu2 %3988, %v6518_v51   ;;  %v1944_v52 = vsel %vm1943_vm13, %v6276_v36, %v1940_v6  ;;  %v2527_v36 = vld [vmem:[%s5997_s3 + $0xb0] sm:$0xff]  ;;  %vm6608_vm9 = vmor %vm1971_vm12, %vm1972_vm14 }
 0x2cd   : > { %v6535_v53 = vmul.f32 0.5, %v2017_v57  ;;  %v2037_v1 = vmul.f32 %v6472_v22, %v2036_v61  ;;  %v6538_v54 = vadd.f32 0.001, %v1673_v7  ;;  %v6540_v35 = vmul.f32 %v2520_v32, %v1944_v52  ;;  %vm6556_vm1 = vmor %vm2011_vm10, %vm2012_vm15  ;;  %v9180_v61 = vld [vmem:[#allocation88_spill] sm:$0xff]  ;;  %v9185_v52 = vld [vmem:[#allocation134_spill] sm:$0xff] }
 0x2ce   : > { %v6542_v42 = vpop.eup %4041  ;;  %v1997_v25 = vmul.f32 %v6452_v63, %v1996_v19  ;;  %v2047_v18 = vmul.f32 %v6491_v48, %v2046_v17  ;;  %v6546_v28 = vadd.f32 0.001, %v1672_v8  ;;  %v2010_v4 = vmul.f32 %v6350_v31, %v2009_v14  ;;  %v6563_v17 = vpop.xlane.xlu1 %1294 }
 0x2cf   : > { %9177 = vst [vmem:[#allocation86_spill] sm:$0xff] %v6540_v35  ;;  %v6550_v57 = vpop.eup %4043  ;;  %4047 = vrsqrt.f32 %v6526_v0  ;;  %v1671_v19 = vmax.f32 %v1599_v12, 0.0  ;;  %v1604_v7 = vsub.f32 %v1460_v39, %v9180_v61  ;;  %2943 = vperm.xlu1 %3987, %v6540_v35   ;;  %v9181_v14 = vsub.f32 1.5, %v6352_v47  ;;  %v9184_v12 = vld [vmem:[#allocation89_spill] sm:$0xff]  ;;  %v2522_v35 = vld [vmem:[%s5997_s3 + $0x88] sm:$0xff] }
 0x2d0   : > { %v6568_v32 = vpop.eup %4045  ;;  %v1603_v39 = vsub.f32 %v1459_v50, %v9184_v12  ;;  %v1458_v61 = vmul.f32 0.020408163, %v9185_v52  ;;  %v2014_v47 = vsel %vm6556_vm1, %v6350_v31, %v2010_v4  ;;  %vm1992_vm3 = vweird.f32 %v6291_v37 }
 0x2d1   : > { %v1960_v8 = vmul.f32 %v6250_v21, %v9181_v14  ;;  %v1970_v14 = vmul.f32 %v6359_v58, %v1969_v13  ;;  %v2038_v51 = vmul.f32 0.5, %v2037_v1  ;;  %4049 = vrsqrt.f32 %v6538_v54  ;;  %v6599_v13 = vpop.xlane.xlu0 %1300  ;;  %v6601_v1 = vpop.xlane.xlu2 %1315 }
 0x2d2   : > { %v6587_v9 = vmul.f32 %v2527_v36, %v2014_v47  ;;  %v6592_v12 = vmul.f32 0.5, %v1997_v25  ;;  %v6594_v52 = vmul.f32 0.5, %v2047_v18  ;;  %v2026_v31 = vmul.f32 %v6542_v42, %v6448_v24  ;;  %9187 = vst [vmem:[#allocation20_spill] sm:$0xff] %v6599_v13 }
 0x2d3   : > { %v1964_v50 = vsel %vm6574_vm2, %v6250_v21, %v1960_v8  ;;  %4051 = vrsqrt.f32 %v6546_v28  ;;  %9188 = vst [vmem:[#allocation88_spill] sm:$0xff] %v6601_v1  ;;  %vm1991_vm6 = vweird.f32 %v6210_v43  ;;  %v2076_v25 = vmul.f32 %v6550_v57, %v6463_v23  ;;  %v9199_v1 = vld [vmem:[#allocation99_spill] sm:$0xff] }
 0x2d4   : > { %9186 = vst [vmem:[#allocation127_spill] sm:$0xff] %v6587_v9  ;;  %v2066_v18 = vmul.f32 %v6568_v32, %v6485_v5  ;;  %v1676_v4 = vmax.f32 %v1604_v7, 0.0  ;;  %2978 = vperm.xlu0 %3986, %v6587_v9   ;;  %v6617_v36 = vmul.f32 %v2522_v35, %v1964_v50  ;;  %v6619_v6 = vadd.f32 0.001, %v1671_v19  ;;  %vm6690_vm13 = vmor %vm1991_vm6, %vm1992_vm3 }
 0x2d5   : > { %v1675_v8 = vmax.f32 %v1603_v39, 0.0  ;;  %v1602_v44 = vsub.f32 %v1458_v61, %v9192_v33  ;;  %v1974_v47 = vsel %vm6608_vm9, %v6359_v58, %v1970_v14  ;;  %v6626_v56 = vpop.eup %4047  ;;  %vm2002_vm4 = vweird.f32 %v6452_v63 }
 0x2d6   : > { %9191 = vst [vmem:[#allocation89_spill] sm:$0xff] %v6617_v36  ;;  %v2039_v7 = vsub.f32 1.5, %v2038_v51  ;;  %vm2041_vm5 = vweird.f32 %v6381_v40  ;;  %2953 = vperm.xlu2 %3988, %v6617_v36   ;;  %v1999_v35 = vsub.f32 1.5, %v6592_v12  ;;  %vm2001_vm8 = vweird.f32 %v6372_v16 }
 0x2d7   : > { %vm2042_vm7 = vweird.f32 %v6472_v22  ;;  %v2027_v58 = vmul.f32 %v6542_v42, %v2026_v31  ;;  %v1462_v19 = vmul.f32 0.020408163, %v6079_v15  ;;  %v6637_v39 = vpop.eup %4049  ;;  %v2077_v51 = vmul.f32 %v6550_v57, %v2076_v25  ;;  %v9194_v25 = vld [vmem:[#allocation135_spill] sm:$0xff]  ;;  %vm6722_vm2 = vmor %vm2001_vm8, %vm2002_vm4 }
 0x2d8   : > { %v6641_v14 = vadd.f32 0.001, %v1676_v4  ;;  %v6643_v50 = vmul.f32 %v2523_v30, %v1974_v47  ;;  %v2067_v12 = vmul.f32 %v6568_v32, %v2066_v18  ;;  %4053 = vrsqrt.f32 %v6619_v6  ;;  %v6656_v30 = vpop.xlane.xlu1 %1303  ;;  %vm6666_vm11 = vmor %vm2041_vm5, %vm2042_vm7 }
 0x2d9   : > { %v6645_v21 = vpop.eup %4051  ;;  %v6649_v31 = vadd.f32 0.001, %v1675_v8  ;;  %v1674_v15 = vmax.f32 %v1602_v44, 0.0  ;;  %vm2022_vm10 = vweird.f32 %v6426_v49  ;;  %v2056_v33 = vmul.f32 %v6626_v56, %v6526_v0  ;;  %9195 = vst [vmem:[#allocation92_spill] sm:$0xff] %v6656_v30 }
 0x2da   : > { %9193 = vst [vmem:[#allocation134_spill] sm:$0xff] %v6643_v50  ;;  %v1463_v4 = vmul.f32 0.020408163, %v9194_v25  ;;  %2958 = vperm.xlu1 %3987, %v6643_v50   ;;  %v2040_v47 = vmul.f32 %v6472_v22, %v2039_v7  ;;  %v9196_v18 = vsub.f32 1.5, %v6415_v29  ;;  %v6670_v44 = vmul.f32 0.5, %v2027_v58  ;;  %v9200_v7 = vld [vmem:[#allocation35_spill] sm:$0xff] }
 0x2db   : > { %v2106_v25 = vmul.f32 %v6637_v39, %v6538_v54  ;;  %v1606_v50 = vsub.f32 %v1462_v19, %v9199_v1  ;;  %v1461_v36 = vmul.f32 0.020408163, %v9200_v7  ;;  %v2530_v29 = vld [vmem:[%s5997_s3 + $0xc8] sm:$0xff]  ;;  %vm2021_vm12 = vweird.f32 %v6331_v38  ;;  %v9225_v38 = vld [vmem:[#allocation107_spill] sm:$0xff] }
 0x2dc   : > { %v1990_v61 = vmul.f32 %v6291_v37, %v9196_v18  ;;  %v6678_v18 = vmul.f32 0.5, %v2077_v51  ;;  %v2096_v40 = vmul.f32 %v6645_v21, %v6546_v28  ;;  %4055 = vrsqrt.f32 %v6641_v14  ;;  %v9205_v7 = vld [vmem:[#allocation96_spill] sm:$0xff]  ;;  %vm6765_vm6 = vmor %vm2021_vm12, %vm2022_vm10 }
 0x2dd   : > { %v2044_v58 = vsel %vm6666_vm11, %v6472_v22, %v2040_v47  ;;  %vm2032_vm14 = vweird.f32 %v6542_v42  ;;  %v2068_v19 = vmul.f32 0.5, %v2067_v12  ;;  %vm2071_vm15 = vweird.f32 %v6485_v5  ;;  %v6700_v22 = vpop.xlane.xlu0 %1309  ;;  %v6702_v47 = vpop.xlane.xlu2 %1324 }
 0x2de   : > { %4057 = vrsqrt.f32 %v6649_v31  ;;  %v6697_v51 = vadd.f32 0.001, %v1674_v15  ;;  %v2000_v8 = vmul.f32 %v6452_v63, %v1999_v35  ;;  %9203 = vst [vmem:[#allocation135_spill] sm:$0xff] %v6700_v22  ;;  %v2057_v43 = vmul.f32 %v6626_v56, %v2056_v33  ;;  %v6712_v15 = vpop.eup %4053  ;;  %v9207_v33 = vld [vmem:[#allocation102_spill] sm:$0xff] }
 0x2df   : > { %9204 = vst [vmem:[#allocation99_spill] sm:$0xff] %v6702_v47  ;;  %v1607_v9 = vsub.f32 %v1463_v4, %v9205_v7  ;;  %v6706_v13 = vmul.f32 %v2530_v29, %v2044_v58  ;;  %v1994_v12 = vsel %vm6690_vm13, %v6291_v37, %v1990_v61  ;;  %v2029_v35 = vsub.f32 1.5, %v6670_v44  ;;  %v9210_v61 = vld [vmem:[#allocation68_spill] sm:$0xff] }
 0x2e0   : > { %vm2031_vm1 = vweird.f32 %v6448_v24  ;;  %v2107_v47 = vmul.f32 %v6637_v39, %v2106_v25  ;;  %v1678_v22 = vmax.f32 %v1606_v50, 0.0  ;;  %v1605_v30 = vsub.f32 %v1461_v36, %v9207_v33  ;;  %v2526_v50 = vld [vmem:[%s5997_s3 + $0xa8] sm:$0xff] }
 0x2e1   : > { %9206 = vst [vmem:[#allocation35_spill] sm:$0xff] %v6706_v13  ;;  %vm2072_vm3 = vweird.f32 %v6568_v32  ;;  %v2097_v37 = vmul.f32 %v6645_v21, %v2096_v40  ;;  %v1466_v44 = vmul.f32 0.020408163, %v9210_v61  ;;  %v1465_v29 = vmul.f32 0.020408163, %v6190_v46  ;;  %2993 = vperm.xlu0 %3986, %v6706_v13   ;;  %v9214_v61 = vld [vmem:[#allocation41_spill] sm:$0xff]  ;;  %v6759_v13 = vpop.xlane.xlu1 %1312  ;;  %vm6817_vm11 = vmor %vm2031_vm1, %vm2032_vm14 }
 0x2e2   : > { %v2069_v36 = vsub.f32 1.5, %v2068_v19  ;;  %4059 = vrsqrt.f32 %v6697_v51  ;;  %v6733_v25 = vmul.f32 %v2525_v41, %v1994_v12  ;;  %v2004_v16 = vsel %vm6722_vm2, %v6452_v63, %v2000_v8  ;;  %v6738_v58 = vpop.eup %4055  ;;  %vm6783_vm5 = vmor %vm2071_vm15, %vm2072_vm3 }
 0x2e3   : > { %v6741_v1 = vmul.f32 0.5, %v2057_v43  ;;  %v2086_v46 = vmul.f32 %v6712_v15, %v6619_v6  ;;  %v1679_v7 = vmax.f32 %v1607_v9, 0.0  ;;  %v6747_v19 = vmul.f32 0.5, %v2107_v47  ;;  %v9213_v43 = vld [vmem:[#allocation103_spill] sm:$0xff] }
 0x2e4   : > { %9211 = vst [vmem:[#allocation96_spill] sm:$0xff] %v6733_v25  ;;  %v6745_v33 = vpop.eup %4057  ;;  %v6749_v41 = vadd.f32 0.001, %v1678_v22  ;;  %v1677_v12 = vmax.f32 %v1605_v30, 0.0  ;;  %2968 = vperm.xlu2 %3988, %v6733_v25   ;;  %v6752_v63 = vmul.f32 %v2526_v50, %v2004_v16  ;;  %v6754_v8 = vmul.f32 0.5, %v2097_v37 }
 0x2e5   : > { %v1610_v4 = vsub.f32 %v1466_v44, %v9213_v43  ;;  %v1609_v40 = vsub.f32 %v1465_v29, %v9214_v61  ;;  %v1464_v9 = vmul.f32 0.020408163, %v6117_v62  ;;  %vm2102_vm9 = vweird.f32 %v6645_v21  ;;  %v2533_v62 = vld [vmem:[%s5997_s3 + $0xe0] sm:$0xff]  ;;  %v6808_v43 = vpop.xlane.xlu0 %1318  ;;  %v6810_v61 = vpop.xlane.xlu2 %1333 }
 0x2e6   : > { %9212 = vst [vmem:[#allocation102_spill] sm:$0xff] %v6752_v63  ;;  %v1469_v22 = vmul.f32 0.020408163, %v6119_v10  ;;  %2973 = vperm.xlu1 %3987, %v6752_v63   ;;  %v2070_v47 = vmul.f32 %v6568_v32, %v2069_v36  ;;  %v9217_v37 = vsub.f32 1.5, %v6535_v53  ;;  %v2030_v29 = vmul.f32 %v6542_v42, %v2029_v35  ;;  %v2528_v35 = vld [vmem:[%s5997_s3 + $0xb8] sm:$0xff] }
 0x2e7   : > { %vm2052_vm4 = vweird.f32 %v6491_v48  ;;  %v2087_v10 = vmul.f32 %v6712_v15, %v2086_v46  ;;  %v2136_v50 = vmul.f32 %v6738_v58, %v6641_v14  ;;  %v2126_v53 = vmul.f32 %v6745_v33, %v6649_v31  ;;  %9220 = vst [vmem:[#allocation68_spill] sm:$0xff] %v6810_v61  ;;  %v2529_v61 = vld [vmem:[%s5997_s3 + $0xc0] sm:$0xff] }
 0x2e8   : > { %v2020_v44 = vmul.f32 %v6426_v49, %v9217_v37  ;;  %v6792_v36 = vadd.f32 0.001, %v1679_v7  ;;  %v6795_v16 = vpop.eup %4059  ;;  %vm2062_vm8 = vweird.f32 %v6626_v56  ;;  %vm2101_vm7 = vweird.f32 %v6546_v28 }
 0x2e9   : > { %4061 = vrsqrt.f32 %v6749_v41  ;;  %v6800_v5 = vadd.f32 0.001, %v1677_v12  ;;  %v2074_v46 = vsel %vm6783_vm5, %v6568_v32, %v2070_v47  ;;  %vm2051_vm10 = vweird.f32 %v6399_v55  ;;  %v9223_v32 = vld [vmem:[#allocation105_spill] sm:$0xff]  ;;  %vm6879_vm14 = vmor %vm2101_vm7, %vm2102_vm9 }
 0x2ea   : > { %v2024_v7 = vsel %vm6765_vm6, %v6426_v49, %v2020_v44  ;;  %v1682_v37 = vmax.f32 %v1610_v4, 0.0  ;;  %v1608_v47 = vsub.f32 %v1464_v9, %v9223_v32  ;;  %v1468_v30 = vmul.f32 0.020408163, %v6283_v60  ;;  %vm6895_vm1 = vmor %vm2051_vm10, %vm2052_vm4 }
 0x2eb   : > { %v6823_v49 = vmul.f32 %v2533_v62, %v2074_v46  ;;  %vm2061_vm12 = vweird.f32 %v6526_v0  ;;  %v1681_v44 = vmax.f32 %v1609_v40, 0.0  ;;  %v1613_v63 = vsub.f32 %v1469_v22, %v9225_v38  ;;  %v2536_v38 = vld [vmem:[%s5997_s3 + $0xf8] sm:$0xff] }
 0x2ec   : > { %v6827_v25 = vmul.f32 %v2528_v35, %v2024_v7  ;;  %v2034_v24 = vsel %vm6817_vm11, %v6542_v42, %v2030_v29  ;;  %v2137_v4 = vmul.f32 %v6738_v58, %v2136_v50  ;;  %v2127_v9 = vmul.f32 %v6745_v33, %v2126_v53  ;;  %v9227_v50 = vld [vmem:[#allocation108_spill] sm:$0xff]  ;;  %vm6916_vm3 = vmor %vm2061_vm12, %vm2062_vm8 }
 0x2ed   : > { %9224 = vst [vmem:[#allocation103_spill] sm:$0xff] %v6823_v49  ;;  %v2116_v60 = vmul.f32 %v6795_v16, %v6697_v51  ;;  %4063 = vrsqrt.f32 %v6792_v36  ;;  %3008 = vperm.xlu0 %3986, %v6823_v49   ;;  %v2059_v40 = vsub.f32 1.5, %v6741_v1  ;;  %v2099_v22 = vsub.f32 1.5, %v6754_v8  ;;  %v6910_v55 = vpop.xlane.xlu2 %1342 }
 0x2ee   : > { %9226 = vst [vmem:[#allocation41_spill] sm:$0xff] %v6827_v25  ;;  %4065 = vrsqrt.f32 %v6800_v5  ;;  %v1467_v42 = vmul.f32 0.020408163, %v6228_v20  ;;  %2983 = vperm.xlu2 %3988, %v6827_v25   ;;  %v6844_v62 = vadd.f32 0.001, %v1682_v37  ;;  %v1680_v29 = vmax.f32 %v1608_v47, 0.0  ;;  %v6863_v47 = vpop.xlane.xlu1 %1321 }
 0x2ef   : > { %v1612_v53 = vsub.f32 %v1468_v30, %v9227_v50  ;;  %v6847_v35 = vmul.f32 %v2529_v61, %v2034_v24  ;;  %v6849_v46 = vpop.eup %4061  ;;  %v6852_v7 = vmul.f32 0.5, %v2087_v10  ;;  %v6854_v8 = vadd.f32 0.001, %v1681_v44  ;;  %v9229_v10 = vld [vmem:[#allocation109_spill] sm:$0xff]  ;;  %9235 = vst [vmem:[#allocation107_spill] sm:$0xff] %v6910_v55  ;;  %v2532_v55 = vld [vmem:[%s5997_s3 + $0xd8] sm:$0xff] }
 0x2f0   : > { %v1685_v12 = vmax.f32 %v1613_v63, 0.0  ;;  %v6856_v20 = vmul.f32 0.5, %v2137_v4  ;;  %v6858_v32 = vmul.f32 0.5, %v2127_v9  ;;  %v2117_v37 = vmul.f32 %v6795_v16, %v2116_v60 }
 0x2f1   : > { %9228 = vst [vmem:[#allocation105_spill] sm:$0xff] %v6847_v35  ;;  %v1472_v61 = vmul.f32 0.020408163, %v6230_v26  ;;  %2988 = vperm.xlu1 %3987, %v6847_v35   ;;  %vm2082_vm13 = vweird.f32 %v6550_v57  ;;  %v1611_v30 = vsub.f32 %v1467_v42, %v9229_v10  ;;  %v1471_v44 = vmul.f32 0.020408163, %v6375_v34  ;;  %v9240_v35 = vld [vmem:[#allocation111_spill] sm:$0xff] }
 0x2f2   : > { %v2100_v63 = vmul.f32 %v6645_v21, %v2099_v22  ;;  %v9230_v24 = vsub.f32 1.5, %v6594_v52  ;;  %vm2132_vm15 = vweird.f32 %v6745_v33  ;;  %4067 = vrsqrt.f32 %v6844_v62  ;;  %v2531_v52 = vld [vmem:[%s5997_s3 + $0xd0] sm:$0xff] }
 0x2f3   : > { %v6873_v9 = vpop.eup %4063  ;;  %v6885_v34 = vadd.f32 0.001, %v1680_v29  ;;  %v1684_v60 = vmax.f32 %v1612_v53, 0.0  ;;  %v2060_v22 = vmul.f32 %v6626_v56, %v2059_v40  ;;  %vm2081_vm2 = vweird.f32 %v6463_v23  ;;  %v6908_v53 = vpop.xlane.xlu0 %1327 }
 0x2f4   : > { %v2050_v4 = vmul.f32 %v6491_v48, %v9230_v24  ;;  %v6889_v42 = vpop.eup %4065  ;;  %v2156_v29 = vmul.f32 %v6849_v46, %v6749_v41  ;;  %4069 = vrsqrt.f32 %v6854_v8  ;;  %v6903_v50 = vadd.f32 0.001, %v1685_v12  ;;  %v9238_v12 = vld [vmem:[#allocation110_spill] sm:$0xff]  ;;  %vm6981_vm5 = vmor %vm2081_vm2, %vm2082_vm13 }
 0x2f5   : > { %v2104_v40 = vsel %vm6879_vm14, %v6645_v21, %v2100_v63  ;;  %vm2131_vm6 = vweird.f32 %v6649_v31  ;;  %v1616_v24 = vsub.f32 %v1472_v61, %v9238_v12  ;;  %v1470_v1 = vmul.f32 0.020408163, %v6306_v3 }
 0x2f6   : > { %v6923_v26 = vmul.f32 %v2536_v38, %v2104_v40  ;;  %v2054_v21 = vsel %vm6895_vm1, %v6491_v48, %v2050_v4  ;;  %v1683_v63 = vmax.f32 %v1611_v30, 0.0  ;;  %v1615_v25 = vsub.f32 %v1471_v44, %v9240_v35  ;;  %vm2133_vm8 = vmor %vm2131_vm6, %vm2132_vm15 }
 0x2f7   : > { %v6929_v0 = vmul.f32 %v2531_v52, %v2054_v21  ;;  %v2064_v49 = vsel %vm6916_vm3, %v6626_v56, %v2060_v22  ;;  %vm2092_vm9 = vweird.f32 %v6712_v15  ;;  %v6936_v61 = vmul.f32 0.5, %v2117_v37 }
 0x2f8   : > { %9239 = vst [vmem:[#allocation108_spill] sm:$0xff] %v6923_v26  ;;  %v2166_v3 = vmul.f32 %v6873_v9, %v6792_v36  ;;  %4071 = vrsqrt.f32 %v6885_v34  ;;  %v6941_v48 = vadd.f32 0.001, %v1684_v60  ;;  %3023 = vperm.xlu0 %3986, %v6923_v26   ;;  %v2089_v35 = vsub.f32 1.5, %v6852_v7  ;;  %v6950_v37 = vpop.eup %4067  ;;  %v9242_v60 = vld [vmem:[#allocation112_spill] sm:$0xff] }
 0x2f9   : > { %9241 = vst [vmem:[#allocation109_spill] sm:$0xff] %v6929_v0  ;;  %v2129_v30 = vsub.f32 1.5, %v6858_v32  ;;  %v2157_v56 = vmul.f32 %v6849_v46, %v2156_v29  ;;  %v2146_v44 = vmul.f32 %v6889_v42, %v6800_v5  ;;  %2998 = vperm.xlu2 %3988, %v6929_v0   ;;  %vm2091_vm4 = vweird.f32 %v6619_v6 }
 0x2fa   : > { %v1688_v4 = vmax.f32 %v1616_v24, 0.0  ;;  %v1614_v52 = vsub.f32 %v1470_v1, %v9242_v60  ;;  %v6955_v22 = vmul.f32 %v2532_v55, %v2064_v49  ;;  %v6957_v7 = vpop.eup %4069  ;;  %4073 = vrsqrt.f32 %v6903_v50  ;;  %v6968_v1 = vpop.xlane.xlu1 %1330  ;;  %vm7038_vm12 = vmor %vm2091_vm4, %vm2092_vm9 }
 0x2fb   : > { %v6960_v32 = vadd.f32 0.001, %v1683_v63  ;;  %v1687_v28 = vmax.f32 %v1615_v25, 0.0  ;;  %v1475_v29 = vmul.f32 0.020408163, %v6308_v59  ;;  %v2167_v10 = vmul.f32 %v6873_v9, %v2166_v3  ;;  %v7004_v38 = vpop.xlane.xlu0 %1336 }
 0x2fc   : > { %9243 = vst [vmem:[#allocation110_spill] sm:$0xff] %v6955_v22  ;;  %4075 = vrsqrt.f32 %v6941_v48  ;;  %v1474_v49 = vmul.f32 0.020408163, %v6467_v11  ;;  %3003 = vperm.xlu1 %3987, %v6955_v22   ;;  %v6970_v55 = vmul.f32 0.5, %v2157_v56  ;;  %v2147_v25 = vmul.f32 %v6889_v42, %v2146_v44  ;;  %v2539_v56 = vld [vmem:[%s5997_s3 + $0x110] sm:$0xff]  ;;  %v2534_v44 = vld [vmem:[%s5997_s3 + $0xe8] sm:$0xff] }
 0x2fd   : > { %v1473_v59 = vmul.f32 0.020408163, %v6411_v45  ;;  %v2130_v12 = vmul.f32 %v6745_v33, %v2129_v30  ;;  %v2196_v21 = vmul.f32 %v6950_v37, %v6844_v62  ;;  %v6987_v63 = vadd.f32 0.001, %v1688_v4  ;;  %v9247_v4 = vld [vmem:[#allocation114_spill] sm:$0xff]  ;;  %9248 = vst [vmem:[#allocation111_spill] sm:$0xff] %v7004_v38 }
 0x2fe   : > { %v6975_v24 = vpop.eup %4071  ;;  %v1686_v3 = vmax.f32 %v1614_v52, 0.0  ;;  %v9246_v45 = vsub.f32 1.5, %v6678_v18  ;;  %v2186_v23 = vmul.f32 %v6957_v7, %v6854_v8  ;;  %4077 = vrsqrt.f32 %v6960_v32  ;;  %v7006_v18 = vpop.xlane.xlu2 %1351  ;;  %v2535_v11 = vld [vmem:[%s5997_s3 + $0xf0] sm:$0xff] }
 0x2ff   : > { %v7001_v60 = vadd.f32 0.001, %v1687_v28  ;;  %v1619_v52 = vsub.f32 %v1475_v29, %v9247_v4  ;;  %9249 = vst [vmem:[#allocation112_spill] sm:$0xff] %v7006_v18  ;;  %v2134_v22 = vsel %vm2133_vm8, %v6745_v33, %v2130_v12  ;;  %v2090_v0 = vmul.f32 %v6712_v15, %v2089_v35  ;;  %v9251_v29 = vld [vmem:[#allocation31_spill] sm:$0xff] }
 0x300   : > { %v2080_v30 = vmul.f32 %v6550_v57, %v9246_v45  ;;  %v9250_v45 = vld [vmem:[#allocation44_spill] sm:$0xff]  ;;  %v7014_v26 = vpop.eup %4073  ;;  %vm2112_vm7 = vweird.f32 %v6637_v39  ;;  %v2176_v28 = vmul.f32 %v6975_v24, %v6885_v34  ;;  %v1617_v4 = vsub.f32 %v1473_v59, %v9251_v29 }
 0x301   : > { %v1618_v40 = vsub.f32 %v1474_v49, %v9250_v45  ;;  %v7020_v18 = vmul.f32 %v2539_v56, %v2134_v22  ;;  %vm2122_vm10 = vweird.f32 %v6795_v16  ;;  %v2159_v35 = vsub.f32 1.5, %v6970_v55 }
 0x302   : > { %v2084_v31 = vsel %vm6981_vm5, %v6550_v57, %v2080_v30  ;;  %v7024_v33 = vpop.eup %4075  ;;  %v7027_v57 = vmul.f32 0.5, %v2167_v10  ;;  %4079 = vrsqrt.f32 %v6987_v63  ;;  %v7031_v12 = vadd.f32 0.001, %v1686_v3 }
 0x303   : > { %9252 = vst [vmem:[#allocation114_spill] sm:$0xff] %v7020_v18  ;;  %v7022_v49 = vmul.f32 %v2534_v44, %v2084_v31  ;;  %vm2111_vm11 = vweird.f32 %v6538_v54  ;;  %v7042_v59 = vmul.f32 0.5, %v2147_v25  ;;  %v2197_v10 = vmul.f32 %v6950_v37, %v2196_v21  ;;  %3038 = vperm.xlu0 %3986, %v7020_v18   ;;  %v2537_v18 = vld [vmem:[%s5997_s3 + $0x100] sm:$0xff] }
 0x304   : > { %4081 = vrsqrt.f32 %v7001_v60  ;;  %v1691_v55 = vmax.f32 %v1619_v52, 0.0  ;;  %vm2121_vm13 = vweird.f32 %v6697_v51  ;;  %v2187_v6 = vmul.f32 %v6957_v7, %v2186_v23  ;;  %v7056_v21 = vpop.eup %4077  ;;  %vm2113_vm6 = vmor %vm2111_vm11, %vm2112_vm7 }
 0x305   : > { %9253 = vst [vmem:[#allocation44_spill] sm:$0xff] %v7022_v49  ;;  %3013 = vperm.xlu2 %3988, %v7022_v49   ;;  %v2226_v3 = vmul.f32 %v7014_v26, %v6903_v50  ;;  %v1690_v56 = vmax.f32 %v1618_v40, 0.0  ;;  %v2094_v25 = vsel %vm7038_vm12, %v6712_v15, %v2090_v0  ;;  %vm2161_vm14 = vweird.f32 %v6749_v41  ;;  %v7067_v15 = vpop.xlane.xlu1 %1339  ;;  %vm7136_vm4 = vmor %vm2121_vm13, %vm2122_vm10 }
 0x306   : > { %v2177_v30 = vmul.f32 %v6975_v24, %v2176_v28  ;;  %v2216_v44 = vmul.f32 %v7024_v33, %v6941_v48  ;;  %v1689_v52 = vmax.f32 %v1617_v4, 0.0  ;;  %vm2162_vm15 = vweird.f32 %v6849_v46  ;;  %v7085_v0 = vpop.permute.xlu2 %2878 }
 0x307   : > { %4083 = vrsqrt.f32 %v7031_v12  ;;  %v1477_v40 = vmul.f32 0.020408163, %v6563_v17  ;;  %v7065_v23 = vmul.f32 %v2535_v11, %v2094_v25  ;;  %v7071_v31 = vadd.f32 0.001, %v1691_v55  ;;  %v2542_v25 = vld [vmem:[%s5997_s3 + $0x128] sm:$0xff]  ;;  %9257 = vst [vmem:[#allocation139_spill] sm:$0xff] %v7085_v0  ;;  %vm2163_vm1 = vmor %vm2161_vm14, %vm2162_vm15 }
 0x308   : > { %v2160_v28 = vmul.f32 %v6849_v46, %v2159_v35  ;;  %v7074_v29 = vpop.eup %4079  ;;  %v7076_v4 = vmul.f32 0.5, %v2197_v10  ;;  %v7078_v22 = vmul.f32 0.5, %v2187_v6  ;;  %v2227_v17 = vmul.f32 %v7014_v26, %v2226_v3  ;;  %v7100_v3 = vpop.xlane.xlu0 %1345  ;;  %v9259_v0 = vld [vmem:[#allocation120_spill] sm:$0xff] }
 0x309   : > { %9256 = vst [vmem:[#allocation31_spill] sm:$0xff] %v7065_v23  ;;  %v7081_v11 = vadd.f32 0.001, %v1690_v56  ;;  %3018 = vperm.xlu1 %3987, %v7065_v23   ;;  %v7093_v35 = vmul.f32 0.5, %v2177_v30  ;;  %v2217_v10 = vmul.f32 %v7024_v33, %v2216_v44  ;;  %v2206_v55 = vmul.f32 %v7056_v21, %v6960_v32 }
 0x30a   : > { %v7087_v45 = vpop.eup %4081  ;;  %v7098_v6 = vadd.f32 0.001, %v1689_v52  ;;  %9258 = vst [vmem:[#allocation140_spill] sm:$0xff] %v7100_v3  ;;  %vm2191_vm2 = vweird.f32 %v6854_v8  ;;  %v1478_v56 = vmul.f32 0.020408163, %v6413_v2  ;;  %v1621_v23 = vsub.f32 %v1477_v40, %v9259_v0 }
 0x30b   : > { %v2164_v41 = vsel %vm2163_vm1, %v6849_v46, %v2160_v28  ;;  %v9260_v30 = vsub.f32 1.5, %v6747_v19  ;;  %vm2142_vm3 = vweird.f32 %v6738_v58  ;;  %v2256_v44 = vmul.f32 %v7074_v29, %v6987_v63 }
 0x30c   : > { %4085 = vrsqrt.f32 %v7071_v31  ;;  %v7113_v52 = vmul.f32 %v2542_v25, %v2164_v41  ;;  %v9262_v2 = vsub.f32 1.5, %v6936_v61  ;;  %v2189_v19 = vsub.f32 1.5, %v7078_v22  ;;  %v2538_v25 = vld [vmem:[%s5997_s3 + $0x108] sm:$0xff]  ;;  %v9265_v41 = vld [vmem:[#allocation119_spill] sm:$0xff] }
 0x30d   : > { %v2110_v49 = vmul.f32 %v6637_v39, %v9260_v30  ;;  %v7119_v46 = vpop.eup %4083  ;;  %v7126_v0 = vmul.f32 0.5, %v2227_v17  ;;  %v2246_v28 = vmul.f32 %v7087_v45, %v7001_v60  ;;  %4087 = vrsqrt.f32 %v7081_v11 }
 0x30e   : > { %9261 = vst [vmem:[#allocation120_spill] sm:$0xff] %v7113_v52  ;;  %v2120_v40 = vmul.f32 %v6795_v16, %v9262_v2  ;;  %vm2141_vm9 = vweird.f32 %v6641_v14  ;;  %v7140_v54 = vmul.f32 0.5, %v2217_v10  ;;  %4089 = vrsqrt.f32 %v7098_v6  ;;  %3053 = vperm.xlu0 %3986, %v7113_v52  }
 0x30f   : > { %v1476_v22 = vmul.f32 0.020408163, %v6506_v27  ;;  %v2114_v17 = vsel %vm2113_vm6, %v6637_v39, %v2110_v49  ;;  %v1622_v30 = vsub.f32 %v1478_v56, %v9265_v41  ;;  %v1693_v2 = vmax.f32 %v1621_v23, 0.0  ;;  %v9267_v39 = vld [vmem:[#allocation92_spill] sm:$0xff]  ;;  %v9268_v23 = vld [vmem:[#allocation38_spill] sm:$0xff]  ;;  %v9272_v41 = vld [vmem:[#allocation121_spill] sm:$0xff] }
 0x310   : > { %v7148_v3 = vmul.f32 %v2537_v18, %v2114_v17  ;;  %v2124_v51 = vsel %vm7136_vm4, %v6795_v16, %v2120_v40  ;;  %vm2152_vm5 = vweird.f32 %v6889_v42  ;;  %v2207_v10 = vmul.f32 %v7056_v21, %v2206_v55  ;;  %v7165_v40 = vpop.xlane.xlu1 %1348  ;;  %v7167_v55 = vpop.permute.xlu2 %2883  ;;  %vm2143_vm1 = vmor %vm2141_vm9, %vm2142_vm3 }
 0x311   : > { %v2257_v27 = vmul.f32 %v7074_v29, %v2256_v44  ;;  %v2236_v52 = vmul.f32 %v7119_v46, %v7031_v12  ;;  %v1480_v49 = vmul.f32 0.020408163, %v9267_v39  ;;  %vm2192_vm8 = vweird.f32 %v6957_v7  ;;  %9270 = vst [vmem:[#allocation38_spill] sm:$0xff] %v7165_v40 }
 0x312   : > { %9266 = vst [vmem:[#allocation119_spill] sm:$0xff] %v7148_v3  ;;  %v2247_v18 = vmul.f32 %v7087_v45, %v2246_v28  ;;  %v1481_v56 = vmul.f32 0.020408163, %v9268_v23  ;;  %3028 = vperm.xlu2 %3988, %v7148_v3   ;;  %v7163_v16 = vmul.f32 %v2538_v25, %v2124_v51  ;;  %v7169_v44 = vpop.eup %4085  ;;  %vm2172_vm7 = vweird.f32 %v6873_v9  ;;  %v7177_v51 = vpop.permute.xlu0 %2868  ;;  %v2545_v28 = vld [vmem:[%s5997_s3 + $0x140] sm:$0xff]  ;;  %vm2193_vm13 = vmor %vm2191_vm2, %vm2192_vm8  ;;  %v9275_v23 = vld [vmem:[#allocation122_spill] sm:$0xff] }
 0x313   : > { %9271 = vst [vmem:[#allocation141_spill] sm:$0xff] %v7167_v55  ;;  %vm2151_vm10 = vweird.f32 %v6800_v5  ;;  %v1620_v25 = vsub.f32 %v1476_v22, %v9272_v41  ;;  %v7179_v39 = vpop.eup %4087  ;;  %vm2222_vm11 = vweird.f32 %v7024_v33  ;;  %v1694_v55 = vmax.f32 %v1622_v30, 0.0  ;;  %v9274_v41 = vld [vmem:[#allocation123_spill] sm:$0xff] }
 0x314   : > { %9269 = vst [vmem:[#allocation92_spill] sm:$0xff] %v7163_v16  ;;  %v7183_v3 = vadd.f32 0.001, %v1693_v2  ;;  %3033 = vperm.xlu1 %3987, %v7163_v16   ;;  %v2190_v61 = vmul.f32 %v6957_v7, %v2189_v19  ;;  %v7188_v38 = vpop.eup %4089  ;;  %vm2171_vm12 = vweird.f32 %v6792_v36  ;;  %v7195_v22 = vmul.f32 0.5, %v2207_v10  ;;  %vm7255_vm9 = vmor %vm2151_vm10, %vm2152_vm5  ;;  %v9298_v36 = vld [vmem:[#allocation128_spill] sm:$0xff] }
 0x315   : > { %9273 = vst [vmem:[#allocation121_spill] sm:$0xff] %v7177_v51  ;;  %v7197_v30 = vmul.f32 0.5, %v2257_v27  ;;  %v2237_v2 = vmul.f32 %v7119_v46, %v2236_v52  ;;  %v1624_v17 = vsub.f32 %v1480_v49, %v9274_v41  ;;  %vm2221_vm14 = vweird.f32 %v6941_v48  ;;  %v9277_v27 = vld [vmem:[#allocation20_spill] sm:$0xff]  ;;  %vm7281_vm5 = vmor %vm2171_vm12, %vm2172_vm7 }
 0x316   : > { %v7202_v19 = vmul.f32 0.5, %v2247_v18  ;;  %v1625_v51 = vsub.f32 %v1481_v56, %v9275_v23  ;;  %v2194_v16 = vsel %vm2193_vm13, %v6957_v7, %v2190_v61  ;;  %v9276_v8 = vsub.f32 1.5, %v6856_v20  ;;  %v2540_v18 = vld [vmem:[%s5997_s3 + $0x118] sm:$0xff]  ;;  %vm7300_vm7 = vmor %vm2221_vm14, %vm2222_vm11 }
 0x317   : > { %vm2182_vm15 = vweird.f32 %v6975_v24  ;;  %v2286_v10 = vmul.f32 %v7169_v44, %v7071_v31  ;;  %v1692_v52 = vmax.f32 %v1620_v25, 0.0  ;;  %v1479_v49 = vmul.f32 0.020408163, %v9277_v27 }
 0x318   : > { %v2140_v40 = vmul.f32 %v6738_v58, %v9276_v8  ;;  %v7213_v41 = vmul.f32 %v2545_v28, %v2194_v16  ;;  %v2276_v20 = vmul.f32 %v7179_v39, %v7081_v11  ;;  %v7222_v7 = vadd.f32 0.001, %v1694_v55  ;;  %v7238_v8 = vpop.permute.xlu2 %2893  ;;  %v7240_v27 = vpop.permute.xlu1 %2873 }
 0x319   : > { %4091 = vrsqrt.f32 %v7183_v3  ;;  %v1483_v56 = vmul.f32 0.020408163, %v6759_v13  ;;  %vm2181_vm2 = vweird.f32 %v6885_v34  ;;  %v2266_v61 = vmul.f32 %v7188_v38, %v7098_v6 }
 0x31a   : > { %9278 = vst [vmem:[#allocation123_spill] sm:$0xff] %v7213_v41  ;;  %v1696_v28 = vmax.f32 %v1624_v17, 0.0  ;;  %3068 = vperm.xlu0 %3986, %v7213_v41   ;;  %v2144_v14 = vsel %vm2143_vm1, %v6738_v58, %v2140_v40  ;;  %vm2252_vm3 = vweird.f32 %v7087_v45  ;;  %v7234_v25 = vmul.f32 0.5, %v2237_v2  ;;  %v9279_v58 = vld [vmem:[#allocation124_spill] sm:$0xff]  ;;  %v2541_v41 = vld [vmem:[%s5997_s3 + $0x120] sm:$0xff]  ;;  %vm7333_vm12 = vmor %vm2181_vm2, %vm2182_vm15 }
 0x31b   : > { %v1697_v13 = vmax.f32 %v1625_v51, 0.0  ;;  %v7236_v23 = vmul.f32 %v2540_v18, %v2144_v14  ;;  %vm2202_vm6 = vweird.f32 %v6950_v37  ;;  %v2249_v17 = vsub.f32 1.5, %v7202_v19  ;;  %v9284_v14 = vld [vmem:[#allocation88_spill] sm:$0xff] }
 0x31c   : > { %v7244_v16 = vadd.f32 0.001, %v1692_v52  ;;  %v1623_v40 = vsub.f32 %v1479_v49, %v9279_v58  ;;  %v9280_v55 = vsub.f32 1.5, %v7042_v59  ;;  %vm2251_vm4 = vweird.f32 %v7001_v60  ;;  %v9283_v59 = vld [vmem:[#allocation55_spill] sm:$0xff] }
 0x31d   : > { %v2287_v19 = vmul.f32 %v7169_v44, %v2286_v10  ;;  %v2277_v52 = vmul.f32 %v7179_v39, %v2276_v20  ;;  %4093 = vrsqrt.f32 %v7222_v7  ;;  %v1627_v49 = vsub.f32 %v1483_v56, %v9283_v59  ;;  %3043 = vperm.xlu2 %3988, %v7236_v23   ;;  %v7273_v20 = vpop.permute.xlu0 %2903  ;;  %vm7373_vm2 = vmor %vm2251_vm4, %vm2252_vm3 }
 0x31e   : > { %v2150_v2 = vmul.f32 %v6889_v42, %v9280_v55  ;;  %vm2201_vm8 = vweird.f32 %v6844_v62  ;;  %v2267_v5 = vmul.f32 %v7188_v38, %v2266_v61  ;;  %v7267_v18 = vadd.f32 0.001, %v1696_v28  ;;  %9285 = vst [vmem:[#allocation122_spill] sm:$0xff] %v7273_v20 }
 0x31f   : > { %v1484_v55 = vmul.f32 0.020408163, %v9284_v14  ;;  %v7275_v58 = vpop.eup %4091  ;;  %v7285_v61 = vadd.f32 0.001, %v1697_v13  ;;  %v9288_v59 = vsub.f32 1.5, %v7140_v54  ;;  %v9289_v51 = vsub.f32 1.5, %v7027_v57 }
 0x320   : > { %v2154_v10 = vsel %vm7255_vm9, %v6889_v42, %v2150_v2  ;;  %v2548_v2 = vld [vmem:[%s5997_s3 + $0x158] sm:$0xff]  ;;  %vm2212_vm10 = vweird.f32 %v7056_v21  ;;  %4095 = vrsqrt.f32 %v7244_v16  ;;  %v1695_v54 = vmax.f32 %v1623_v40, 0.0  ;;  %v2543_v13 = vld [vmem:[%s5997_s3 + $0x130] sm:$0xff]  ;;  %vm7386_vm9 = vmor %vm2201_vm8, %vm2202_vm6 }
 0x321   : > { %v7287_v28 = vmul.f32 %v2541_v41, %v2154_v10  ;;  %v2220_v42 = vmul.f32 %v7024_v33, %v9288_v59  ;;  %v2170_v14 = vmul.f32 %v6873_v9, %v9289_v51  ;;  %v1486_v41 = vmul.f32 0.020408163, %v6863_v47 }
 0x322   : > { %v9292_v57 = vsub.f32 1.5, %v7093_v35  ;;  %v7311_v59 = vmul.f32 0.5, %v2277_v52  ;;  %v1699_v51 = vmax.f32 %v1627_v49, 0.0  ;;  %vm2211_vm11 = vweird.f32 %v6960_v32  ;;  %v9293_v35 = vld [vmem:[#allocation17_spill] sm:$0xff] }
 0x323   : > { %3048 = vperm.xlu1 %3987, %v7287_v28   ;;  %v2224_v48 = vsel %vm7300_vm7, %v7024_v33, %v2220_v42  ;;  %v2174_v40 = vsel %vm7281_vm5, %v6873_v9, %v2170_v14  ;;  %v2306_v47 = vmul.f32 %v7275_v58, %v7183_v3  ;;  %4097 = vrsqrt.f32 %v7267_v18  ;;  %v9296_v33 = vld [vmem:[#allocation135_spill] sm:$0xff]  ;;  %vm7429_vm4 = vmor %vm2211_vm11, %vm2212_vm10 }
 0x324   : > { %v2180_v10 = vmul.f32 %v6975_v24, %v9292_v57  ;;  %v1628_v52 = vsub.f32 %v1484_v55, %v9293_v35  ;;  %v7325_v49 = vmul.f32 %v2548_v2, %v2224_v48  ;;  %v7327_v57 = vpop.eup %4093  ;;  %4099 = vrsqrt.f32 %v7285_v61  ;;  %v7342_v2 = vpop.permute.xlu2 %2908  ;;  %v2544_v35 = vld [vmem:[%s5997_s3 + $0x138] sm:$0xff] }
 0x325   : > { %v1482_v56 = vmul.f32 0.020408163, %v9296_v33  ;;  %v7339_v42 = vmul.f32 %v2543_v13, %v2174_v40  ;;  %v2250_v55 = vmul.f32 %v7087_v45, %v2249_v17  ;;  %9297 = vst [vmem:[#allocation20_spill] sm:$0xff] %v7342_v2  ;;  %vm2232_vm13 = vweird.f32 %v7014_v26  ;;  %v2546_v2 = vld [vmem:[%s5997_s3 + $0x148] sm:$0xff] }
 0x326   : > { %v7345_v14 = vadd.f32 0.001, %v1695_v54  ;;  %v1630_v34 = vsub.f32 %v1486_v41, %v9298_v36  ;;  %3083 = vperm.xlu0 %3986, %v7325_v49   ;;  %v2184_v48 = vsel %vm7333_vm12, %v6975_v24, %v2180_v10  ;;  %v9299_v13 = vsub.f32 1.5, %v7076_v4  ;;  %v7364_v41 = vpop.permute.xlu1 %2888  ;;  %v7366_v24 = vpop.eup %4095 }
 0x327   : > { %v7357_v33 = vmul.f32 0.5, %v2287_v19  ;;  %vm2281_vm14 = vweird.f32 %v7081_v11  ;;  %vm2282_vm15 = vweird.f32 %v7179_v39  ;;  %v7361_v54 = vadd.f32 0.001, %v1699_v51  ;;  %3058 = vperm.xlu2 %3988, %v7339_v42   ;;  %9300 = vst [vmem:[#allocation124_spill] sm:$0xff] %v7364_v41 }
 0x328   : > { %v2200_v40 = vmul.f32 %v6950_v37, %v9299_v13  ;;  %vm2231_vm1 = vweird.f32 %v6903_v50  ;;  %v7377_v19 = vmul.f32 0.5, %v2267_v5  ;;  %v2316_v10 = vmul.f32 %v7327_v57, %v7222_v7  ;;  %v9305_v13 = vld [vmem:[#allocation125_spill] sm:$0xff]  ;;  %vm7466_vm10 = vmor %vm2281_vm14, %vm2282_vm15  ;;  %v9318_v50 = vld [vmem:[#allocation99_spill] sm:$0xff] }
 0x329   : > { %v2307_v51 = vmul.f32 %v7275_v58, %v2306_v47  ;;  %v1700_v9 = vmax.f32 %v1628_v52, 0.0  ;;  %v2279_v60 = vsub.f32 1.5, %v7311_v59  ;;  %v1626_v17 = vsub.f32 %v1482_v56, %v9305_v13  ;;  %v2551_v47 = vld [vmem:[%s5997_s3 + $0x170] sm:$0xff]  ;;  %v7398_v52 = vpop.eup %4097  ;;  %vm7480_vm12 = vmor %vm2231_vm1, %vm2232_vm13 }
 0x32a   : > { %v7392_v5 = vmul.f32 %v2544_v35, %v2184_v48  ;;  %v2254_v20 = vsel %vm7373_vm2, %v7087_v45, %v2250_v55  ;;  %vm2242_vm3 = vweird.f32 %v7119_v46  ;;  %4101 = vrsqrt.f32 %v7345_v14  ;;  %v7409_v35 = vpop.permute.xlu0 %2918  ;;  %v7411_v45 = vpop.eup %4099 }
 0x32b   : > { %v1702_v62 = vmax.f32 %v1630_v34, 0.0  ;;  %v2204_v59 = vsel %vm7386_vm9, %v6950_v37, %v2200_v40  ;;  %v9306_v56 = vsub.f32 1.5, %v7195_v22  ;;  %9307 = vst [vmem:[#allocation55_spill] sm:$0xff] %v7409_v35  ;;  %v2296_v4 = vmul.f32 %v7366_v24, %v7244_v16 }
 0x32c   : > { %4103 = vrsqrt.f32 %v7361_v54  ;;  %v1489_v34 = vmul.f32 0.020408163, %v6968_v1  ;;  %3063 = vperm.xlu1 %3987, %v7392_v5   ;;  %vm2241_vm6 = vweird.f32 %v7031_v12  ;;  %v2317_v37 = vmul.f32 %v7327_v57, %v2316_v10  ;;  %v9325_v12 = vld [vmem:[#allocation126_spill] sm:$0xff] }
 0x32d   : > { %v2210_v48 = vmul.f32 %v7056_v21, %v9306_v56  ;;  %v2308_v22 = vmul.f32 0.5, %v2307_v51  ;;  %v7421_v40 = vadd.f32 0.001, %v1700_v9  ;;  %v7423_v36 = vmul.f32 %v2551_v47, %v2254_v20  ;;  %v7438_v51 = vpop.permute.xlu2 %2923  ;;  %v2547_v47 = vld [vmem:[%s5997_s3 + $0x150] sm:$0xff]  ;;  %v9312_v20 = vld [vmem:[#allocation130_spill] sm:$0xff]  ;;  %vm7524_vm15 = vmor %vm2241_vm6, %vm2242_vm3 }
 0x32e   : > { %v2336_v1 = vmul.f32 %v7398_v52, %v7267_v18  ;;  %v1698_v56 = vmax.f32 %v1626_v17, 0.0  ;;  %v7435_v55 = vmul.f32 %v2546_v2, %v2204_v59  ;;  %v2280_v10 = vmul.f32 %v7179_v39, %v2279_v60  ;;  %9310 = vst [vmem:[#allocation88_spill] sm:$0xff] %v7438_v51 }
 0x32f   : > { %vm2262_vm8 = vweird.f32 %v7074_v29  ;;  %v7442_v9 = vadd.f32 0.001, %v1702_v62  ;;  %3098 = vperm.xlu0 %3986, %v7423_v36   ;;  %v2214_v32 = vsel %vm7429_vm4, %v7056_v21, %v2210_v48  ;;  %v9311_v2 = vsub.f32 1.5, %v7126_v0 }
 0x330   : > { %vm2311_vm5 = vweird.f32 %v7183_v3  ;;  %v2297_v60 = vmul.f32 %v7366_v24, %v2296_v4  ;;  %v2346_v59 = vmul.f32 %v7411_v45, %v7285_v61  ;;  %v1485_v62 = vmul.f32 0.020408163, %v6808_v43  ;;  %3073 = vperm.xlu2 %3988, %v7435_v55   ;;  %v7459_v21 = vpop.eup %4101 }
 0x331   : > { %v2230_v17 = vmul.f32 %v7014_v26, %v9311_v2  ;;  %v1633_v35 = vsub.f32 %v1489_v34, %v9312_v20  ;;  %vm2261_vm7 = vweird.f32 %v6987_v63  ;;  %v7470_v48 = vmul.f32 0.5, %v2317_v37  ;;  %v2554_v20 = vld [vmem:[%s5997_s3 + $0x188] sm:$0xff]  ;;  %v7493_v2 = vpop.permute.xlu1 %2898 }
 0x332   : > { %v2309_v43 = vsub.f32 1.5, %v2308_v22  ;;  %vm2312_vm11 = vweird.f32 %v7275_v58  ;;  %4105 = vrsqrt.f32 %v7421_v40  ;;  %v7474_v4 = vpop.eup %4103  ;;  %v2337_v34 = vmul.f32 %v7398_v52, %v2336_v1  ;;  %9317 = vst [vmem:[#allocation17_spill] sm:$0xff] %v7493_v2  ;;  %vm7573_vm4 = vmor %vm2261_vm7, %vm2262_vm8 }
 0x333   : > { %v7485_v37 = vadd.f32 0.001, %v1698_v56  ;;  %v7487_v13 = vmul.f32 %v2547_v47, %v2214_v32  ;;  %v2284_v22 = vsel %vm7466_vm10, %v7179_v39, %v2280_v10  ;;  %vm2272_vm14 = vweird.f32 %v7188_v38  ;;  %v2549_v56 = vld [vmem:[%s5997_s3 + $0x160] sm:$0xff]  ;;  %v9320_v10 = vld [vmem:[#allocation129_spill] sm:$0xff]  ;;  %vm7560_vm6 = vmor %vm2311_vm5, %vm2312_vm11 }
 0x334   : > { %v1487_v51 = vmul.f32 0.020408163, %v9318_v50  ;;  %4107 = vrsqrt.f32 %v7442_v9  ;;  %v2234_v1 = vsel %vm7480_vm12, %v7014_v26, %v2230_v17  ;;  %v9319_v32 = vsub.f32 1.5, %v7234_v25 }
 0x335   : > { %v7505_v0 = vmul.f32 0.5, %v2297_v60  ;;  %v2347_v39 = vmul.f32 %v7411_v45, %v2346_v59  ;;  %v1629_v2 = vsub.f32 %v1485_v62, %v9320_v10  ;;  %v1705_v41 = vmax.f32 %v1633_v35, 0.0  ;;  %3078 = vperm.xlu1 %3987, %v7487_v13   ;;  %v7518_v60 = vpop.permute.xlu0 %2933 }
 0x336   : > { %v2240_v47 = vmul.f32 %v7119_v46, %v9319_v32  ;;  %vm2271_vm13 = vweird.f32 %v7098_v6  ;;  %v2326_v11 = vmul.f32 %v7459_v21, %v7345_v14  ;;  %v2366_v26 = vmul.f32 %v7474_v4, %v7361_v54  ;;  %9321 = vst [vmem:[#allocation135_spill] sm:$0xff] %v7518_v60 }
 0x337   : > { %v1492_v25 = vmul.f32 0.020408163, %v7067_v15  ;;  %v7516_v17 = vmul.f32 %v2554_v20, %v2284_v22  ;;  %v2338_v62 = vmul.f32 0.5, %v2337_v34  ;;  %v7529_v50 = vmul.f32 %v2549_v56, %v2234_v1  ;;  %v7532_v15 = vpop.permute.xlu2 %2938  ;;  %v2550_v1 = vld [vmem:[%s5997_s3 + $0x168] sm:$0xff]  ;;  %vm7613_vm7 = vmor %vm2271_vm13, %vm2272_vm14 }
 0x338   : > { %v2310_v32 = vmul.f32 %v7275_v58, %v2309_v43  ;;  %9324 = vst [vmem:[#allocation128_spill] sm:$0xff] %v7532_v15  ;;  %v7534_v22 = vpop.eup %4105  ;;  %vm2292_vm1 = vweird.f32 %v7169_v44  ;;  %4109 = vrsqrt.f32 %v7485_v37  ;;  %v1631_v20 = vsub.f32 %v1487_v51, %v9325_v12  ;;  %v2552_v15 = vld [vmem:[%s5997_s3 + $0x178] sm:$0xff] }
 0x339   : > { %3113 = vperm.xlu0 %3986, %v7516_v17   ;;  %v2244_v34 = vsel %vm7524_vm15, %v7119_v46, %v2240_v47  ;;  %v9326_v56 = vsub.f32 1.5, %v7197_v30  ;;  %vm2341_vm2 = vweird.f32 %v7267_v18  ;;  %vm2342_vm9 = vweird.f32 %v7398_v52  ;;  %3088 = vperm.xlu2 %3988, %v7529_v50   ;;  %v9329_v47 = vld [vmem:[#allocation14_spill] sm:$0xff] }
 0x33a   : > { %v1701_v59 = vmax.f32 %v1629_v2, 0.0  ;;  %v7550_v51 = vadd.f32 0.001, %v1705_v41  ;;  %v7553_v12 = vpop.eup %4107  ;;  %vm2291_vm3 = vweird.f32 %v7071_v31  ;;  %v7564_v30 = vmul.f32 0.5, %v2347_v39  ;;  %vm7650_vm12 = vmor %vm2341_vm2, %vm2342_vm9 }
 0x33b   : > { %v2260_v43 = vmul.f32 %v7074_v29, %v9326_v56  ;;  %v2327_v41 = vmul.f32 %v7459_v21, %v2326_v11  ;;  %v2367_v2 = vmul.f32 %v7474_v4, %v2366_v26  ;;  %v1636_v35 = vsub.f32 %v1492_v25, %v9329_v47  ;;  %v2557_v11 = vld [vmem:[%s5997_s3 + $0x1a0] sm:$0xff]  ;;  %v9333_v25 = vld [vmem:[#allocation68_spill] sm:$0xff]  ;;  %vm7664_vm14 = vmor %vm2291_vm3, %vm2292_vm1 }
 0x33c   : > { %v2339_v3 = vsub.f32 1.5, %v2338_v62  ;;  %v1488_v10 = vmul.f32 0.020408163, %v6908_v53  ;;  %v7578_v60 = vmul.f32 %v2550_v1, %v2244_v34  ;;  %v2314_v39 = vsel %vm7560_vm6, %v7275_v58, %v2310_v32 }
 0x33d   : > { %vm2302_vm5 = vweird.f32 %v7366_v24  ;;  %v1703_v26 = vmax.f32 %v1631_v20, 0.0  ;;  %v1490_v47 = vmul.f32 0.020408163, %v9333_v25  ;;  %v2264_v63 = vsel %vm7573_vm4, %v7074_v29, %v2260_v43  ;;  %v7601_v20 = vpop.permute.xlu1 %2913  ;;  %v9336_v43 = vld [vmem:[#allocation38_spill] sm:$0xff]  ;;  %v2553_v25 = vld [vmem:[%s5997_s3 + $0x180] sm:$0xff] }
 0x33e   : > { %9332 = vst [vmem:[#allocation125_spill] sm:$0xff] %v7578_v60  ;;  %v9334_v62 = vsub.f32 1.5, %v7377_v19  ;;  %v2376_v34 = vmul.f32 %v7534_v22, %v7421_v40  ;;  %v2396_v58 = vmul.f32 %v7553_v12, %v7442_v9  ;;  %v7597_v32 = vadd.f32 0.001, %v1701_v59  ;;  %3093 = vperm.xlu1 %3987, %v7578_v60   ;;  %v7603_v29 = vpop.eup %4109 }
 0x33f   : > { %4111 = vrsqrt.f32 %v7550_v51  ;;  %9335 = vst [vmem:[#allocation130_spill] sm:$0xff] %v7601_v20  ;;  %vm2301_vm8 = vweird.f32 %v7244_v16  ;;  %v2368_v19 = vmul.f32 0.5, %v2367_v2  ;;  %v1708_v1 = vmax.f32 %v1636_v35, 0.0  ;;  %v7622_v35 = vpop.permute.xlu2 %2953 }
 0x340   : > { %v2270_v53 = vmul.f32 %v7188_v38, %v9334_v62  ;;  %v1495_v46 = vmul.f32 0.020408163, %v9336_v43  ;;  %v7607_v56 = vmul.f32 %v2557_v11, %v2314_v39  ;;  %v9339_v62 = vld [vmem:[#allocation131_spill] sm:$0xff]  ;;  %v7619_v60 = vmul.f32 %v2552_v15, %v2264_v63  ;;  %9340 = vst [vmem:[#allocation99_spill] sm:$0xff] %v7622_v35  ;;  %v9341_v11 = vld [vmem:[#allocation13_spill] sm:$0xff]  ;;  %vm7700_vm2 = vmor %vm2301_vm8, %vm2302_vm5 }
 0x341   : > { %v1632_v20 = vsub.f32 %v1488_v10, %v9339_v62  ;;  %v2340_v2 = vmul.f32 %v7398_v52, %v2339_v3  ;;  %vm2322_vm10 = vweird.f32 %v7327_v57  ;;  %v7625_v39 = vadd.f32 0.001, %v1703_v26  ;;  %v7636_v3 = vpop.permute.xlu0 %2948 }
 0x342   : > { %v1634_v6 = vsub.f32 %v1490_v47, %v9341_v11  ;;  %3128 = vperm.xlu0 %3986, %v7607_v56   ;;  %v2274_v43 = vsel %vm7613_vm7, %v7188_v38, %v2270_v53  ;;  %v9342_v15 = vsub.f32 1.5, %v7357_v33  ;;  %9343 = vst [vmem:[#allocation129_spill] sm:$0xff] %v7636_v3  ;;  %v7638_v63 = vmul.f32 0.5, %v2327_v41  ;;  %3103 = vperm.xlu2 %3988, %v7619_v60   ;;  %v9346_v53 = vld [vmem:[#allocation136_spill] sm:$0xff]  ;;  %v9349_v11 = vld [vmem:[#allocation111_spill] sm:$0xff]  ;;  %v2555_v3 = vld [vmem:[%s5997_s3 + $0x190] sm:$0xff] }
 0x343   : > { %v2377_v26 = vmul.f32 %v7534_v22, %v2376_v34  ;;  %v2356_v47 = vmul.f32 %v7603_v29, %v7485_v37  ;;  %v2397_v62 = vmul.f32 %v7553_v12, %v2396_v58  ;;  %vm2321_vm11 = vweird.f32 %v7222_v7 }
 0x344   : > { %v2290_v10 = vmul.f32 %v7169_v44, %v9342_v15  ;;  %v2369_v33 = vsub.f32 1.5, %v2368_v19  ;;  %4113 = vrsqrt.f32 %v7597_v32  ;;  %v7655_v41 = vadd.f32 0.001, %v1708_v1  ;;  %vm7755_vm5 = vmor %vm2321_vm11, %vm2322_vm10 }
 0x345   : > { %v1639_v34 = vsub.f32 %v1495_v46, %v9346_v53  ;;  %v7658_v58 = vpop.eup %4111  ;;  %v1704_v59 = vmax.f32 %v1632_v20, 0.0  ;;  %v1491_v15 = vmul.f32 0.020408163, %v9349_v11  ;;  %v7669_v19 = vmul.f32 %v2553_v25, %v2274_v43  ;;  %v2560_v46 = vld [vmem:[%s5997_s3 + $0x1b8] sm:$0xff] }
 0x346   : > { %v2344_v1 = vsel %vm7650_vm12, %v7398_v52, %v2340_v2  ;;  %vm2332_vm13 = vweird.f32 %v7459_v21  ;;  %4115 = vrsqrt.f32 %v7625_v39  ;;  %v1706_v53 = vmax.f32 %v1634_v6, 0.0  ;;  %v9351_v2 = vld [vmem:[#allocation107_spill] sm:$0xff] }
 0x347   : > { %v2294_v31 = vsel %vm7664_vm14, %v7169_v44, %v2290_v10  ;;  %v9350_v20 = vsub.f32 1.5, %v7505_v0  ;;  %vm2372_vm15 = vweird.f32 %v7474_v4  ;;  %v2357_v43 = vmul.f32 %v7603_v29, %v2356_v47  ;;  %3108 = vperm.xlu1 %3987, %v7669_v19  }
 0x348   : > { %v7686_v52 = vmul.f32 0.5, %v2397_v62  ;;  %v1493_v38 = vmul.f32 0.020408163, %v9351_v2  ;;  %vm2331_vm1 = vweird.f32 %v7345_v14  ;;  %v2426_v44 = vmul.f32 %v7658_v58, %v7550_v51  ;;  %v9354_v62 = vld [vmem:[#allocation132_spill] sm:$0xff]  ;;  %v7710_v2 = vpop.permute.xlu1 %2928 }
 0x349   : > { %v2300_v25 = vmul.f32 %v7366_v24, %v9350_v20  ;;  %4117 = vrsqrt.f32 %v7655_v41  ;;  %v1711_v0 = vmax.f32 %v1639_v34, 0.0  ;;  %v7694_v6 = vmul.f32 %v2560_v46, %v2344_v1  ;;  %9355 = vst [vmem:[#allocation126_spill] sm:$0xff] %v7710_v2  ;;  %v2558_v2 = vld [vmem:[%s5997_s3 + $0x1a8] sm:$0xff]  ;;  %vm7790_vm10 = vmor %vm2331_vm1, %vm2332_vm13 }
 0x34a   : > { %v7704_v47 = vadd.f32 0.001, %v1704_v59  ;;  %v1635_v18 = vsub.f32 %v1491_v15, %v9354_v62  ;;  %v7707_v11 = vmul.f32 %v2555_v3, %v2294_v31  ;;  %v2370_v20 = vmul.f32 %v7474_v4, %v2369_v33  ;;  %v7712_v34 = vpop.eup %4113  ;;  %v2556_v3 = vld [vmem:[%s5997_s3 + $0x198] sm:$0xff]  ;;  %v7733_v62 = vpop.permute.xlu2 %2968 }
 0x34b   : > { %vm2352_vm9 = vweird.f32 %v7411_v45  ;;  %v2329_v16 = vsub.f32 1.5, %v7638_v63  ;;  %v7716_v1 = vadd.f32 0.001, %v1706_v53  ;;  %3143 = vperm.xlu0 %3986, %v7694_v6   ;;  %v2304_v59 = vsel %vm7700_vm2, %v7366_v24, %v2300_v25  ;;  %v9357_v63 = vld [vmem:[#allocation23_spill] sm:$0xff]  ;;  %9358 = vst [vmem:[#allocation14_spill] sm:$0xff] %v7733_v62  ;;  %v9361_v25 = vld [vmem:[#allocation140_spill] sm:$0xff] }
 0x34c   : > { %v9356_v15 = vsub.f32 1.5, %v7470_v48  ;;  %v7726_v46 = vmul.f32 0.5, %v2377_v26  ;;  %vm2371_vm3 = vweird.f32 %v7361_v54  ;;  %v7729_v31 = vmul.f32 0.5, %v2357_v43  ;;  %3118 = vperm.xlu2 %3988, %v7707_v11   ;;  %v7735_v10 = vpop.eup %4115 }
 0x34d   : > { %v1637_v53 = vsub.f32 %v1493_v38, %v9357_v63  ;;  %vm2351_vm6 = vweird.f32 %v7285_v61  ;;  %vm7740_vm4 = vmor %vm2371_vm3, %vm2372_vm15  ;;  %v2399_v54 = vsub.f32 1.5, %v7686_v52  ;;  %v2427_v48 = vmul.f32 %v7658_v58, %v2426_v44  ;;  %v7749_v38 = vpop.permute.xlu0 %2963 }
 0x34e   : > { %v2320_v33 = vmul.f32 %v7327_v57, %v9356_v15  ;;  %v7746_v26 = vadd.f32 0.001, %v1711_v0  ;;  %v1494_v43 = vmul.f32 0.020408163, %v9361_v25  ;;  %9362 = vst [vmem:[#allocation68_spill] sm:$0xff] %v7749_v38  ;;  %4119 = vrsqrt.f32 %v7704_v47  ;;  %v2563_v0 = vld [vmem:[%s5997_s3 + $0x1d0] sm:$0xff]  ;;  %vm7835_vm13 = vmor %vm2351_vm6, %vm2352_vm9 }
 0x34f   : > { %v1707_v63 = vmax.f32 %v1635_v18, 0.0  ;;  %v7760_v52 = vmul.f32 %v2556_v3, %v2304_v59  ;;  %v2374_v44 = vsel %vm7740_vm4, %v7474_v4, %v2370_v20  ;;  %v7766_v25 = vpop.eup %4117  ;;  %v2386_v38 = vmul.f32 %v7712_v34, %v7597_v32  ;;  %v9365_v20 = vld [vmem:[#allocation112_spill] sm:$0xff] }
 0x350   : > { %4121 = vrsqrt.f32 %v7716_v1  ;;  %v2324_v7 = vsel %vm7755_vm5, %v7327_v57, %v2320_v33  ;;  %v2330_v18 = vmul.f32 %v7459_v21, %v2329_v16  ;;  %v2406_v59 = vmul.f32 %v7735_v10, %v7625_v39  ;;  %v9366_v57 = vld [vmem:[#allocation19_spill] sm:$0xff] }
 0x351   : > { %vm2402_vm8 = vweird.f32 %v7553_v12  ;;  %v1709_v4 = vmax.f32 %v1637_v53, 0.0  ;;  %v1496_v3 = vmul.f32 0.020408163, %v9365_v20  ;;  %3123 = vperm.xlu1 %3987, %v7760_v52   ;;  %vm2361_vm7 = vweird.f32 %v7485_v37 }
 0x352   : > { %v2428_v24 = vmul.f32 0.5, %v2427_v48  ;;  %4123 = vrsqrt.f32 %v7746_v26  ;;  %v1638_v33 = vsub.f32 %v1494_v43, %v9366_v57  ;;  %v7784_v15 = vmul.f32 %v2563_v0, %v2374_v44  ;;  %v2559_v0 = vld [vmem:[%s5997_s3 + $0x1b0] sm:$0xff] }
 0x353   : > { %v2456_v53 = vmul.f32 %v7766_v25, %v7655_v41  ;;  %v7796_v20 = vadd.f32 0.001, %v1707_v63  ;;  %v7798_v48 = vmul.f32 %v2558_v2, %v2324_v7  ;;  %v2400_v62 = vmul.f32 %v7553_v12, %v2399_v54  ;;  %v7819_v54 = vpop.permute.xlu1 %2943 }
 0x354   : > { %v2359_v43 = vsub.f32 1.5, %v7729_v31  ;;  %v2387_v44 = vmul.f32 %v7712_v34, %v2386_v38  ;;  %3158 = vperm.xlu0 %3986, %v7784_v15   ;;  %v2334_v14 = vsel %vm7790_vm10, %v7459_v21, %v2330_v18  ;;  %v9369_v57 = vsub.f32 1.5, %v7564_v30  ;;  %v7811_v35 = vpop.eup %4119  ;;  %9370 = vst [vmem:[#allocation38_spill] sm:$0xff] %v7819_v54  ;;  %v9373_v18 = vld [vmem:[#allocation133_spill] sm:$0xff]  ;;  %v2561_v54 = vld [vmem:[%s5997_s3 + $0x1c0] sm:$0xff] }
 0x355   : > { %vm2362_vm11 = vweird.f32 %v7603_v29  ;;  %v2407_v2 = vmul.f32 %v7735_v10, %v2406_v59  ;;  %vm2401_vm12 = vweird.f32 %v7442_v9  ;;  %v7816_v31 = vadd.f32 0.001, %v1709_v4  ;;  %3133 = vperm.xlu2 %3988, %v7798_v48  }
 0x356   : > { %v2350_v63 = vmul.f32 %v7411_v45, %v9369_v57  ;;  %v7821_v21 = vpop.eup %4121  ;;  %v2379_v30 = vsub.f32 1.5, %v7726_v46  ;;  %vm7826_vm14 = vmor %vm2401_vm12, %vm2402_vm8  ;;  %v2429_v7 = vsub.f32 1.5, %v2428_v24  ;;  %v1640_v9 = vsub.f32 %v1496_v3, %v9373_v18  ;;  %v2566_v3 = vld [vmem:[%s5997_s3 + $0x1e8] sm:$0xff] }
 0x357   : > { %v1710_v59 = vmax.f32 %v1638_v33, 0.0  ;;  %v2457_v46 = vmul.f32 %v7766_v25, %v2456_v53  ;;  %4125 = vrsqrt.f32 %v7796_v20  ;;  %v7841_v16 = vmul.f32 %v2559_v0, %v2334_v14  ;;  %v7847_v33 = vpop.permute.xlu2 %2983  ;;  %v7858_v0 = vpop.permute.xlu0 %2978  ;;  %vm7876_vm2 = vmor %vm2361_vm7, %vm2362_vm11 }
 0x358   : > { %v2404_v24 = vsel %vm7826_vm14, %v7553_v12, %v2400_v62  ;;  %9376 = vst [vmem:[#allocation131_spill] sm:$0xff] %v7847_v33  ;;  %v7849_v57 = vpop.eup %4123  ;;  %v2388_v61 = vmul.f32 0.5, %v2387_v44  ;;  %v2416_v18 = vmul.f32 %v7811_v35, %v7704_v47  ;;  %v2354_v53 = vsel %vm7835_vm13, %v7411_v45, %v2350_v63 }
 0x359   : > { %v2360_v14 = vmul.f32 %v7603_v29, %v2359_v43  ;;  %9377 = vst [vmem:[#allocation13_spill] sm:$0xff] %v7858_v0  ;;  %vm2382_vm15 = vweird.f32 %v7534_v22  ;;  %v7861_v12 = vmul.f32 0.5, %v2407_v2  ;;  %v2436_v62 = vmul.f32 %v7821_v21, %v7716_v1  ;;  %3138 = vperm.xlu1 %3987, %v7841_v16  }
 0x35a   : > { %4127 = vrsqrt.f32 %v7816_v31  ;;  %vm2432_vm1 = vweird.f32 %v7658_v58  ;;  %v1712_v45 = vmax.f32 %v1640_v9, 0.0  ;;  %v7868_v44 = vadd.f32 0.001, %v1710_v59 }
 0x35b   : > { %v7870_v43 = vmul.f32 %v2566_v3, %v2404_v24  ;;  %v2458_v2 = vmul.f32 0.5, %v2457_v46  ;;  %v2486_v38 = vmul.f32 %v7849_v57, %v7746_v26  ;;  %v7882_v4 = vmul.f32 %v2561_v54, %v2354_v53  ;;  %v2562_v3 = vld [vmem:[%s5997_s3 + $0x1c8] sm:$0xff] }
 0x35c   : > { %v2430_v9 = vmul.f32 %v7658_v58, %v2429_v7  ;;  %v2389_v59 = vsub.f32 1.5, %v2388_v61  ;;  %v2417_v24 = vmul.f32 %v7811_v35, %v2416_v18  ;;  %v2364_v37 = vsel %vm7876_vm2, %v7603_v29, %v2360_v14 }
 0x35d   : > { %3173 = vperm.xlu0 %3986, %v7870_v43   ;;  %v2380_v0 = vmul.f32 %v7534_v22, %v2379_v30  ;;  %v7892_v46 = vpop.eup %4125  ;;  %vm2381_vm9 = vweird.f32 %v7421_v40  ;;  %vm2392_vm3 = vweird.f32 %v7712_v34  ;;  %vm2431_vm6 = vweird.f32 %v7550_v51  ;;  %3148 = vperm.xlu2 %3988, %v7882_v4  }
 0x35e   : > { %v2409_v54 = vsub.f32 1.5, %v7861_v12  ;;  %v2437_v7 = vmul.f32 %v7821_v21, %v2436_v62  ;;  %vm7902_vm4 = vmor %vm2431_vm6, %vm2432_vm1  ;;  %v7906_v30 = vadd.f32 0.001, %v1712_v45  ;;  %4129 = vrsqrt.f32 %v7868_v44  ;;  %v2569_v12 = vld [vmem:[%s5997_s3 + $0x200] sm:$0xff]  ;;  %v7924_v62 = vpop.permute.xlu1 %2958 }
 0x35f   : > { %vm7913_vm5 = vmor %vm2381_vm9, %vm2382_vm15  ;;  %v2459_v61 = vsub.f32 1.5, %v2458_v2  ;;  %v2487_v18 = vmul.f32 %v7849_v57, %v2486_v38  ;;  %v7918_v53 = vmul.f32 %v2562_v3, %v2364_v37  ;;  %v2434_v14 = vsel %vm7902_vm4, %v7658_v58, %v2430_v9  ;;  %v2564_v2 = vld [vmem:[%s5997_s3 + $0x1d8] sm:$0xff]  ;;  %v7936_v58 = vpop.permute.xlu2 %2998 }
 0x360   : > { %v7909_v40 = vpop.eup %4127  ;;  %v2418_v45 = vmul.f32 0.5, %v2417_v24  ;;  %v2446_v63 = vmul.f32 %v7892_v46, %v7796_v20  ;;  %v2384_v33 = vsel %vm7913_vm5, %v7534_v22, %v2380_v0  ;;  %v2390_v38 = vmul.f32 %v7712_v34, %v2389_v59  ;;  %v7943_v22 = vpop.permute.xlu0 %2993 }
 0x361   : > { %vm2412_vm8 = vweird.f32 %v7735_v10  ;;  %vm2391_vm7 = vweird.f32 %v7597_v32  ;;  %3153 = vperm.xlu1 %3987, %v7918_v53   ;;  %v2438_v9 = vmul.f32 0.5, %v2437_v7  ;;  %v2466_v24 = vmul.f32 %v7909_v40, %v7816_v31  ;;  %9384 = vst [vmem:[#allocation136_spill] sm:$0xff] %v7943_v22 }
 0x362   : > { %4131 = vrsqrt.f32 %v7906_v30  ;;  %v7941_v37 = vmul.f32 %v2569_v12, %v2434_v14  ;;  %vm7947_vm10 = vmor %vm2391_vm7, %vm2392_vm3  ;;  %vm2462_vm11 = vweird.f32 %v7766_v25  ;;  %v2488_v32 = vmul.f32 0.5, %v2487_v18  ;;  %v2565_v12 = vld [vmem:[%s5997_s3 + $0x1e0] sm:$0xff]  ;;  %v2568_v18 = vld [vmem:[%s5997_s3 + $0x1f8] sm:$0xff] }
 0x363   : > { %v7952_v59 = vmul.f32 %v2564_v2, %v2384_v33  ;;  %v2460_v3 = vmul.f32 %v7766_v25, %v2459_v61  ;;  %v2419_v29 = vsub.f32 1.5, %v2418_v45  ;;  %v2447_v51 = vmul.f32 %v7892_v46, %v2446_v63  ;;  %v2572_v45 = vld [vmem:[%s5997_s3 + $0x218] sm:$0xff] }
 0x364   : > { %v7955_v7 = vpop.eup %4129  ;;  %v2394_v14 = vsel %vm7947_vm10, %v7712_v34, %v2390_v38  ;;  %v2410_v22 = vmul.f32 %v7735_v10, %v2409_v54  ;;  %vm2461_vm12 = vweird.f32 %v7655_v41  ;;  %vm2411_vm14 = vweird.f32 %v7625_v39 }
 0x365   : > { %3188 = vperm.xlu0 %3986, %v7941_v37   ;;  %3163 = vperm.xlu2 %3988, %v7952_v59   ;;  %v2439_v33 = vsub.f32 1.5, %v2438_v9  ;;  %v2467_v61 = vmul.f32 %v7909_v40, %v2466_v24  ;;  %vm7970_vm13 = vmor %vm2461_vm12, %vm2462_vm11  ;;  %vm2422_vm1 = vweird.f32 %v7811_v35  ;;  %v2489_v41 = vsub.f32 1.5, %v2488_v32  ;;  %v2567_v24 = vld [vmem:[%s5997_s3 + $0x1f0] sm:$0xff] }
 0x366   : > { %vm7976_vm15 = vmor %vm2411_vm14, %vm2412_vm8  ;;  %v7981_v54 = vmul.f32 %v2565_v12, %v2394_v14  ;;  %v2464_v39 = vsel %vm7970_vm13, %v7766_v25, %v2460_v3  ;;  %v2448_v2 = vmul.f32 0.5, %v2447_v51  ;;  %v2476_v38 = vmul.f32 %v7955_v7, %v7868_v44  ;;  %v7997_v32 = vpop.permute.xlu1 %2973 }
 0x367   : > { %v2414_v9 = vsel %vm7976_vm15, %v7735_v10, %v2410_v22  ;;  %v2420_v0 = vmul.f32 %v7811_v35, %v2419_v29  ;;  %vm2442_vm2 = vweird.f32 %v7821_v21  ;;  %vm2421_vm9 = vweird.f32 %v7704_v47  ;;  %v8015_v14 = vpop.permute.xlu2 %3013 }
 0x368   : > { %v7987_v63 = vpop.eup %4131  ;;  %v2468_v25 = vmul.f32 0.5, %v2467_v61  ;;  %v8001_v3 = vmul.f32 %v2572_v45, %v2464_v39  ;;  %vm8005_vm3 = vmor %vm2421_vm9, %vm2422_vm1  ;;  %vm2492_vm6 = vweird.f32 %v7849_v57  ;;  %v8012_v22 = vmul.f32 %v2567_v24, %v2414_v9  ;;  %v8023_v34 = vpop.permute.xlu0 %3008  ;;  %v2570_v9 = vld [vmem:[%s5997_s3 + $0x208] sm:$0xff] }
 0x369   : > { %3168 = vperm.xlu1 %3987, %v7981_v54   ;;  %v2496_v10 = vmul.f32 %v7987_v63, %v7906_v30  ;;  %v2490_v29 = vmul.f32 %v7849_v57, %v2489_v41  ;;  %v2449_v47 = vsub.f32 1.5, %v2448_v2  ;;  %v2477_v12 = vmul.f32 %v7955_v7, %v2476_v38  ;;  %v2575_v2 = vld [vmem:[%s5997_s3 + $0x230] sm:$0xff] }
 0x36a   : > { %v2424_v61 = vsel %vm8005_vm3, %v7811_v35, %v2420_v0  ;;  %v2440_v39 = vmul.f32 %v7821_v21, %v2439_v33  ;;  %vm2491_vm4 = vweird.f32 %v7746_v26  ;;  %vm2441_vm5 = vweird.f32 %v7716_v1 }
 0x36b   : > { %vm2493_vm8 = vmor %vm2491_vm4, %vm2492_vm6  ;;  %v2469_v35 = vsub.f32 1.5, %v2468_v25  ;;  %vm2452_vm10 = vweird.f32 %v7892_v46  ;;  %v8036_v45 = vmul.f32 %v2568_v18, %v2424_v61  ;;  %v2497_v26 = vmul.f32 %v7987_v63, %v2496_v10  ;;  %v9397_v61 = vld [vmem:[#allocation7_spill] sm:$0xff]  ;;  %v9398_v18 = vld [vmem:[#allocation26_spill] sm:$0xff] }
 0x36c   : > { %vm8031_vm7 = vmor %vm2441_vm5, %vm2442_vm2  ;;  %v2494_v33 = vsel %vm2493_vm8, %v7849_v57, %v2490_v29  ;;  %v2478_v38 = vmul.f32 0.5, %v2477_v12  ;;  %v2450_v24 = vmul.f32 %v7892_v46, %v2449_v47  ;;  %vm2451_vm11 = vweird.f32 %v7796_v20  ;;  %v2571_v29 = vld [vmem:[%s5997_s3 + $0x210] sm:$0xff] }
 0x36d   : > { %3203 = vperm.xlu0 %3986, %v8001_v3   ;;  %3178 = vperm.xlu2 %3988, %v8012_v22   ;;  %v2444_v1 = vsel %vm8031_vm7, %v7821_v21, %v2440_v39  ;;  %v8048_v0 = vmul.f32 %v2575_v2, %v2494_v33  ;;  %vm2472_vm12 = vweird.f32 %v7909_v40  ;;  %vm8051_vm14 = vmor %vm2451_vm11, %vm2452_vm10  ;;  %v2498_v21 = vmul.f32 0.5, %v2497_v26  ;;  %v2573_v26 = vld [vmem:[%s5997_s3 + $0x220] sm:$0xff] }
 0x36e   : > { %v8055_v25 = vmul.f32 %v2570_v9, %v2444_v1  ;;  %v8057_v51 = vpop.permute.xlu1 %2988  ;;  %v2479_v10 = vsub.f32 1.5, %v2478_v38  ;;  %v2454_v20 = vsel %vm8051_vm14, %v7892_v46, %v2450_v24  ;;  %v2470_v47 = vmul.f32 %v7909_v40, %v2469_v35  ;;  %v3885_v46 = vld [vmem:[%s5997_s3 + $0x248] sm:$0xff] }
 0x36f   : > { %v8066_v12 = vpop.permute.xlu2 %3028  ;;  %v2723_v39 = vmul.f32 %v9398_v18, %v9397_v61  ;;  %vm2471_vm13 = vweird.f32 %v7816_v31  ;;  %v8075_v33 = vmul.f32 %v2571_v29, %v2454_v20  ;;  %v2499_v2 = vsub.f32 1.5, %v2498_v21  ;;  %v2574_v24 = vld [vmem:[%s5997_s3 + $0x228] sm:$0xff]  ;;  %v9401_v21 = vld [vmem:[#allocation69_spill] sm:$0xff]  ;;  %v3888_v29 = vld [vmem:[%s5997_s3 + $0x260] sm:$0xff] }
 0x370   : > { %v8071_v41 = vpop.permute.xlu0 %3023  ;;  %vm2473_vm15 = vmor %vm2471_vm13, %vm2472_vm12  ;;  %vm2482_vm1 = vweird.f32 %v7955_v7  ;;  %v2480_v38 = vmul.f32 %v7955_v7, %v2479_v10  ;;  %vm2481_vm2 = vweird.f32 %v7868_v44  ;;  %vm2502_vm3 = vweird.f32 %v7987_v63  ;;  %v9400_v44 = vld [vmem:[#allocation29_spill] sm:$0xff]  ;;  %v2576_v18 = vld [vmem:[%s5997_s3 + $0x238] sm:$0xff] }
 0x371   : > { %3183 = vperm.xlu1 %3987, %v8036_v45   ;;  %v2474_v35 = vsel %vm2473_vm15, %v7909_v40, %v2470_v47  ;;  %v2795_v31 = vsub.f32 %v3885_v46, %v2723_v39  ;;  %vm2483_vm9 = vmor %vm2481_vm2, %vm2482_vm1  ;;  %v2500_v40 = vmul.f32 %v7987_v63, %v2499_v2  ;;  %vm2501_vm6 = vweird.f32 %v7906_v30  ;;  %v9403_v30 = vld [vmem:[#allocation4_spill] sm:$0xff]  ;;  %v9404_v46 = vld [vmem:[#allocation66_spill] sm:$0xff] }
 0x372   : > { %v8084_v1 = vmul.f32 %v2573_v26, %v2474_v35  ;;  %v2484_v9 = vsel %vm2483_vm9, %v7955_v7, %v2480_v38  ;;  %v2726_v10 = vmul.f32 %v9401_v21, %v9400_v44  ;;  %vm2503_vm4 = vmor %vm2501_vm6, %vm2502_vm3  ;;  %v2722_v2 = vmul.f32 %v9404_v46, %v9403_v30  ;;  %v3884_v26 = vld [vmem:[%s5997_s3 + $0x240] sm:$0xff]  ;;  %v9405_v38 = vld [vmem:[#allocation32_spill] sm:$0xff] }
 0x373   : > { %v8096_v20 = vmul.f32 %v2574_v24, %v2484_v9  ;;  %v2504_v61 = vsel %vm2503_vm4, %v7987_v63, %v2500_v40  ;;  %v9407_v24 = vld [vmem:[#allocation3_spill] sm:$0xff]  ;;  %v9408_v44 = vld [vmem:[#allocation25_spill] sm:$0xff]  ;;  %v9412_v46 = vld [vmem:[#allocation6_spill] sm:$0xff] }
 0x374   : > { %v2798_v39 = vsub.f32 %v3888_v29, %v2726_v10  ;;  %v8108_v35 = vmul.f32 %v2576_v18, %v2504_v61  ;;  %v2724_v63 = vmul.f32 %v9408_v44, %v9407_v24  ;;  %v2794_v40 = vsub.f32 %v3884_v26, %v2722_v2  ;;  %v3891_v10 = vld [vmem:[%s5997_s3 + $0x278] sm:$0xff]  ;;  %v3886_v61 = vld [vmem:[%s5997_s3 + $0x250] sm:$0xff]  ;;  %v9414_v2 = vld [vmem:[#allocation15_spill] sm:$0xff] }
 0x375   : > { %3218 = vperm.xlu0 %3986, %v8048_v0   ;;  %3193 = vperm.xlu2 %3988, %v8055_v25   ;;  %v9415_v26 = vld [vmem:[#allocation72_spill] sm:$0xff] }
 0x376   : > { %v8091_v57 = vpop.permute.xlu1 %3003  ;;  %v2796_v30 = vsub.f32 %v3886_v61, %v2724_v63  ;;  %v2732_v24 = vmul.f32 %v9415_v26, %v9414_v2  ;;  %v3889_v63 = vld [vmem:[%s5997_s3 + $0x268] sm:$0xff]  ;;  %v9422_v2 = vld [vmem:[#allocation21_spill] sm:$0xff] }
 0x377   : > { %9399 = vst [vmem:[#allocation111_spill] sm:$0xff] %v8091_v57  ;;  %v8099_v47 = vpop.permute.xlu2 %3043  ;;  %v9417_v57 = vld [vmem:[#allocation65_spill] sm:$0xff] }
 0x378   : > { %v8101_v7 = vpop.permute.xlu0 %3038 }
 0x379   : > { %3198 = vperm.xlu1 %3987, %v8075_v33   ;;  %9402 = vst [vmem:[#allocation107_spill] sm:$0xff] %v8101_v7  ;;  %v9413_v7 = vld [vmem:[#allocation10_spill] sm:$0xff] }
 0x37d   : > { %3305 = vperm.xlu0 %3986, %v2795_v31   ;;  %3208 = vperm.xlu2 %3988, %v8084_v1   ;;  %v9406_v31 = vld [vmem:[#allocation67_spill] sm:$0xff] }
 0x37e   : > { %v2729_v9 = vmul.f32 %v9406_v31, %v9405_v38  ;;  %v8116_v21 = vpop.permute.xlu1 %3018  ;;  %v2725_v38 = vmul.f32 %v9413_v7, %v9412_v46  ;;  %v3887_v31 = vld [vmem:[%s5997_s3 + $0x258] sm:$0xff] }
 0x37f   : > { %9409 = vst [vmem:[#allocation132_spill] sm:$0xff] %v8116_v21  ;;  %v3894_v21 = vld [vmem:[%s5997_s3 + $0x290] sm:$0xff] }
 0x380   : > { %v2801_v18 = vsub.f32 %v3891_v10, %v2729_v9  ;;  %v2797_v44 = vsub.f32 %v3887_v31, %v2725_v38  ;;  %v2804_v7 = vsub.f32 %v3894_v21, %v2732_v24  ;;  %v3890_v31 = vld [vmem:[%s5997_s3 + $0x270] sm:$0xff]  ;;  %v3892_v24 = vld [vmem:[%s5997_s3 + $0x280] sm:$0xff] }
 0x381   : > { %3213 = vperm.xlu1 %3987, %v8096_v20   ;;  %v8119_v29 = vpop.permute.xlu2 %3058 }
 0x382   : > { %9410 = vst [vmem:[#allocation23_spill] sm:$0xff] %v8119_v29  ;;  %v9416_v29 = vld [vmem:[#allocation5_spill] sm:$0xff] }
 0x385   : > { %3320 = vperm.xlu0 %3986, %v2798_v39   ;;  %3223 = vperm.xlu2 %3988, %v8108_v35   ;;  %v8122_v39 = vpop.permute.xlu0 %3053 }
 0x386   : > { %9411 = vst [vmem:[#allocation140_spill] sm:$0xff] %v8122_v39  ;;  %v8135_v10 = vpop.permute.xlu1 %3033  ;;  %v9425_v39 = vld [vmem:[#allocation37_spill] sm:$0xff] }
 0x387   : > { %9419 = vst [vmem:[#allocation19_spill] sm:$0xff] %v8135_v10 }
 0x389   : > { %3300 = vperm.xlu1 %3987, %v2794_v40   ;;  %v2727_v40 = vmul.f32 %v9417_v57, %v9416_v29  ;;  %v9423_v57 = vld [vmem:[#allocation71_spill] sm:$0xff] }
 0x38a   : > { %v8132_v9 = vpop.permute.xlu2 %3073  ;;  %v2735_v29 = vmul.f32 %v9423_v57, %v9422_v2  ;;  %v9431_v2 = vld [vmem:[#allocation28_spill] sm:$0xff] }
 0x38b   : > { %9418 = vst [vmem:[#allocation112_spill] sm:$0xff] %v8132_v9  ;;  %v2799_v61 = vsub.f32 %v3889_v63, %v2727_v40  ;;  %v3897_v9 = vld [vmem:[%s5997_s3 + $0x2a8] sm:$0xff] }
 0x38c   : > { %v2807_v40 = vsub.f32 %v3897_v9, %v2735_v29  ;;  %v9434_v9 = vld [vmem:[#allocation82_spill] sm:$0xff] }
 0x38d   : > { %3335 = vperm.xlu0 %3986, %v2801_v18   ;;  %3310 = vperm.xlu2 %3988, %v2796_v30   ;;  %v9420_v18 = vld [vmem:[#allocation9_spill] sm:$0xff]  ;;  %v8139_v38 = vpop.permute.xlu0 %3068 }
 0x38e   : > { %v9421_v30 = vld [vmem:[#allocation73_spill] sm:$0xff] }
 0x38f   : > { %v2728_v46 = vmul.f32 %v9421_v30, %v9420_v18  ;;  %v9428_v18 = vld [vmem:[#allocation16_spill] sm:$0xff] }
 0x391   : > { %3315 = vperm.xlu1 %3987, %v2797_v44   ;;  %v2800_v26 = vsub.f32 %v3890_v31, %v2728_v46  ;;  %v9424_v44 = vld [vmem:[#allocation8_spill] sm:$0xff] }
 0x392   : > { %v2730_v10 = vmul.f32 %v9425_v39, %v9424_v44  ;;  %v3893_v46 = vld [vmem:[%s5997_s3 + $0x288] sm:$0xff]  ;;  %v9432_v39 = vld [vmem:[#allocation81_spill] sm:$0xff] }
 0x393   : > { %v8147_v21 = vpop.permute.xlu2 %3088  ;;  %v2738_v57 = vmul.f32 %v9432_v39, %v9431_v2  ;;  %v9440_v2 = vld [vmem:[#allocation34_spill] sm:$0xff]  ;;  %v9441_v39 = vld [vmem:[#allocation84_spill] sm:$0xff] }
 0x394   : > { %9426 = vst [vmem:[#allocation133_spill] sm:$0xff] %v8147_v21  ;;  %v3900_v21 = vld [vmem:[%s5997_s3 + $0x2c0] sm:$0xff] }
 0x395   : > { %3350 = vperm.xlu0 %3986, %v2804_v7   ;;  %3325 = vperm.xlu2 %3988, %v2799_v61   ;;  %v8150_v63 = vpop.permute.xlu1 %3048  ;;  %v2802_v7 = vsub.f32 %v3892_v24, %v2730_v10  ;;  %v9429_v61 = vld [vmem:[#allocation137_spill] sm:$0xff]  ;;  %v3895_v10 = vld [vmem:[%s5997_s3 + $0x298] sm:$0xff]  ;;  %v2810_v24 = vsub.f32 %v3900_v21, %v2738_v57 }
 0x396   : > { %9427 = vst [vmem:[#allocation7_spill] sm:$0xff] %v8150_v63  ;;  %v2731_v30 = vmul.f32 %v9429_v61, %v9428_v18  ;;  %v9437_v18 = vld [vmem:[#allocation24_spill] sm:$0xff]  ;;  %v9438_v61 = vld [vmem:[#allocation138_spill] sm:$0xff] }
 0x397   : > { %v9443_v21 = vld [vmem:[#allocation22_spill] sm:$0xff] }
 0x398   : > { %v8155_v31 = vpop.permute.xlu0 %3083  ;;  %v2803_v44 = vsub.f32 %v3893_v46, %v2731_v30  ;;  %v3896_v30 = vld [vmem:[%s5997_s3 + $0x2a0] sm:$0xff] }
 0x399   : > { %3330 = vperm.xlu1 %3987, %v2800_v26   ;;  %9430 = vst [vmem:[#allocation26_spill] sm:$0xff] %v8155_v31  ;;  %v9433_v26 = vld [vmem:[#allocation12_spill] sm:$0xff]  ;;  %v2734_v31 = vmul.f32 %v9438_v61, %v9437_v18  ;;  %v9446_v18 = vld [vmem:[#allocation30_spill] sm:$0xff] }
 0x39a   : > { %v2733_v29 = vmul.f32 %v9434_v9, %v9433_v26  ;;  %v2741_v26 = vmul.f32 %v9441_v39, %v9440_v2  ;;  %v9447_v61 = vld [vmem:[#allocation86_spill] sm:$0xff]  ;;  %v9449_v2 = vld [vmem:[#allocation40_spill] sm:$0xff]  ;;  %v9450_v39 = vld [vmem:[#allocation127_spill] sm:$0xff] }
 0x39b   : > { %v2806_v9 = vsub.f32 %v3896_v30, %v2734_v31  ;;  %v3899_v31 = vld [vmem:[%s5997_s3 + $0x2b8] sm:$0xff] }
 0x39c   : > { %v8162_v63 = vpop.permute.xlu2 %3103 }
 0x39d   : > { %3365 = vperm.xlu0 %3986, %v2807_v40   ;;  %3340 = vperm.xlu2 %3988, %v2802_v7   ;;  %9435 = vst [vmem:[#allocation29_spill] sm:$0xff] %v8162_v63  ;;  %v2805_v7 = vsub.f32 %v3895_v10, %v2733_v29  ;;  %v3903_v63 = vld [vmem:[%s5997_s3 + $0x2d8] sm:$0xff]  ;;  %v3898_v29 = vld [vmem:[%s5997_s3 + $0x2b0] sm:$0xff] }
 0x39e   : > { %v8165_v40 = vpop.permute.xlu1 %3063  ;;  %v2813_v10 = vsub.f32 %v3903_v63, %v2741_v26  ;;  %v9452_v63 = vld [vmem:[#allocation89_spill] sm:$0xff] }
 0x39f   : > { %9436 = vst [vmem:[#allocation69_spill] sm:$0xff] %v8165_v40 }
 0x3a1   : > { %3345 = vperm.xlu1 %3987, %v2803_v44   ;;  %v8170_v46 = vpop.permute.xlu0 %3098  ;;  %v9442_v44 = vld [vmem:[#allocation18_spill] sm:$0xff] }
 0x3a2   : > { %9439 = vst [vmem:[#allocation4_spill] sm:$0xff] %v8170_v46  ;;  %v2736_v57 = vmul.f32 %v9443_v21, %v9442_v44  ;;  %v2737_v46 = vmul.f32 %v9447_v61, %v9446_v18  ;;  %v2744_v44 = vmul.f32 %v9450_v39, %v9449_v2  ;;  %v9455_v18 = vld [vmem:[#allocation36_spill] sm:$0xff]  ;;  %v9456_v61 = vld [vmem:[#allocation134_spill] sm:$0xff]  ;;  %v9458_v2 = vld [vmem:[#allocation45_spill] sm:$0xff] }
 0x3a3   : > { %v9459_v39 = vld [vmem:[#allocation35_spill] sm:$0xff] }
 0x3a4   : > { %v2809_v21 = vsub.f32 %v3899_v31, %v2737_v46  ;;  %v3902_v46 = vld [vmem:[%s5997_s3 + $0x2d0] sm:$0xff] }
 0x3a5   : > { %3380 = vperm.xlu0 %3986, %v2810_v24   ;;  %3355 = vperm.xlu2 %3988, %v2805_v7   ;;  %v2808_v7 = vsub.f32 %v3898_v29, %v2736_v57  ;;  %v3901_v57 = vld [vmem:[%s5997_s3 + $0x2c8] sm:$0xff] }
 0x3a6   : > { %v8177_v40 = vpop.permute.xlu2 %3118 }
 0x3a7   : > { %9444 = vst [vmem:[#allocation66_spill] sm:$0xff] %v8177_v40  ;;  %v8180_v24 = vpop.permute.xlu1 %3078  ;;  %v3906_v40 = vld [vmem:[%s5997_s3 + $0x2f0] sm:$0xff] }
 0x3a8   : > { %9445 = vst [vmem:[#allocation32_spill] sm:$0xff] %v8180_v24  ;;  %v2816_v29 = vsub.f32 %v3906_v40, %v2744_v44  ;;  %v9461_v40 = vld [vmem:[#allocation96_spill] sm:$0xff] }
 0x3a9   : > { %3360 = vperm.xlu1 %3987, %v2806_v9   ;;  %v9451_v9 = vld [vmem:[#allocation27_spill] sm:$0xff] }
 0x3aa   : > { %v2739_v26 = vmul.f32 %v9452_v63, %v9451_v9  ;;  %v2747_v9 = vmul.f32 %v9459_v39, %v9458_v2  ;;  %v9467_v2 = vld [vmem:[#allocation75_spill] sm:$0xff] }
 0x3ab   : > { %v8185_v30 = vpop.permute.xlu0 %3113  ;;  %v9468_v39 = vld [vmem:[#allocation103_spill] sm:$0xff] }
 0x3ac   : > { %9448 = vst [vmem:[#allocation67_spill] sm:$0xff] %v8185_v30  ;;  %v2740_v30 = vmul.f32 %v9456_v61, %v9455_v18  ;;  %v9464_v18 = vld [vmem:[#allocation42_spill] sm:$0xff] }
 0x3ad   : > { %3395 = vperm.xlu0 %3986, %v2813_v10   ;;  %3370 = vperm.xlu2 %3988, %v2808_v7   ;;  %v2811_v7 = vsub.f32 %v3901_v57, %v2739_v26  ;;  %v3904_v26 = vld [vmem:[%s5997_s3 + $0x2e0] sm:$0xff]  ;;  %v9465_v61 = vld [vmem:[#allocation102_spill] sm:$0xff] }
 0x3ae   : > { %v2812_v63 = vsub.f32 %v3902_v46, %v2740_v30  ;;  %v3905_v30 = vld [vmem:[%s5997_s3 + $0x2e8] sm:$0xff] }
 0x3af   : > { %v8192_v24 = vpop.permute.xlu2 %3133 }
 0x3b0   : > { %9453 = vst [vmem:[#allocation3_spill] sm:$0xff] %v8192_v24  ;;  %v8195_v10 = vpop.permute.xlu1 %3093  ;;  %v3909_v24 = vld [vmem:[%s5997_s3 + $0x308] sm:$0xff] }
 0x3b1   : > { %3375 = vperm.xlu1 %3987, %v2809_v21   ;;  %9454 = vst [vmem:[#allocation25_spill] sm:$0xff] %v8195_v10  ;;  %v9460_v21 = vld [vmem:[#allocation33_spill] sm:$0xff]  ;;  %v2819_v57 = vsub.f32 %v3909_v24, %v2747_v9 }
 0x3b2   : > { %v2742_v44 = vmul.f32 %v9461_v40, %v9460_v21  ;;  %v2750_v21 = vmul.f32 %v9468_v39, %v9467_v2  ;;  %v9470_v24 = vld [vmem:[#allocation41_spill] sm:$0xff]  ;;  %v9477_v39 = vld [vmem:[#allocation108_spill] sm:$0xff] }
 0x3b3   : > { %v9476_v2 = vld [vmem:[#allocation77_spill] sm:$0xff] }
 0x3b4   : > { %v8200_v31 = vpop.permute.xlu0 %3128 }
 0x3b5   : > { %3410 = vperm.xlu0 %3986, %v2816_v29   ;;  %3385 = vperm.xlu2 %3988, %v2811_v7   ;;  %9457 = vst [vmem:[#allocation6_spill] sm:$0xff] %v8200_v31  ;;  %v2814_v7 = vsub.f32 %v3904_v26, %v2742_v44  ;;  %v2743_v31 = vmul.f32 %v9465_v61, %v9464_v18  ;;  %v3907_v44 = vld [vmem:[%s5997_s3 + $0x2f8] sm:$0xff]  ;;  %v9473_v18 = vld [vmem:[#allocation47_spill] sm:$0xff]  ;;  %v9474_v61 = vld [vmem:[#allocation105_spill] sm:$0xff] }
 0x3b7   : > { %v8207_v10 = vpop.permute.xlu2 %3148  ;;  %v2815_v40 = vsub.f32 %v3905_v30, %v2743_v31  ;;  %v3908_v31 = vld [vmem:[%s5997_s3 + $0x300] sm:$0xff] }
 0x3b8   : > { %9462 = vst [vmem:[#allocation10_spill] sm:$0xff] %v8207_v10  ;;  %v3912_v10 = vld [vmem:[%s5997_s3 + $0x320] sm:$0xff] }
 0x3b9   : > { %3390 = vperm.xlu1 %3987, %v2812_v63   ;;  %v8210_v29 = vpop.permute.xlu1 %3108  ;;  %v9469_v63 = vld [vmem:[#allocation39_spill] sm:$0xff]  ;;  %v2822_v26 = vsub.f32 %v3912_v10, %v2750_v21  ;;  %v9479_v10 = vld [vmem:[#allocation109_spill] sm:$0xff] }
 0x3ba   : > { %9463 = vst [vmem:[#allocation15_spill] sm:$0xff] %v8210_v29  ;;  %v2745_v9 = vmul.f32 %v9470_v24, %v9469_v63  ;;  %v2753_v63 = vmul.f32 %v9477_v39, %v9476_v2  ;;  %v9485_v2 = vld [vmem:[#allocation80_spill] sm:$0xff]  ;;  %v9486_v39 = vld [vmem:[#allocation114_spill] sm:$0xff] }
 0x3bd   : > { %3425 = vperm.xlu0 %3986, %v2819_v57   ;;  %3400 = vperm.xlu2 %3988, %v2814_v7   ;;  %v8215_v46 = vpop.permute.xlu0 %3143  ;;  %v2817_v7 = vsub.f32 %v3907_v44, %v2745_v9  ;;  %v3910_v9 = vld [vmem:[%s5997_s3 + $0x310] sm:$0xff] }
 0x3be   : > { %9466 = vst [vmem:[#allocation72_spill] sm:$0xff] %v8215_v46  ;;  %v2746_v46 = vmul.f32 %v9474_v61, %v9473_v18  ;;  %v9482_v18 = vld [vmem:[#allocation48_spill] sm:$0xff]  ;;  %v9483_v61 = vld [vmem:[#allocation110_spill] sm:$0xff] }
 0x3bf   : > { %v8222_v29 = vpop.permute.xlu2 %3163 }
 0x3c0   : > { %9471 = vst [vmem:[#allocation5_spill] sm:$0xff] %v8222_v29  ;;  %v2818_v24 = vsub.f32 %v3908_v31, %v2746_v46  ;;  %v3915_v29 = vld [vmem:[%s5997_s3 + $0x338] sm:$0xff] }
 0x3c1   : > { %3405 = vperm.xlu1 %3987, %v2815_v40   ;;  %v9478_v40 = vld [vmem:[#allocation70_spill] sm:$0xff]  ;;  %v2825_v44 = vsub.f32 %v3915_v29, %v2753_v63  ;;  %v9488_v29 = vld [vmem:[#allocation44_spill] sm:$0xff] }
 0x3c2   : > { %v2748_v21 = vmul.f32 %v9479_v10, %v9478_v40  ;;  %v3911_v46 = vld [vmem:[%s5997_s3 + $0x318] sm:$0xff]  ;;  %v2756_v40 = vmul.f32 %v9486_v39, %v9485_v2  ;;  %v9494_v2 = vld [vmem:[#allocation87_spill] sm:$0xff]  ;;  %v9495_v39 = vld [vmem:[#allocation120_spill] sm:$0xff] }
 0x3c3   : > { %v8225_v57 = vpop.permute.xlu1 %3123 }
 0x3c4   : > { %9472 = vst [vmem:[#allocation65_spill] sm:$0xff] %v8225_v57 }
 0x3c5   : > { %3440 = vperm.xlu0 %3986, %v2822_v26   ;;  %3415 = vperm.xlu2 %3988, %v2817_v7   ;;  %v2820_v7 = vsub.f32 %v3910_v9, %v2748_v21  ;;  %v3913_v21 = vld [vmem:[%s5997_s3 + $0x328] sm:$0xff] }
 0x3c6   : > { %v8230_v30 = vpop.permute.xlu0 %3158 }
 0x3c7   : > { %9475 = vst [vmem:[#allocation9_spill] sm:$0xff] %v8230_v30  ;;  %v8237_v57 = vpop.permute.xlu2 %3178  ;;  %v2749_v30 = vmul.f32 %v9483_v61, %v9482_v18  ;;  %v9491_v18 = vld [vmem:[#allocation78_spill] sm:$0xff]  ;;  %v9492_v61 = vld [vmem:[#allocation31_spill] sm:$0xff] }
 0x3c8   : > { %9480 = vst [vmem:[#allocation73_spill] sm:$0xff] %v8237_v57  ;;  %v3918_v57 = vld [vmem:[%s5997_s3 + $0x350] sm:$0xff] }
 0x3c9   : > { %3420 = vperm.xlu1 %3987, %v2818_v24   ;;  %v2821_v10 = vsub.f32 %v3911_v46, %v2749_v30  ;;  %v9487_v24 = vld [vmem:[#allocation74_spill] sm:$0xff]  ;;  %v2828_v9 = vsub.f32 %v3918_v57, %v2756_v40  ;;  %v3914_v30 = vld [vmem:[%s5997_s3 + $0x330] sm:$0xff]  ;;  %v9497_v57 = vld [vmem:[#allocation119_spill] sm:$0xff] }
 0x3ca   : > { %v2751_v63 = vmul.f32 %v9488_v29, %v9487_v24  ;;  %v2759_v24 = vmul.f32 %v9495_v39, %v9494_v2  ;;  %v9501_v2 = vld [vmem:[#allocation93_spill] sm:$0xff]  ;;  %v9502_v39 = vld [vmem:[#allocation123_spill] sm:$0xff] }
 0x3cb   : > { %v8240_v26 = vpop.permute.xlu1 %3138 }
 0x3cc   : > { %9481 = vst [vmem:[#allocation21_spill] sm:$0xff] %v8240_v26 }
 0x3cd   : > { %3455 = vperm.xlu0 %3986, %v2825_v44   ;;  %3430 = vperm.xlu2 %3988, %v2820_v7   ;;  %v2823_v7 = vsub.f32 %v3913_v21, %v2751_v63  ;;  %v3916_v63 = vld [vmem:[%s5997_s3 + $0x340] sm:$0xff] }
 0x3cf   : > { %v8245_v31 = vpop.permute.xlu0 %3173  ;;  %v8252_v26 = vpop.permute.xlu2 %3193 }
 0x3d0   : > { %9484 = vst [vmem:[#allocation71_spill] sm:$0xff] %v8245_v31  ;;  %v2752_v31 = vmul.f32 %v9492_v61, %v9491_v18  ;;  %v9499_v18 = vld [vmem:[#allocation83_spill] sm:$0xff]  ;;  %v9500_v61 = vld [vmem:[#allocation92_spill] sm:$0xff] }
 0x3d1   : > { %9489 = vst [vmem:[#allocation8_spill] sm:$0xff] %v8252_v26  ;;  %3435 = vperm.xlu1 %3987, %v2821_v10   ;;  %v3921_v26 = vld [vmem:[%s5997_s3 + $0x368] sm:$0xff] }
 0x3d2   : > { %v2824_v29 = vsub.f32 %v3914_v30, %v2752_v31  ;;  %v9496_v10 = vld [vmem:[#allocation76_spill] sm:$0xff]  ;;  %v2831_v21 = vsub.f32 %v3921_v26, %v2759_v24 }
 0x3d3   : > { %v8255_v44 = vpop.permute.xlu1 %3153  ;;  %v2754_v40 = vmul.f32 %v9497_v57, %v9496_v10  ;;  %v3917_v31 = vld [vmem:[%s5997_s3 + $0x348] sm:$0xff]  ;;  %v2762_v10 = vmul.f32 %v9502_v39, %v9501_v2  ;;  %v9506_v2 = vld [vmem:[#allocation139_spill] sm:$0xff] }
 0x3d4   : > { %9490 = vst [vmem:[#allocation37_spill] sm:$0xff] %v8255_v44 }
 0x3d5   : > { %3470 = vperm.xlu0 %3986, %v2828_v9   ;;  %3445 = vperm.xlu2 %3988, %v2823_v7   ;;  %v2826_v7 = vsub.f32 %v3916_v63, %v2754_v40  ;;  %v3919_v40 = vld [vmem:[%s5997_s3 + $0x358] sm:$0xff] }
 0x3d7   : > { %v8260_v46 = vpop.permute.xlu0 %3188  ;;  %v8267_v44 = vpop.permute.xlu2 %3208 }
 0x3d8   : > { %9493 = vst [vmem:[#allocation16_spill] sm:$0xff] %v8260_v46  ;;  %v2755_v46 = vmul.f32 %v9500_v61, %v9499_v18  ;;  %v9505_v18 = vld [vmem:[#allocation90_spill] sm:$0xff] }
 0x3d9   : > { %9498 = vst [vmem:[#allocation137_spill] sm:$0xff] %v8267_v44  ;;  %3450 = vperm.xlu1 %3987, %v2824_v29   ;;  %v3924_v44 = vld [vmem:[%s5997_s3 + $0x380] sm:$0xff]  ;;  %v2758_v61 = vmul.f32 %v7287_v28, %v9505_v18 }
 0x3da   : > { %v2827_v57 = vsub.f32 %v3917_v31, %v2755_v46  ;;  %v9503_v29 = vld [vmem:[#allocation79_spill] sm:$0xff]  ;;  %v2834_v63 = vsub.f32 %v3924_v44, %v2762_v10  ;;  %v4133_v31 = vld [vmem:[%s4583_s28 + $0x10] sm:$0xff]  ;;  %v3927_v10 = vld [vmem:[%s5997_s3 + $0x398] sm:$0xff] }
 0x3db   : > { %v8270_v9 = vpop.permute.xlu1 %3168  ;;  %v2757_v26 = vmul.f32 %v7236_v23, %v9503_v29  ;;  %v3920_v46 = vld [vmem:[%s5997_s3 + $0x360] sm:$0xff]  ;;  %v3228_v23 = vmul.f32 %v4133_v31, %v9506_v2  ;;  %v9507_v29 = vld [vmem:[#allocation97_spill] sm:$0xff]  ;;  %v4135_v2 = vld [vmem:[%s4583_s28 + $0x28] sm:$0xff] }
 0x3dc   : > { %v2830_v44 = vsub.f32 %v3920_v46, %v2758_v61  ;;  %v3923_v61 = vld [vmem:[%s5997_s3 + $0x378] sm:$0xff]  ;;  %v4134_v46 = vld [vmem:[%s4583_s28 + $0x8] sm:$0xff] }
 0x3dd   : > { %3485 = vperm.xlu0 %3986, %v2831_v21   ;;  %3460 = vperm.xlu2 %3988, %v2826_v7   ;;  %v2829_v7 = vsub.f32 %v3919_v40, %v2757_v26  ;;  %v3922_v40 = vld [vmem:[%s5997_s3 + $0x370] sm:$0xff]  ;;  %v3227_v31 = vmul.f32 %v4134_v46, %v7240_v27  ;;  %v3925_v27 = vld [vmem:[%s5997_s3 + $0x388] sm:$0xff] }
 0x3de   : > { %v9513_v46 = vld [vmem:[#allocation124_spill] sm:$0xff] }
 0x3df   : > { %v8275_v30 = vpop.permute.xlu0 %3203  ;;  %v8282_v24 = vpop.permute.xlu2 %3223 }
 0x3e1   : > { %3465 = vperm.xlu1 %3987, %v2827_v57   ;;  %v2765_v57 = vmul.f32 %v7325_v49, %v9507_v29 }
 0x3e3   : > { %v8285_v21 = vpop.permute.xlu1 %3183 }
 0x3e4   : > { %9504 = vst [vmem:[#allocation28_spill] sm:$0xff] %v8285_v21  ;;  %v9508_v21 = vld [vmem:[#allocation85_spill] sm:$0xff] }
 0x3e5   : > { %3500 = vperm.xlu0 %3986, %v2834_v63   ;;  %3475 = vperm.xlu2 %3988, %v2829_v7   ;;  %v2760_v26 = vmul.f32 %v7339_v42, %v9508_v21  ;;  %v2837_v7 = vsub.f32 %v3927_v10, %v2765_v57  ;;  %v9509_v42 = vld [vmem:[#allocation94_spill] sm:$0xff]  ;;  %v9510_v57 = vld [vmem:[#allocation101_spill] sm:$0xff] }
 0x3e6   : > { %v2761_v21 = vmul.f32 %v7392_v5, %v9509_v42  ;;  %v3930_v5 = vld [vmem:[%s5997_s3 + $0x3b0] sm:$0xff]  ;;  %v9512_v42 = vld [vmem:[#allocation98_spill] sm:$0xff] }
 0x3e7   : > { %v8292_v39 = vpop.permute.xlu0 %3218  ;;  %v3311_v28 = vpop.permute.xlu2 %3310  ;;  %v2832_v18 = vsub.f32 %v3922_v40, %v2760_v26 }
 0x3e8   : > { %v3660_v63 = vadd.f32 %v3311_v28, %v3228_v23  ;;  %v3231_v23 = vmul.f32 %v4135_v2, %v7238_v8  ;;  %v2833_v26 = vsub.f32 %v3923_v61, %v2761_v21  ;;  %v9511_v28 = vld [vmem:[#allocation91_spill] sm:$0xff]  ;;  %v2764_v21 = vmul.f32 %v7487_v13, %v9512_v42 }
 0x3e9   : > { %3480 = vperm.xlu1 %3987, %v2830_v44   ;;  %v2768_v44 = vmul.f32 %v7423_v36, %v9510_v57  ;;  %v2763_v40 = vmul.f32 %v7435_v55, %v9511_v28  ;;  %v3926_v55 = vld [vmem:[%s5997_s3 + $0x390] sm:$0xff]  ;;  %v4136_v61 = vld [vmem:[%s4583_s28 + $0x20] sm:$0xff]  ;;  %v3933_v28 = vld [vmem:[%s5997_s3 + $0x3c8] sm:$0xff] }
 0x3ea   : > { %3732 = vst.msk [vmem:[%s8305_s6 + $0x10] sm:$0xff] %vm848_vm0, %v3660_v63  ;;  %v4137_v2 = vld [vmem:[%s4583_s28 + $0x40] sm:$0xff] }
 0x3eb   : > { %v8309_v49 = vpop.permute.xlu1 %3198  ;;  %v2840_v8 = vsub.f32 %v3930_v5, %v2768_v44  ;;  %v9515_v44 = vld [vmem:[#allocation113_spill] sm:$0xff]  ;;  %v2836_v5 = vsub.f32 %v3926_v55, %v2764_v21  ;;  %v9516_v13 = vld [vmem:[#allocation95_spill] sm:$0xff] }
 0x3ed   : > { %3515 = vperm.xlu0 %3986, %v2837_v7   ;;  %3490 = vperm.xlu2 %3988, %v2832_v18   ;;  %v2835_v18 = vsub.f32 %v3925_v27, %v2763_v40  ;;  %v2766_v40 = vmul.f32 %v7529_v50, %v9516_v13  ;;  %v3928_v27 = vld [vmem:[%s5997_s3 + $0x3a0] sm:$0xff]  ;;  %v9519_v50 = vld [vmem:[#allocation125_spill] sm:$0xff] }
 0x3ef   : > { %v3306_v29 = vpop.permute.xlu0 %3305  ;;  %v3326_v63 = vpop.permute.xlu2 %3325  ;;  %v2838_v55 = vsub.f32 %v3928_v27, %v2766_v40  ;;  %v3936_v27 = vld [vmem:[%s5997_s3 + $0x3e0] sm:$0xff] }
 0x3f0   : > { %v3659_v10 = vadd.f32 %v3306_v29, %v3227_v31  ;;  %v3663_v7 = vadd.f32 %v3326_v63, %v3231_v23  ;;  %v3230_v31 = vmul.f32 %v4136_v61, %v9513_v46  ;;  %v9514_v23 = vld [vmem:[#allocation20_spill] sm:$0xff] }
 0x3f1   : > { %3495 = vperm.xlu1 %3987, %v2833_v26   ;;  %v3234_v29 = vmul.f32 %v4137_v2, %v9514_v23  ;;  %v9518_v61 = vld [vmem:[#allocation104_spill] sm:$0xff]  ;;  %v4139_v23 = vld [vmem:[%s4583_s28 + $0x38] sm:$0xff] }
 0x3f2   : > { %3731 = vst.msk [vmem:[%s8305_s6 + $0x8] sm:$0xff] %vm848_vm0, %v3659_v10  ;;  %v2771_v10 = vmul.f32 %v7516_v17, %v9515_v44  ;;  %v2767_v46 = vmul.f32 %v9519_v50, %v9518_v61  ;;  %v3929_v2 = vld [vmem:[%s5997_s3 + $0x3a8] sm:$0xff]  ;;  %v4140_v44 = vld [vmem:[%s4583_s28 + $0x58] sm:$0xff] }
 0x3f3   : > { %3735 = vst.msk [vmem:[%s8305_s6 + $0x28] sm:$0xff] %vm848_vm0, %v3663_v7  ;;  %v8328_v36 = vpop.permute.xlu1 %3213 }
 0x3f4   : > { %v2843_v17 = vsub.f32 %v3933_v28, %v2771_v10  ;;  %v9521_v10 = vld [vmem:[#allocation88_spill] sm:$0xff]  ;;  %v9522_v28 = vld [vmem:[#allocation43_spill] sm:$0xff] }
 0x3f5   : > { %3530 = vperm.xlu0 %3986, %v2840_v8   ;;  %3505 = vperm.xlu2 %3988, %v2835_v18   ;;  %v4138_v8 = vld [vmem:[%s4583_s28] sm:$0xff]  ;;  %v9517_v18 = vld [vmem:[#allocation121_spill] sm:$0xff]  ;;  %v2774_v13 = vmul.f32 %v7607_v56, %v9522_v28 }
 0x3f6   : > { %v3226_v42 = vmul.f32 %v4138_v8, %v9517_v18 }
 0x3f7   : > { %v3321_v57 = vpop.permute.xlu0 %3320  ;;  %v3341_v63 = vpop.permute.xlu2 %3340  ;;  %v2846_v56 = vsub.f32 %v3936_v27, %v2774_v13  ;;  %v9528_v13 = vld [vmem:[#allocation118_spill] sm:$0xff] }
 0x3f8   : > { %v3662_v26 = vadd.f32 %v3321_v57, %v3230_v31  ;;  %v3666_v7 = vadd.f32 %v3341_v63, %v3234_v29  ;;  %v9520_v29 = vld [vmem:[#allocation122_spill] sm:$0xff]  ;;  %v2839_v63 = vsub.f32 %v3929_v2, %v2767_v46 }
 0x3f9   : > { %3510 = vperm.xlu1 %3987, %v2836_v5   ;;  %v3233_v57 = vmul.f32 %v4139_v23, %v9520_v29  ;;  %v3932_v23 = vld [vmem:[%s5997_s3 + $0x3c0] sm:$0xff]  ;;  %v4142_v29 = vld [vmem:[%s4583_s28 + $0x50] sm:$0xff]  ;;  %v3939_v27 = vld [vmem:[%s5997_s3 + $0x3f8] sm:$0xff] }
 0x3fa   : > { %3734 = vst.msk [vmem:[%s8305_s6 + $0x20] sm:$0xff] %vm848_vm0, %v3662_v26  ;;  %v3237_v26 = vmul.f32 %v4140_v44, %v9521_v10  ;;  %v4143_v10 = vld [vmem:[%s4583_s28 + $0x70] sm:$0xff] }
 0x3fb   : > { %3738 = vst.msk [vmem:[%s8305_s6 + $0x40] sm:$0xff] %vm848_vm0, %v3666_v7  ;;  %v3301_v21 = vpop.permute.xlu1 %3300  ;;  %v9523_v7 = vld [vmem:[#allocation100_spill] sm:$0xff] }
 0x3fc   : > { %v3658_v31 = vadd.f32 %v3301_v21, %v3226_v42  ;;  %v2769_v8 = vmul.f32 %v7619_v60, %v9523_v7  ;;  %v3931_v42 = vld [vmem:[%s5997_s3 + $0x3b8] sm:$0xff] }
 0x3fd   : > { %3545 = vperm.xlu0 %3986, %v2843_v17   ;;  %3520 = vperm.xlu2 %3988, %v2838_v55   ;;  %v4141_v21 = vld [vmem:[%s4583_s28 + $0x18] sm:$0xff]  ;;  %v9524_v55 = vld [vmem:[#allocation141_spill] sm:$0xff] }
 0x3fe   : > { %3730 = vst.msk [vmem:[%s8305_s6] sm:$0xff] %vm848_vm0, %v3658_v31  ;;  %v3229_v61 = vmul.f32 %v4141_v21, %v9524_v55  ;;  %v2841_v46 = vsub.f32 %v3931_v42, %v2769_v8  ;;  %v9525_v31 = vld [vmem:[#allocation115_spill] sm:$0xff]  ;;  %v9529_v7 = vld [vmem:[#allocation106_spill] sm:$0xff]  ;;  %v3934_v42 = vld [vmem:[%s5997_s3 + $0x3d0] sm:$0xff] }
 0x3ff   : > { %v3336_v5 = vpop.permute.xlu0 %3335  ;;  %v3356_v18 = vpop.permute.xlu2 %3355  ;;  %v2770_v60 = vmul.f32 %v7669_v19, %v9525_v31  ;;  %v2777_v19 = vmul.f32 %v7694_v6, %v9528_v13  ;;  %v2772_v8 = vmul.f32 %v7707_v11, %v9529_v7  ;;  %v4144_v21 = vld [vmem:[%s4583_s28 + $0x30] sm:$0xff]  ;;  %v3937_v7 = vld [vmem:[%s5997_s3 + $0x3e8] sm:$0xff] }
 0x400   : > { %v3665_v40 = vadd.f32 %v3336_v5, %v3233_v57  ;;  %v3669_v17 = vadd.f32 %v3356_v18, %v3237_v26  ;;  %v9526_v57 = vld [vmem:[#allocation55_spill] sm:$0xff]  ;;  %v9527_v26 = vld [vmem:[#allocation128_spill] sm:$0xff]  ;;  %v9530_v55 = vld [vmem:[#allocation17_spill] sm:$0xff] }
 0x401   : > { %3525 = vperm.xlu1 %3987, %v2839_v63   ;;  %v3236_v44 = vmul.f32 %v4142_v29, %v9526_v57  ;;  %v3240_v5 = vmul.f32 %v4143_v10, %v9527_v26  ;;  %v2842_v63 = vsub.f32 %v3932_v23, %v2770_v60  ;;  %v2849_v6 = vsub.f32 %v3939_v27, %v2777_v19  ;;  %v3935_v60 = vld [vmem:[%s5997_s3 + $0x3d8] sm:$0xff]  ;;  %v9532_v23 = vld [vmem:[#allocation135_spill] sm:$0xff]  ;;  %v4146_v57 = vld [vmem:[%s4583_s28 + $0x88] sm:$0xff] }
 0x402   : > { %3737 = vst.msk [vmem:[%s8305_s6 + $0x38] sm:$0xff] %vm848_vm0, %v3665_v40  ;;  %v3942_v19 = vld [vmem:[%s5997_s3 + $0x410] sm:$0xff] }
 0x403   : > { %3741 = vst.msk [vmem:[%s8305_s6 + $0x58] sm:$0xff] %vm848_vm0, %v3669_v17  ;;  %v3316_v50 = vpop.permute.xlu1 %3315 }
 0x404   : > { %v3661_v2 = vadd.f32 %v3316_v50, %v3229_v61  ;;  %v3232_v61 = vmul.f32 %v4144_v21, %v9530_v55  ;;  %v2844_v50 = vsub.f32 %v3934_v42, %v2772_v8  ;;  %v9536_v42 = vld [vmem:[#allocation130_spill] sm:$0xff] }
 0x405   : > { %3560 = vperm.xlu0 %3986, %v2846_v56   ;;  %3535 = vperm.xlu2 %3988, %v2841_v46   ;;  %v9531_v46 = vld [vmem:[#allocation46_spill] sm:$0xff] }
 0x406   : > { %3733 = vst.msk [vmem:[%s8305_s6 + $0x18] sm:$0xff] %vm848_vm0, %v3661_v2  ;;  %v2773_v11 = vmul.f32 %v7760_v52, %v9531_v46  ;;  %v4145_v2 = vld [vmem:[%s4583_s28 + $0x68] sm:$0xff]  ;;  %v9538_v46 = vld [vmem:[#allocation129_spill] sm:$0xff] }
 0x407   : > { %v3351_v28 = vpop.permute.xlu0 %3350  ;;  %v3371_v18 = vpop.permute.xlu2 %3370  ;;  %v3239_v29 = vmul.f32 %v4145_v2, %v9532_v23 }
 0x408   : > { %v3668_v40 = vadd.f32 %v3351_v28, %v3236_v44  ;;  %v3672_v17 = vadd.f32 %v3371_v18, %v3240_v5  ;;  %v9533_v44 = vld [vmem:[#allocation99_spill] sm:$0xff]  ;;  %v2845_v13 = vsub.f32 %v3935_v60, %v2773_v11  ;;  %v4147_v18 = vld [vmem:[%s4583_s28 + $0x48] sm:$0xff]  ;;  %v9539_v60 = vld [vmem:[#allocation14_spill] sm:$0xff] }
 0x409   : > { %3540 = vperm.xlu1 %3987, %v2842_v63   ;;  %v3243_v10 = vmul.f32 %v4146_v57, %v9533_v44  ;;  %v9534_v5 = vld [vmem:[#allocation51_spill] sm:$0xff] }
 0x40a   : > { %3740 = vst.msk [vmem:[%s8305_s6 + $0x50] sm:$0xff] %vm848_vm0, %v3668_v40  ;;  %v2780_v52 = vmul.f32 %v7784_v15, %v9534_v5  ;;  %v9535_v40 = vld [vmem:[#allocation116_spill] sm:$0xff] }
 0x40b   : > { %3744 = vst.msk [vmem:[%s8305_s6 + $0x70] sm:$0xff] %vm848_vm0, %v3672_v17  ;;  %v3331_v56 = vpop.permute.xlu1 %3330  ;;  %v2775_v63 = vmul.f32 %v7798_v48, %v9535_v40  ;;  %v3235_v17 = vmul.f32 %v4147_v18, %v9536_v42  ;;  %v9542_v40 = vld [vmem:[#allocation126_spill] sm:$0xff]  ;;  %v3941_v42 = vld [vmem:[%s5997_s3 + $0x408] sm:$0xff] }
 0x40c   : > { %v3664_v31 = vadd.f32 %v3331_v56, %v3232_v61  ;;  %v2852_v15 = vsub.f32 %v3942_v19, %v2780_v52  ;;  %v9537_v61 = vld [vmem:[#allocation49_spill] sm:$0xff]  ;;  %v4150_v19 = vld [vmem:[%s4583_s28 + $0x60] sm:$0xff] }
 0x40d   : > { %3575 = vperm.xlu0 %3986, %v2849_v6   ;;  %3550 = vperm.xlu2 %3988, %v2844_v50   ;;  %v2847_v55 = vsub.f32 %v3937_v7, %v2775_v63  ;;  %v2776_v48 = vmul.f32 %v7841_v16, %v9537_v61  ;;  %v3938_v56 = vld [vmem:[%s5997_s3 + $0x3f0] sm:$0xff]  ;;  %v4148_v50 = vld [vmem:[%s4583_s28 + $0x80] sm:$0xff]  ;;  %v3238_v63 = vmul.f32 %v4150_v19, %v9542_v40 }
 0x40e   : > { %3736 = vst.msk [vmem:[%s8305_s6 + $0x30] sm:$0xff] %vm848_vm0, %v3664_v31  ;;  %v3242_v11 = vmul.f32 %v4148_v50, %v9538_v46  ;;  %v4149_v31 = vld [vmem:[%s4583_s28 + $0xa0] sm:$0xff]  ;;  %v9550_v19 = vld [vmem:[#allocation13_spill] sm:$0xff] }
 0x40f   : > { %v3366_v26 = vpop.permute.xlu0 %3365  ;;  %v3386_v27 = vpop.permute.xlu2 %3385  ;;  %v3246_v2 = vmul.f32 %v4149_v31, %v9539_v60  ;;  %v2848_v44 = vsub.f32 %v3938_v56, %v2776_v48  ;;  %v9545_v61 = vld [vmem:[#allocation131_spill] sm:$0xff]  ;;  %v9546_v56 = vld [vmem:[#allocation57_spill] sm:$0xff]  ;;  %v9547_v31 = vld [vmem:[#allocation50_spill] sm:$0xff] }
 0x410   : > { %v3671_v28 = vadd.f32 %v3366_v26, %v3239_v29  ;;  %v3675_v8 = vadd.f32 %v3386_v27, %v3243_v10  ;;  %v9540_v29 = vld [vmem:[#allocation11_spill] sm:$0xff]  ;;  %v3945_v10 = vld [vmem:[%s5997_s3 + $0x428] sm:$0xff]  ;;  %v9541_v26 = vld [vmem:[#allocation117_spill] sm:$0xff]  ;;  %v2781_v60 = vmul.f32 %v7952_v59, %v9547_v31 }
 0x411   : > { %3555 = vperm.xlu1 %3987, %v2845_v13   ;;  %v2783_v16 = vmul.f32 %v7870_v43, %v9540_v29  ;;  %v2778_v5 = vmul.f32 %v7882_v4, %v9541_v26 }
 0x412   : > { %3743 = vst.msk [vmem:[%s8305_s6 + $0x68] sm:$0xff] %vm848_vm0, %v3671_v28  ;;  %v3940_v28 = vld [vmem:[%s5997_s3 + $0x400] sm:$0xff] }
 0x413   : > { %3747 = vst.msk [vmem:[%s8305_s6 + $0x88] sm:$0xff] %vm848_vm0, %v3675_v8  ;;  %v3346_v21 = vpop.permute.xlu1 %3345  ;;  %v2855_v43 = vsub.f32 %v3945_v10, %v2783_v16  ;;  %v2850_v7 = vsub.f32 %v3940_v28, %v2778_v5  ;;  %v9543_v8 = vld [vmem:[#allocation52_spill] sm:$0xff]  ;;  %v4153_v16 = vld [vmem:[%s4583_s28 + $0x78] sm:$0xff]  ;;  %v3944_v28 = vld [vmem:[%s5997_s3 + $0x420] sm:$0xff] }
 0x414   : > { %v3667_v6 = vadd.f32 %v3346_v21, %v3235_v17  ;;  %v2779_v4 = vmul.f32 %v7918_v53, %v9543_v8  ;;  %v4151_v17 = vld [vmem:[%s4583_s28 + $0x98] sm:$0xff]  ;;  %v2786_v53 = vmul.f32 %v7941_v37, %v9546_v56 }
 0x415   : > { %3590 = vperm.xlu0 %3986, %v2852_v15   ;;  %3565 = vperm.xlu2 %3988, %v2847_v55   ;;  %v9544_v15 = vld [vmem:[#allocation68_spill] sm:$0xff]  ;;  %v4152_v55 = vld [vmem:[%s4583_s28 + $0xb8] sm:$0xff] }
 0x416   : > { %3739 = vst.msk [vmem:[%s8305_s6 + $0x48] sm:$0xff] %vm848_vm0, %v3667_v6  ;;  %v3245_v21 = vmul.f32 %v4151_v17, %v9544_v15  ;;  %v3249_v48 = vmul.f32 %v4152_v55, %v9545_v61  ;;  %v2851_v46 = vsub.f32 %v3941_v42, %v2779_v4  ;;  %v9549_v5 = vld [vmem:[#allocation54_spill] sm:$0xff]  ;;  %v9552_v42 = vld [vmem:[#allocation53_spill] sm:$0xff] }
 0x417   : > { %v3381_v23 = vpop.permute.xlu0 %3380  ;;  %v3401_v52 = vpop.permute.xlu2 %3400  ;;  %v2782_v59 = vmul.f32 %v7981_v54, %v9549_v5  ;;  %v2784_v17 = vmul.f32 %v8012_v22, %v9552_v42  ;;  %v9553_v56 = vld [vmem:[#allocation58_spill] sm:$0xff]  ;;  %v3952_v42 = vld [vmem:[%s5997_s3 + $0x460] sm:$0xff] }
 0x418   : > { %v3674_v57 = vadd.f32 %v3381_v23, %v3242_v11  ;;  %v3678_v13 = vadd.f32 %v3401_v52, %v3246_v2  ;;  %v3948_v11 = vld [vmem:[%s5997_s3 + $0x440] sm:$0xff]  ;;  %v3943_v23 = vld [vmem:[%s5997_s3 + $0x418] sm:$0xff]  ;;  %v2785_v22 = vmul.f32 %v8036_v45, %v9553_v56 }
 0x419   : > { %3570 = vperm.xlu1 %3987, %v2848_v44   ;;  %v2858_v37 = vsub.f32 %v3948_v11, %v2786_v53  ;;  %v2853_v26 = vsub.f32 %v3943_v23, %v2781_v60  ;;  %v2854_v4 = vsub.f32 %v3944_v28, %v2782_v59  ;;  %v9554_v11 = vld [vmem:[#allocation136_spill] sm:$0xff]  ;;  %v9555_v23 = vld [vmem:[#allocation63_spill] sm:$0xff] }
 0x41a   : > { %3746 = vst.msk [vmem:[%s8305_s6 + $0x80] sm:$0xff] %vm848_vm0, %v3674_v57  ;;  %v9548_v57 = vld [vmem:[#allocation38_spill] sm:$0xff]  ;;  %v2792_v45 = vmul.f32 %v8048_v0, %v9555_v23 }
 0x41b   : > { %3750 = vst.msk [vmem:[%s8305_s6 + $0xa0] sm:$0xff] %vm848_vm0, %v3678_v13  ;;  %v3361_v27 = vpop.permute.xlu1 %3360  ;;  %v3241_v44 = vmul.f32 %v4153_v16, %v9548_v57  ;;  %v4154_v13 = vld [vmem:[%s4583_s28 + $0xb0] sm:$0xff] }
 0x41c   : > { %v3670_v18 = vadd.f32 %v3361_v27, %v3238_v63  ;;  %v3248_v40 = vmul.f32 %v4154_v13, %v9550_v19  ;;  %v4155_v63 = vld [vmem:[%s4583_s28 + $0xd0] sm:$0xff] }
 0x41d   : > { %3605 = vperm.xlu0 %3986, %v2855_v43   ;;  %3580 = vperm.xlu2 %3988, %v2850_v7   ;;  %v3252_v43 = vmul.f32 %v4155_v63, %v7936_v58  ;;  %v9551_v7 = vld [vmem:[#allocation60_spill] sm:$0xff]  ;;  %v4156_v58 = vld [vmem:[%s4583_s28 + $0x90] sm:$0xff]  ;;  %v4160_v63 = vld [vmem:[%s4583_s28 + $0xe0] sm:$0xff] }
 0x41e   : > { %3742 = vst.msk [vmem:[%s8305_s6 + $0x60] sm:$0xff] %vm848_vm0, %v3670_v18  ;;  %v2789_v54 = vmul.f32 %v8001_v3, %v9551_v7  ;;  %v3951_v18 = vld [vmem:[%s5997_s3 + $0x458] sm:$0xff]  ;;  %v3244_v61 = vmul.f32 %v4156_v58, %v7924_v62  ;;  %v4158_v62 = vld [vmem:[%s4583_s28 + $0xe8] sm:$0xff]  ;;  %v3954_v57 = vld [vmem:[%s5997_s3 + $0x470] sm:$0xff] }
 0x41f   : > { %v3396_v6 = vpop.permute.xlu0 %3395  ;;  %v3416_v2 = vpop.permute.xlu2 %3415  ;;  %v3255_v60 = vmul.f32 %v4158_v62, %v8015_v14  ;;  %v4159_v14 = vld [vmem:[%s4583_s28 + $0xa8] sm:$0xff]  ;;  %v2864_v0 = vsub.f32 %v3954_v57, %v2792_v45  ;;  %v9557_v13 = vld [vmem:[#allocation61_spill] sm:$0xff]  ;;  %v9561_v62 = vld [vmem:[#allocation111_spill] sm:$0xff] }
 0x420   : > { %v3677_v50 = vadd.f32 %v3396_v6, %v3245_v21  ;;  %v3681_v29 = vadd.f32 %v3416_v2, %v3249_v48  ;;  %v3946_v21 = vld [vmem:[%s5997_s3 + $0x430] sm:$0xff]  ;;  %v2861_v3 = vsub.f32 %v3951_v18, %v2789_v54  ;;  %v3247_v59 = vmul.f32 %v4159_v14, %v7997_v32  ;;  %v4161_v32 = vld [vmem:[%s4583_s28 + $0x100] sm:$0xff] }
 0x421   : > { %3585 = vperm.xlu1 %3987, %v2851_v46   ;;  %v2856_v6 = vsub.f32 %v3946_v21, %v2784_v17  ;;  %v4157_v46 = vld [vmem:[%s4583_s28 + $0xc8] sm:$0xff]  ;;  %v4166_v45 = vld [vmem:[%s4583_s28 + $0x110] sm:$0xff]  ;;  %v9563_v57 = vld [vmem:[#allocation23_spill] sm:$0xff] }
 0x422   : > { %3749 = vst.msk [vmem:[%s8305_s6 + $0x98] sm:$0xff] %vm848_vm0, %v3677_v50  ;;  %v3947_v50 = vld [vmem:[%s5997_s3 + $0x438] sm:$0xff]  ;;  %v3251_v31 = vmul.f32 %v4157_v46, %v9554_v11  ;;  %v4168_v14 = vld [vmem:[%s4583_s28 + $0xf0] sm:$0xff] }
 0x423   : > { %3753 = vst.msk [vmem:[%s8305_s6 + $0xb8] sm:$0xff] %vm848_vm0, %v3681_v29  ;;  %v3376_v10 = vpop.permute.xlu1 %3375  ;;  %v2857_v16 = vsub.f32 %v3947_v50, %v2785_v22  ;;  %v9560_v50 = vld [vmem:[#allocation62_spill] sm:$0xff] }
 0x424   : > { %v3673_v52 = vadd.f32 %v3376_v10, %v3241_v44  ;;  %v9556_v44 = vld [vmem:[#allocation56_spill] sm:$0xff]  ;;  %v3955_v11 = vld [vmem:[%s5997_s3 + $0x478] sm:$0xff] }
 0x425   : > { %3620 = vperm.xlu0 %3986, %v2858_v37   ;;  %3595 = vperm.xlu2 %3988, %v2853_v26   ;;  %v2787_v37 = vmul.f32 %v8055_v25, %v9556_v44  ;;  %v3949_v26 = vld [vmem:[%s5997_s3 + $0x448] sm:$0xff]  ;;  %v2788_v25 = vmul.f32 %v8075_v33, %v9557_v13 }
 0x426   : > { %3745 = vst.msk [vmem:[%s8305_s6 + $0x78] sm:$0xff] %vm848_vm0, %v3673_v52  ;;  %v4169_v13 = vld [vmem:[%s4583_s28 + $0x128] sm:$0xff] }
 0x427   : > { %v3411_v27 = vpop.permute.xlu0 %3410  ;;  %v3431_v15 = vpop.permute.xlu2 %3430  ;;  %v2859_v28 = vsub.f32 %v3949_v26, %v2787_v37 }
 0x428   : > { %v3680_v8 = vadd.f32 %v3411_v27, %v3248_v40  ;;  %v3684_v55 = vadd.f32 %v3431_v15, %v3252_v43  ;;  %v3950_v40 = vld [vmem:[%s5997_s3 + $0x450] sm:$0xff]  ;;  %v3254_v43 = vmul.f32 %v4160_v63, %v8023_v34  ;;  %v3258_v27 = vmul.f32 %v4161_v32, %v8066_v12  ;;  %v4162_v34 = vld [vmem:[%s4583_s28 + $0xc0] sm:$0xff]  ;;  %v9566_v63 = vld [vmem:[#allocation112_spill] sm:$0xff] }
 0x429   : > { %3600 = vperm.xlu1 %3987, %v2854_v4   ;;  %v2860_v33 = vsub.f32 %v3950_v40, %v2788_v25  ;;  %v3250_v12 = vmul.f32 %v4162_v34, %v8057_v51  ;;  %v9565_v25 = vld [vmem:[#allocation140_spill] sm:$0xff] }
 0x42a   : > { %3752 = vst.msk [vmem:[%s8305_s6 + $0xb0] sm:$0xff] %vm848_vm0, %v3680_v8  ;;  %v9558_v8 = vld [vmem:[#allocation59_spill] sm:$0xff]  ;;  %v4170_v40 = vld [vmem:[%s4583_s28 + $0x148] sm:$0xff] }
 0x42b   : > { %3756 = vst.msk [vmem:[%s8305_s6 + $0xd0] sm:$0xff] %vm848_vm0, %v3684_v55  ;;  %v3391_v48 = vpop.permute.xlu1 %3390  ;;  %v2790_v4 = vmul.f32 %v8084_v1, %v9558_v8  ;;  %v9559_v55 = vld [vmem:[#allocation64_spill] sm:$0xff]  ;;  %v9567_v8 = vld [vmem:[#allocation19_spill] sm:$0xff] }
 0x42c   : > { %v3676_v53 = vadd.f32 %v3391_v48, %v3244_v61  ;;  %v2791_v58 = vmul.f32 %v8096_v20, %v9559_v55  ;;  %v3953_v61 = vld [vmem:[%s5997_s3 + $0x468] sm:$0xff]  ;;  %v2793_v20 = vmul.f32 %v8108_v35, %v9560_v50  ;;  %v9562_v35 = vld [vmem:[#allocation107_spill] sm:$0xff]  ;;  %v4176_v50 = vld [vmem:[%s4583_s28 + $0x178] sm:$0xff] }
 0x42d   : > { %3635 = vperm.xlu0 %3986, %v2861_v3   ;;  %3610 = vperm.xlu2 %3988, %v2856_v6   ;;  %v2862_v21 = vsub.f32 %v3952_v42, %v2790_v4  ;;  %v4163_v3 = vld [vmem:[%s4583_s28 + $0xf8] sm:$0xff] }
 0x42e   : > { %3748 = vst.msk [vmem:[%s8305_s6 + $0x90] sm:$0xff] %vm848_vm0, %v3676_v53  ;;  %v3257_v48 = vmul.f32 %v4163_v3, %v8071_v41  ;;  %v4164_v6 = vld [vmem:[%s4583_s28 + $0x118] sm:$0xff]  ;;  %v2863_v53 = vsub.f32 %v3953_v61, %v2791_v58  ;;  %v4174_v3 = vld [vmem:[%s4583_s28 + $0x120] sm:$0xff] }
 0x42f   : > { %v3426_v2 = vpop.permute.xlu0 %3425  ;;  %v3446_v10 = vpop.permute.xlu2 %3445  ;;  %v3261_v51 = vmul.f32 %v4164_v6, %v8099_v47  ;;  %v4165_v41 = vld [vmem:[%s4583_s28 + $0xd8] sm:$0xff] }
 0x430   : > { %v3683_v29 = vadd.f32 %v3426_v2, %v3251_v31  ;;  %v3687_v5 = vadd.f32 %v3446_v10, %v3255_v60  ;;  %v3253_v47 = vmul.f32 %v4165_v41, %v9561_v62  ;;  %v2865_v2 = vsub.f32 %v3955_v11, %v2793_v20  ;;  %v9571_v20 = vld [vmem:[#allocation29_spill] sm:$0xff] }
 0x431   : > { %3615 = vperm.xlu1 %3987, %v2857_v16   ;;  %v4167_v16 = vld [vmem:[%s4583_s28 + $0x130] sm:$0xff] }
 0x432   : > { %3755 = vst.msk [vmem:[%s8305_s6 + $0xc8] sm:$0xff] %vm848_vm0, %v3683_v29  ;;  %v3260_v29 = vmul.f32 %v4166_v45, %v9562_v35  ;;  %v3264_v44 = vmul.f32 %v4167_v16, %v9563_v57  ;;  %v4178_v35 = vld [vmem:[%s4583_s28 + $0x170] sm:$0xff] }
 0x433   : > { %3759 = vst.msk [vmem:[%s8305_s6 + $0xe8] sm:$0xff] %vm848_vm0, %v3687_v5  ;;  %v3406_v52 = vpop.permute.xlu1 %3405  ;;  %v4179_v57 = vld [vmem:[%s4583_s28 + $0x190] sm:$0xff] }
 0x434   : > { %v3679_v19 = vadd.f32 %v3406_v52, %v3247_v59  ;;  %v9564_v59 = vld [vmem:[#allocation132_spill] sm:$0xff] }
 0x435   : > { %3650 = vperm.xlu0 %3986, %v2864_v0   ;;  %3625 = vperm.xlu2 %3988, %v2859_v28   ;;  %v3256_v0 = vmul.f32 %v4168_v14, %v9564_v59  ;;  %v4180_v59 = vld [vmem:[%s4583_s28 + $0x150] sm:$0xff] }
 0x436   : > { %3751 = vst.msk [vmem:[%s8305_s6 + $0xa8] sm:$0xff] %vm848_vm0, %v3679_v19  ;;  %v3263_v19 = vmul.f32 %v4169_v13, %v9565_v25  ;;  %v4181_v25 = vld [vmem:[%s4583_s28 + $0x188] sm:$0xff] }
 0x437   : > { %v3441_v7 = vpop.permute.xlu0 %3440  ;;  %v3461_v18 = vpop.permute.xlu2 %3460 }
 0x438   : > { %v3686_v54 = vadd.f32 %v3441_v7, %v3254_v43  ;;  %v3690_v17 = vadd.f32 %v3461_v18, %v3258_v27  ;;  %v3267_v43 = vmul.f32 %v4170_v40, %v9566_v63  ;;  %v4182_v63 = vld [vmem:[%s4583_s28 + $0x1a8] sm:$0xff] }
 0x439   : > { %3630 = vperm.xlu1 %3987, %v2860_v33   ;;  %v4171_v33 = vld [vmem:[%s4583_s28 + $0x108] sm:$0xff] }
 0x43a   : > { %3758 = vst.msk [vmem:[%s8305_s6 + $0xe0] sm:$0xff] %vm848_vm0, %v3686_v54  ;;  %v3259_v4 = vmul.f32 %v4171_v33, %v9567_v8  ;;  %v4183_v8 = vld [vmem:[%s4583_s28 + $0x168] sm:$0xff] }
 0x43b   : > { %3762 = vst.msk [vmem:[%s8305_s6 + $0x100] sm:$0xff] %vm848_vm0, %v3690_v17  ;;  %v3421_v15 = vpop.permute.xlu1 %3420  ;;  %v4172_v17 = vld [vmem:[%s4583_s28 + $0x140] sm:$0xff] }
 0x43c   : > { %v3682_v1 = vadd.f32 %v3421_v15, %v3250_v12  ;;  %v3266_v34 = vmul.f32 %v4172_v17, %v8139_v38  ;;  %v4173_v12 = vld [vmem:[%s4583_s28 + $0x160] sm:$0xff]  ;;  %v9568_v15 = vld [vmem:[#allocation133_spill] sm:$0xff] }
 0x43d   : > { %3640 = vperm.xlu2 %3988, %v2862_v21   ;;  %v3270_v21 = vmul.f32 %v4173_v12, %v9568_v15  ;;  %v9579_v12 = vld [vmem:[#allocation6_spill] sm:$0xff] }
 0x43e   : > { %3754 = vst.msk [vmem:[%s8305_s6 + $0xc0] sm:$0xff] %vm848_vm0, %v3682_v1 }
 0x43f   : > { %v3456_v56 = vpop.permute.xlu0 %3455  ;;  %v3476_v46 = vpop.permute.xlu2 %3475 }
 0x440   : > { %v3689_v22 = vadd.f32 %v3456_v56, %v3257_v48  ;;  %v3693_v31 = vadd.f32 %v3476_v46, %v3261_v51  ;;  %v9569_v48 = vld [vmem:[#allocation7_spill] sm:$0xff]  ;;  %v4175_v56 = vld [vmem:[%s4583_s28 + $0x158] sm:$0xff]  ;;  %v3273_v46 = vmul.f32 %v4176_v50, %v9571_v20  ;;  %v9582_v50 = vld [vmem:[#allocation72_spill] sm:$0xff] }
 0x441   : > { %3645 = vperm.xlu1 %3987, %v2863_v53   ;;  %v3262_v6 = vmul.f32 %v4174_v3, %v9569_v48 }
 0x442   : > { %3761 = vst.msk [vmem:[%s8305_s6 + $0xf8] sm:$0xff] %vm848_vm0, %v3689_v22  ;;  %v9570_v22 = vld [vmem:[#allocation26_spill] sm:$0xff] }
 0x443   : > { %3765 = vst.msk [vmem:[%s8305_s6 + $0x118] sm:$0xff] %vm848_vm0, %v3693_v31  ;;  %v3436_v60 = vpop.permute.xlu1 %3435  ;;  %v3269_v53 = vmul.f32 %v4175_v56, %v9570_v22 }
 0x444   : > { %v3685_v23 = vadd.f32 %v3436_v60, %v3253_v47  ;;  %v4177_v47 = vld [vmem:[%s4583_s28 + $0x138] sm:$0xff]  ;;  %v9572_v60 = vld [vmem:[#allocation69_spill] sm:$0xff] }
 0x445   : > { %3655 = vperm.xlu2 %3988, %v2865_v2   ;;  %v3265_v2 = vmul.f32 %v4177_v47, %v9572_v60 }
 0x446   : > { %3757 = vst.msk [vmem:[%s8305_s6 + $0xd8] sm:$0xff] %vm848_vm0, %v3685_v23 }
 0x447   : > { %v3471_v37 = vpop.permute.xlu0 %3470  ;;  %v3491_v26 = vpop.permute.xlu2 %3490 }
 0x448   : > { %v3692_v10 = vadd.f32 %v3471_v37, %v3260_v29  ;;  %v3696_v5 = vadd.f32 %v3491_v26, %v3264_v44  ;;  %v9573_v29 = vld [vmem:[#allocation4_spill] sm:$0xff]  ;;  %v9574_v44 = vld [vmem:[#allocation66_spill] sm:$0xff] }
 0x449   : > { %v3272_v16 = vmul.f32 %v4178_v35, %v9573_v29  ;;  %v3276_v37 = vmul.f32 %v4179_v57, %v9574_v44  ;;  %v9585_v57 = vld [vmem:[#allocation9_spill] sm:$0xff] }
 0x44a   : > { %3764 = vst.msk [vmem:[%s8305_s6 + $0x110] sm:$0xff] %vm848_vm0, %v3692_v10 }
 0x44b   : > { %3768 = vst.msk [vmem:[%s8305_s6 + $0x130] sm:$0xff] %vm848_vm0, %v3696_v5  ;;  %v3451_v52 = vpop.permute.xlu1 %3450 }
 0x44c   : > { %v3688_v28 = vadd.f32 %v3451_v52, %v3256_v0  ;;  %v9575_v0 = vld [vmem:[#allocation32_spill] sm:$0xff] }
 0x44d   : > { %v3268_v52 = vmul.f32 %v4180_v59, %v9575_v0 }
 0x44e   : > { %3760 = vst.msk [vmem:[%s8305_s6 + $0xf0] sm:$0xff] %vm848_vm0, %v3688_v28 }
 0x44f   : > { %v3486_v32 = vpop.permute.xlu0 %3485  ;;  %v3506_v7 = vpop.permute.xlu2 %3505 }
 0x450   : > { %v3695_v27 = vadd.f32 %v3486_v32, %v3263_v19  ;;  %v3699_v54 = vadd.f32 %v3506_v7, %v3267_v43  ;;  %v9576_v19 = vld [vmem:[#allocation67_spill] sm:$0xff] }
 0x451   : > { %v3275_v40 = vmul.f32 %v4181_v25, %v9576_v19  ;;  %v9577_v43 = vld [vmem:[#allocation3_spill] sm:$0xff] }
 0x452   : > { %3767 = vst.msk [vmem:[%s8305_s6 + $0x128] sm:$0xff] %vm848_vm0, %v3695_v27  ;;  %v3279_v32 = vmul.f32 %v4182_v63, %v9577_v43  ;;  %v9588_v63 = vld [vmem:[#allocation71_spill] sm:$0xff] }
 0x453   : > { %3771 = vst.msk [vmem:[%s8305_s6 + $0x148] sm:$0xff] %vm848_vm0, %v3699_v54  ;;  %v3466_v18 = vpop.permute.xlu1 %3465 }
 0x454   : > { %v3691_v42 = vadd.f32 %v3466_v18, %v3259_v4  ;;  %v9578_v4 = vld [vmem:[#allocation25_spill] sm:$0xff] }
 0x455   : > { %v3271_v18 = vmul.f32 %v4183_v8, %v9578_v4 }
 0x456   : > { %3763 = vst.msk [vmem:[%s8305_s6 + $0x108] sm:$0xff] %vm848_vm0, %v3691_v42 }
 0x457   : > { %v3501_v55 = vpop.permute.xlu0 %3500  ;;  %v3521_v1 = vpop.permute.xlu2 %3520 }
 0x458   : > { %v3698_v58 = vadd.f32 %v3501_v55, %v3266_v34  ;;  %v3702_v61 = vadd.f32 %v3521_v1, %v3270_v21  ;;  %v4184_v34 = vld [vmem:[%s4583_s28 + $0x1a0] sm:$0xff]  ;;  %v9580_v55 = vld [vmem:[#allocation10_spill] sm:$0xff] }
 0x459   : > { %v3278_v15 = vmul.f32 %v4184_v34, %v9579_v12  ;;  %v4185_v21 = vld [vmem:[%s4583_s28 + $0x1c0] sm:$0xff] }
 0x45a   : > { %3770 = vst.msk [vmem:[%s8305_s6 + $0x140] sm:$0xff] %vm848_vm0, %v3698_v58  ;;  %v3282_v58 = vmul.f32 %v4185_v21, %v9580_v55  ;;  %v9591_v21 = vld [vmem:[#allocation16_spill] sm:$0xff] }
 0x45b   : > { %3774 = vst.msk [vmem:[%s8305_s6 + $0x160] sm:$0xff] %vm848_vm0, %v3702_v61  ;;  %v3481_v38 = vpop.permute.xlu1 %3480 }
 0x45c   : > { %v3694_v51 = vadd.f32 %v3481_v38, %v3262_v6  ;;  %v4186_v6 = vld [vmem:[%s4583_s28 + $0x180] sm:$0xff] }
 0x45d   : > { %v9581_v38 = vld [vmem:[#allocation15_spill] sm:$0xff] }
 0x45e   : > { %3766 = vst.msk [vmem:[%s8305_s6 + $0x120] sm:$0xff] %vm848_vm0, %v3694_v51  ;;  %v3274_v51 = vmul.f32 %v4186_v6, %v9581_v38 }
 0x45f   : > { %v3516_v11 = vpop.permute.xlu0 %3515  ;;  %v3536_v41 = vpop.permute.xlu2 %3535 }
 0x460   : > { %v3701_v31 = vadd.f32 %v3516_v11, %v3269_v53  ;;  %v3705_v62 = vadd.f32 %v3536_v41, %v3273_v46  ;;  %v4187_v53 = vld [vmem:[%s4583_s28 + $0x1b8] sm:$0xff]  ;;  %v9583_v11 = vld [vmem:[#allocation5_spill] sm:$0xff] }
 0x461   : > { %v3281_v20 = vmul.f32 %v4187_v53, %v9582_v50  ;;  %v4188_v46 = vld [vmem:[%s4583_s28 + $0x1d8] sm:$0xff] }
 0x462   : > { %3773 = vst.msk [vmem:[%s8305_s6 + $0x158] sm:$0xff] %vm848_vm0, %v3701_v31  ;;  %v3285_v31 = vmul.f32 %v4188_v46, %v9583_v11  ;;  %v4199_v50 = vld [vmem:[%s4583_s28 + $0x218] sm:$0xff] }
 0x463   : > { %3777 = vst.msk [vmem:[%s8305_s6 + $0x178] sm:$0xff] %vm848_vm0, %v3705_v62  ;;  %v3496_v23 = vpop.permute.xlu1 %3495  ;;  %v4200_v46 = vld [vmem:[%s4583_s28 + $0x238] sm:$0xff] }
 0x464   : > { %v3697_v45 = vadd.f32 %v3496_v23, %v3265_v2  ;;  %v4189_v2 = vld [vmem:[%s4583_s28 + $0x198] sm:$0xff]  ;;  %v9584_v23 = vld [vmem:[#allocation65_spill] sm:$0xff]  ;;  %v3297_v11 = vmul.f32 %v4200_v46, %v8282_v24 }
 0x465   : > { %v4202_v24 = vld [vmem:[%s4583_s28 + $0x230] sm:$0xff] }
 0x466   : > { %3769 = vst.msk [vmem:[%s8305_s6 + $0x138] sm:$0xff] %vm848_vm0, %v3697_v45  ;;  %v3277_v45 = vmul.f32 %v4189_v2, %v9584_v23 }
 0x467   : > { %v3531_v10 = vpop.permute.xlu0 %3530  ;;  %v3551_v5 = vpop.permute.xlu2 %3550 }
 0x468   : > { %v3704_v26 = vadd.f32 %v3531_v10, %v3272_v16  ;;  %v3708_v14 = vadd.f32 %v3551_v5, %v3276_v37  ;;  %v4190_v16 = vld [vmem:[%s4583_s28 + $0x1d0] sm:$0xff] }
 0x469   : > { %v3284_v44 = vmul.f32 %v4190_v16, %v9585_v57  ;;  %v4191_v37 = vld [vmem:[%s4583_s28 + $0x1f0] sm:$0xff] }
 0x46a   : > { %3776 = vst.msk [vmem:[%s8305_s6 + $0x170] sm:$0xff] %vm848_vm0, %v3704_v26  ;;  %v9586_v10 = vld [vmem:[#allocation73_spill] sm:$0xff] }
 0x46b   : > { %3780 = vst.msk [vmem:[%s8305_s6 + $0x190] sm:$0xff] %vm848_vm0, %v3708_v14  ;;  %v3511_v28 = vpop.permute.xlu1 %3510  ;;  %v3288_v26 = vmul.f32 %v4191_v37, %v9586_v10  ;;  %v4203_v16 = vld [vmem:[%s4583_s28 + $0x210] sm:$0xff]  ;;  %v4204_v10 = vld [vmem:[%s4583_s28 + $0x228] sm:$0xff] }
 0x46c   : > { %v3700_v13 = vadd.f32 %v3511_v28, %v3268_v52  ;;  %v4192_v52 = vld [vmem:[%s4583_s28 + $0x1b0] sm:$0xff]  ;;  %v3292_v57 = vmul.f32 %v4203_v16, %v8309_v49 }
 0x46d   : > { %v9587_v28 = vld [vmem:[#allocation21_spill] sm:$0xff] }
 0x46e   : > { %3772 = vst.msk [vmem:[%s8305_s6 + $0x150] sm:$0xff] %vm848_vm0, %v3700_v13  ;;  %v3280_v13 = vmul.f32 %v4192_v52, %v9587_v28 }
 0x46f   : > { %v3546_v27 = vpop.permute.xlu0 %3545  ;;  %v3566_v54 = vpop.permute.xlu2 %3565 }
 0x470   : > { %v3707_v7 = vadd.f32 %v3546_v27, %v3275_v40  ;;  %v3711_v33 = vadd.f32 %v3566_v54, %v3279_v32  ;;  %v4193_v40 = vld [vmem:[%s4583_s28 + $0x1e8] sm:$0xff] }
 0x471   : > { %v3287_v43 = vmul.f32 %v4193_v40, %v9588_v63  ;;  %v4194_v32 = vld [vmem:[%s4583_s28 + $0x208] sm:$0xff] }
 0x472   : > { %3779 = vst.msk [vmem:[%s8305_s6 + $0x188] sm:$0xff] %vm848_vm0, %v3707_v7  ;;  %v9589_v27 = vld [vmem:[#allocation8_spill] sm:$0xff] }
 0x473   : > { %3783 = vst.msk [vmem:[%s8305_s6 + $0x1a8] sm:$0xff] %vm848_vm0, %v3711_v33  ;;  %v3526_v42 = vpop.permute.xlu1 %3525  ;;  %v3291_v7 = vmul.f32 %v4194_v32, %v9589_v27 }
 0x474   : > { %v3703_v17 = vadd.f32 %v3526_v42, %v3271_v18  ;;  %v4195_v18 = vld [vmem:[%s4583_s28 + $0x1c8] sm:$0xff]  ;;  %v9590_v42 = vld [vmem:[#allocation37_spill] sm:$0xff] }
 0x476   : > { %3775 = vst.msk [vmem:[%s8305_s6 + $0x168] sm:$0xff] %vm848_vm0, %v3703_v17  ;;  %v3283_v17 = vmul.f32 %v4195_v18, %v9590_v42 }
 0x477   : > { %v3561_v1 = vpop.permute.xlu0 %3560  ;;  %v3581_v3 = vpop.permute.xlu2 %3580 }
 0x478   : > { %v3710_v61 = vadd.f32 %v3561_v1, %v3278_v15  ;;  %v3714_v48 = vadd.f32 %v3581_v3, %v3282_v58  ;;  %v4196_v15 = vld [vmem:[%s4583_s28 + $0x200] sm:$0xff]  ;;  %v9592_v1 = vld [vmem:[#allocation137_spill] sm:$0xff] }
 0x479   : > { %v3290_v55 = vmul.f32 %v4196_v15, %v9591_v21  ;;  %v4197_v58 = vld [vmem:[%s4583_s28 + $0x220] sm:$0xff] }
 0x47a   : > { %3782 = vst.msk [vmem:[%s8305_s6 + $0x1a0] sm:$0xff] %vm848_vm0, %v3710_v61  ;;  %v3294_v61 = vmul.f32 %v4197_v58, %v9592_v1 }
 0x47b   : > { %3786 = vst.msk [vmem:[%s8305_s6 + $0x1c0] sm:$0xff] %vm848_vm0, %v3714_v48  ;;  %v3541_v56 = vpop.permute.xlu1 %3540 }
 0x47c   : > { %v3706_v22 = vadd.f32 %v3541_v56, %v3274_v51  ;;  %v4198_v51 = vld [vmem:[%s4583_s28 + $0x1e0] sm:$0xff] }
 0x47d   : > { %v3286_v56 = vmul.f32 %v4198_v51, %v8270_v9 }
 0x47e   : > { %3778 = vst.msk [vmem:[%s8305_s6 + $0x180] sm:$0xff] %vm848_vm0, %v3706_v22 }
 0x47f   : > { %v3576_v41 = vpop.permute.xlu0 %3575  ;;  %v3596_v47 = vpop.permute.xlu2 %3595 }
 0x480   : > { %v3713_v62 = vadd.f32 %v3576_v41, %v3281_v20  ;;  %v3717_v60 = vadd.f32 %v3596_v47, %v3285_v31  ;;  %v3293_v20 = vmul.f32 %v4199_v50, %v8275_v30  ;;  %v4201_v47 = vld [vmem:[%s4583_s28 + $0x1f8] sm:$0xff] }
 0x482   : > { %3785 = vst.msk [vmem:[%s8305_s6 + $0x1b8] sm:$0xff] %vm848_vm0, %v3713_v62 }
 0x483   : > { %3789 = vst.msk [vmem:[%s8305_s6 + $0x1d8] sm:$0xff] %vm848_vm0, %v3717_v60  ;;  %v3556_v35 = vpop.permute.xlu1 %3555  ;;  %v9593_v60 = vld [vmem:[#allocation28_spill] sm:$0xff] }
 0x484   : > { %v3709_v29 = vadd.f32 %v3556_v35, %v3277_v45  ;;  %v3289_v2 = vmul.f32 %v4201_v47, %v9593_v60  ;;  %v3296_v45 = vmul.f32 %v4202_v24, %v8292_v39 }
 0x486   : > { %3781 = vst.msk [vmem:[%s8305_s6 + $0x198] sm:$0xff] %vm848_vm0, %v3709_v29 }
 0x487   : > { %v3591_v5 = vpop.permute.xlu0 %3590  ;;  %v3611_v59 = vpop.permute.xlu2 %3610 }
 0x488   : > { %v3716_v14 = vadd.f32 %v3591_v5, %v3284_v44  ;;  %v3720_v0 = vadd.f32 %v3611_v59, %v3288_v26  ;;  %v3295_v26 = vmul.f32 %v4204_v10, %v8328_v36 }
 0x48a   : > { %3788 = vst.msk [vmem:[%s8305_s6 + $0x1d0] sm:$0xff] %vm848_vm0, %v3716_v14 }
 0x48b   : > { %3792 = vst.msk [vmem:[%s8305_s6 + $0x1f0] sm:$0xff] %vm848_vm0, %v3720_v0  ;;  %v3571_v25 = vpop.permute.xlu1 %3570 }
 0x48c   : > { %v3712_v19 = vadd.f32 %v3571_v25, %v3280_v13 }
 0x48e   : > { %3784 = vst.msk [vmem:[%s8305_s6 + $0x1b0] sm:$0xff] %vm848_vm0, %v3712_v19 }
 0x48f   : > { %v3606_v54 = vpop.permute.xlu0 %3605  ;;  %v3626_v8 = vpop.permute.xlu2 %3625 }
 0x490   : > { %v3719_v33 = vadd.f32 %v3606_v54, %v3287_v43  ;;  %v3723_v4 = vadd.f32 %v3626_v8, %v3291_v7 }
 0x492   : > { %3791 = vst.msk [vmem:[%s8305_s6 + $0x1e8] sm:$0xff] %vm848_vm0, %v3719_v33 }
 0x493   : > { %3795 = vst.msk [vmem:[%s8305_s6 + $0x208] sm:$0xff] %vm848_vm0, %v3723_v4  ;;  %v3586_v34 = vpop.permute.xlu1 %3585 }
 0x494   : > { %v3715_v12 = vadd.f32 %v3586_v34, %v3283_v17 }
 0x496   : > { %3787 = vst.msk [vmem:[%s8305_s6 + $0x1c8] sm:$0xff] %vm848_vm0, %v3715_v12 }
 0x497   : > { %v3621_v3 = vpop.permute.xlu0 %3620  ;;  %v3641_v6 = vpop.permute.xlu2 %3640 }
 0x498   : > { %v3722_v48 = vadd.f32 %v3621_v3, %v3290_v55  ;;  %v3726_v38 = vadd.f32 %v3641_v6, %v3294_v61 }
 0x49a   : > { %3794 = vst.msk [vmem:[%s8305_s6 + $0x200] sm:$0xff] %vm848_vm0, %v3722_v48 }
 0x49b   : > { %3798 = vst.msk [vmem:[%s8305_s6 + $0x220] sm:$0xff] %vm848_vm0, %v3726_v38  ;;  %v3601_v22 = vpop.permute.xlu1 %3600 }
 0x49c   : > { %v3718_v53 = vadd.f32 %v3601_v22, %v3286_v56 }
 0x49e   : > { %3790 = vst.msk [vmem:[%s8305_s6 + $0x1e0] sm:$0xff] %vm848_vm0, %v3718_v53 }
 0x49f   : > { %v3636_v31 = vpop.permute.xlu0 %3635  ;;  %v3656_v9 = vpop.permute.xlu2 %3655 }
 0x4a0   : > { %v3725_v41 = vadd.f32 %v3636_v31, %v3293_v20  ;;  %v3729_v62 = vadd.f32 %v3656_v9, %v3297_v11 }
 0x4a2   : > { %3797 = vst.msk [vmem:[%s8305_s6 + $0x218] sm:$0xff] %vm848_vm0, %v3725_v41 }
 0x4a3   : > { %3801 = vst.msk [vmem:[%s8305_s6 + $0x238] sm:$0xff] %vm848_vm0, %v3729_v62  ;;  %v3616_v30 = vpop.permute.xlu1 %3615 }
 0x4a4   : > { %v3721_v23 = vadd.f32 %v3616_v30, %v3289_v2 }
 0x4a6   : > { %3793 = vst.msk [vmem:[%s8305_s6 + $0x1f8] sm:$0xff] %vm848_vm0, %v3721_v23 }
 0x4a7   : > { %v3651_v35 = vpop.permute.xlu0 %3650 }
 0x4a8   : > { %v3728_v29 = vadd.f32 %v3651_v35, %v3296_v45 }
 0x4aa   : > { %3800 = vst.msk [vmem:[%s8305_s6 + $0x230] sm:$0xff] %vm848_vm0, %v3728_v29 }
 0x4ab   : > { %v3631_v44 = vpop.permute.xlu1 %3630 }
 0x4ac   : > { %v3724_v37 = vadd.f32 %v3631_v44, %v3292_v57 }
 0x4ae   : > { %3796 = vst.msk [vmem:[%s8305_s6 + $0x210] sm:$0xff] %vm848_vm0, %v3724_v37 }
 0x4b3   : > { %v3646_v5 = vpop.permute.xlu1 %3645 }
 0x4b4   : > { %v3727_v14 = vadd.f32 %v3646_v5, %v3295_v26 }
 0x4b6   : > { %3799 = vst.msk [vmem:[%s8305_s6 + $0x228] sm:$0xff] %vm848_vm0, %v3727_v14 }
 0x4b7 PF: > { %p9_p9 = scmp.ge.s32.totalorder %s4262_s13, 6   ;;  %s9594_s9 = smov %s4223_s10 }
 0x4b8   : > { %s9595_s10 = smov %s4271_s16  ;;  %s9596_s11 = smov %s4262_s13 }
 0x4b9   :  { %11 = sbr.rel (!%p9_p9) target bundleno = 2 (0x2), region = 105 }

</bundles_post_ra>
